<compile_context>
chip_gen: v7x
topology: tpu7x:2x2x1
jax: 0.10.0
libtpu: 0.0.40
codegen_flags: <defaults>
</compile_context>

<pallas_src>
import math

import jax
import jax.numpy as jnp
from jax.experimental import pallas as pl
from jax.experimental.pallas import tpu as pltpu

# ---------------- small synthetic config (consistent with the module) ----------------
B = 2            # batch
S = 8            # sequence length
H = 32           # hidden_size
NH = 4           # num_attention_heads
DH = H // NH     # n_embd (head dim)
L = 2            # num_hidden_layers
P = 4            # pre_seq_len (prefix length)
FF = 64          # intermediate FFN size
VOCAB = 100
NUM_LABELS = 5
CPAD = 128       # classifier lane-padded width (lane-dense output)
MAX_POS = 64
IGNORE_INDEX = -100
LN_EPS = 1e-12
PACK_W = 128     # lane width of the packed parameter slab

# MXU input dtype.  f32 for bit-fidelity at toy sizes; switch to jnp.bfloat16 when this
# template is scaled to real BERT dims (f32 accumulation kept via preferred_element_type).
MXU_DTYPE = jnp.float32


# --------------------------- packed parameter slab layout ----------------------------
def _param_layout():
    """Static row offsets of every parameter inside the (ROWS, 128) f32 slab."""
    entries = [("word_emb", VOCAB, H), ("pos_emb", MAX_POS, H),
               ("type_emb", 2, H), ("emb_ln", 2, H)]
    for l in range(L):
        entries += [
            (f"wqkv{l}", H, 3 * H), (f"bqkv{l}", 1, 3 * H),
            (f"wo{l}", H, H), (f"bo{l}", 1, H), (f"ln1{l}", 2, H),
            (f"w1{l}", H, FF), (f"b1{l}", 1, FF),
            (f"w2{l}", FF, H), (f"b2{l}", 1, H), (f"ln2{l}", 2, H),
            (f"pk{l}", P, H), (f"pv{l}", P, H),          # lane-dense prefix K / V
        ]
    entries += [("wc", H, CPAD), ("bc", 1, CPAD)]
    offsets, row = {}, 0
    for name, r, c in entries:
        offsets[name] = (row, r, c)
        row += -(-r // 8) * 8                            # 8-row align each entry
    return offsets, row


_OFFSETS, _SLAB_ROWS = _param_layout()


# ------------------------------ fused whole-forward kernel ---------------------------
def _fused_forward_kernel(w_ref, tok_ref, amask_ref, logits_ref, loss_ref,
                          q_scr, k_scr, v_scr):
    f32 = jnp.float32

    def get(name, rows=None, row_off=0):
        r0, r, c = _OFFSETS[name]
        rr = r if rows is None else rows
        return w_ref[r0 + row_off:r0 + row_off + rr, 0:c]

    def matmul(x, w):
        return jnp.dot(x.astype(MXU_DTYPE), w.astype(MXU_DTYPE),
                       preferred_element_type=f32)

    def layernorm(x, gb):                                # gb: (2, H) = [gamma; beta]
        mean = jnp.mean(x, axis=-1, keepdims=True)
        var = jnp.mean((x - mean) ** 2, axis=-1, keepdims=True)
        return (x - mean) * jax.lax.rsqrt(var + LN_EPS) * gb[0:1, :] + gb[1:2, :]

    def gelu_erf(x):
        # exact-erf BERT GELU via Abramowitz-Stegun 7.1.26 (|err| <= 1.5e-7); only uses
        # exp / mul / div, all of which lower cleanly (EUP + VPU).
        z = x * 0.7071067811865476
        az = jnp.abs(z)
        t = 1.0 / (1.0 + 0.3275911 * az)
        poly = ((((1.061405429 * t - 1.453152027) * t + 1.421413741) * t
                 - 0.284496736) * t + 0.254829592) * t
        erf_abs = 1.0 - poly * jnp.exp(-az * az)
        erf = jnp.where(z >= 0.0, erf_abs, -erf_abs)
        return 0.5 * x * (1.0 + erf)

    # ---- packed int token data: [input_id | token_type | label | attn_mask] ----
    ids = tok_ref[:, 0:1]
    tt = tok_ref[:, 1:2]
    lbl = tok_ref[:, 2:3]
    msk = tok_ref[:, 3:4]

    # ---- BERT embeddings, entirely in-kernel ----
    # word: one-hot (B*S, VOCAB) @ (VOCAB, H) on the MXU
    viota = jax.lax.broadcasted_iota(jnp.int32, (B * S, VOCAB), 1)
    word = matmul((viota == ids).astype(f32), get("word_emb"))
    # positions: HF BertModel offsets position_ids by past_key_values_length (= pre_seq_len
    # P here, since prefix past_key_values are passed) -> rows P .. P+S-1, tiled over batch.
    pos_rows = get("pos_emb", rows=S, row_off=P)                      # (S, H)
    pos = jnp.concatenate([pos_rows] * B, axis=0)                     # (B*S, H)
    # token type: 2-way select between the two embedding rows
    te = get("type_emb")
    tt_f = tt.astype(f32)
    typ = te[0:1, :] * (1.0 - tt_f) + te[1:2, :] * tt_f               # (B*S, H)
    h = layernorm(word + pos + typ, get("emb_ln"))                    # (B*S, H)

    # ---- HF extended attention mask over keys, ordered [seq keys | prefix keys];
    #      the prefix columns correspond to the all-ones prefix_attention_mask -> 0. ----
    am_seq = (1.0 - amask_ref[...].astype(f32)) * -10000.0            # (B, 1, S)
    am_full = jnp.concatenate([am_seq, jnp.zeros((B, 1, P), f32)], axis=2)   # (B, 1, S+P)
    am_b = jnp.concatenate([am_full] * NH, axis=0)                    # (NH*B, 1, S+P)

    scale = 1.0 / math.sqrt(DH)

    # ---- encoder layers: static unroll, everything VMEM-resident ----
    for l in range(L):
        # fused Q|K|V projection (single MXU matmul)
        qkv = matmul(h, get(f"wqkv{l}")) + get(f"bqkv{l}")            # (B*S, 3H)
        pk_l = get(f"pk{l}")                                          # (P, H) lane-dense
        pv_l = get(f"pv{l}")

        # stage into head-major scratches; key axis = [sequence (S) ; prefix (P)]
        # (softmax is order invariant, and offset-0 seq stores stay sublane-tile aligned)
        for hh in range(NH):
            c0 = hh * DH
            q_scr[hh] = qkv[:, c0:c0 + DH].reshape(B, S, DH)
            k_scr[hh, :, 0:S, :] = qkv[:, H + c0:H + c0 + DH].reshape(B, S, DH)
            v_scr[hh, :, 0:S, :] = qkv[:, 2 * H + c0:2 * H + c0 + DH].reshape(B, S, DH)
            k_scr[hh, :, S:S + P, :] = jnp.broadcast_to(
                pk_l[:, c0:c0 + DH][None], (B, P, DH))
            v_scr[hh, :, S:S + P, :] = jnp.broadcast_to(
                pv_l[:, c0:c0 + DH][None], (B, P, DH))

        qh = q_scr[...].reshape(NH * B, S, DH)
        kf = k_scr[...].reshape(NH * B, S + P, DH)
        vf = v_scr[...].reshape(NH * B, S + P, DH)

        # one batched score einsum + one softmax over all (head, batch, query) rows
        s = jnp.einsum('bqd,bkd->bqk', qh.astype(MXU_DTYPE), kf.astype(MXU_DTYPE),
                       preferred_element_type=f32) * scale + am_b     # (NH*B, S, S+P)
        m = jnp.max(s, axis=-1, keepdims=True)
        e = jnp.exp(s - m)
        prob = e * pl.reciprocal(jnp.sum(e, axis=-1, keepdims=True), approx=True)
        ctx = jnp.einsum('bqk,bkd->bqd', prob.astype(MXU_DTYPE), vf.astype(MXU_DTYPE),
                         preferred_element_type=f32)                  # (NH*B, S, DH)

        # reassemble heads lane-dense and apply W_O with a single matmul
        ctx2d = jnp.concatenate(
            [ctx[hh * B:(hh + 1) * B].reshape(B * S, DH) for hh in range(NH)], axis=1)
        attn = matmul(ctx2d, get(f"wo{l}")) + get(f"bo{l}")           # (B*S, H)
        h = layernorm(attn + h, get(f"ln1{l}"))

        # FFN with exact-erf GELU
        ffn = gelu_erf(matmul(h, get(f"w1{l}")) + get(f"b1{l}"))
        h = layernorm(matmul(ffn, get(f"w2{l}")) + get(f"b2{l}") + h, get(f"ln2{l}"))

    # ---- classifier head, lane-dense (classes padded to CPAD=128) ----
    logits = matmul(h, get("wc")) + get("bc")                         # (B*S, CPAD)
    logits_ref[...] = logits

    # ---- masked token-level cross-entropy (ignore_index=-100), labels masked in-kernel ----
    active_lbl = jnp.where(msk == 1, lbl, IGNORE_INDEX)               # (B*S, 1)
    cls = jax.lax.broadcasted_iota(jnp.int32, (B * S, CPAD), 1)
    z = jnp.where(cls < NUM_LABELS, logits, -1e30)                    # mask padded classes
    zm = jnp.max(z, axis=-1, keepdims=True)
    lse = jnp.log(jnp.sum(jnp.exp(z - zm), axis=-1, keepdims=True)) + zm
    onehot = (cls == active_lbl).astype(jnp.float32)
    per_row = -jnp.sum(onehot * (z - lse), axis=-1, keepdims=True)    # (B*S, 1)
    valid = (active_lbl != IGNORE_INDEX).astype(jnp.float32)
    loss_sum = jnp.sum(per_row * valid, axis=(0, 1), keepdims=True)   # (1, 1)
    count = jnp.sum(valid, axis=(0, 1), keepdims=True)
    # count == 0 -> 0/0 = NaN, matching torch CrossEntropyLoss(mean) on all-ignored input.
    loss_ref[...] = loss_sum / count


def _full_spec(shape):
    zeros = (0,) * len(shape)
    return pl.BlockSpec(tuple(shape), lambda i, _z=zeros: _z)


def _fused_call(slab, tok, amask3):
    # grid=(1,): every operand is a single whole-array VMEM block (total < 1 MB).
    # TODO(synk): at real BERT dims (H=768, L=12) replace grid=(1,) with a layer grid
    # ('arbitrary') + a parallel row-tile axis, bf16 MXU inputs, and an explicit
    # vmem_limit_bytes (v5e default scoped VMEM is only 16 MiB; v7x has 64 MiB total).
    return pl.pallas_call(
        _fused_forward_kernel,
        out_shape=(jax.ShapeDtypeStruct((B * S, CPAD), jnp.float32),
                   jax.ShapeDtypeStruct((1, 1), jnp.float32)),
        grid=(1,),
        in_specs=[_full_spec(slab.shape), _full_spec(tok.shape), _full_spec(amask3.shape)],
        out_specs=(_full_spec((B * S, CPAD)), _full_spec((1, 1))),
        scratch_shapes=[pltpu.VMEM((NH, B, S, DH), jnp.float32),       # q (head-major)
                        pltpu.VMEM((NH, B, S + P, DH), jnp.float32),   # k = [seq ; prefix]
                        pltpu.VMEM((NH, B, S + P, DH), jnp.float32)],  # v = [seq ; prefix]
        compiler_params=pltpu.CompilerParams(dimension_semantics=("arbitrary",)),
    )(slab, tok, amask3)


# ------------------------------ parameters (deterministic) ---------------------------
def init_params(key):
    keys = iter(jax.random.split(key, 32))

    def normal(shape, scale=0.02):
        return (scale * jax.random.normal(next(keys), shape)).astype(jnp.float32)

    slab = jnp.zeros((_SLAB_ROWS, PACK_W), jnp.float32)

    def put(s, name, arr):
        r0, r, c = _OFFSETS[name]
        return s.at[r0:r0 + r, 0:c].set(jnp.asarray(arr, jnp.float32).reshape(r, c))

    ln_rows = jnp.concatenate([jnp.ones((1, H)), jnp.zeros((1, H))], axis=0)

    slab = put(slab, "word_emb", normal((VOCAB, H)))
    slab = put(slab, "pos_emb", normal((MAX_POS, H)))
    slab = put(slab, "type_emb", normal((2, H)))
    slab = put(slab, "emb_ln", ln_rows)

    # PrefixEncoder (prefix_projection=False): Embedding(pre_seq_len, 2*L*H).
    # get_prompt()'s view/permute/split is parameter-only in eval (dropout=identity,
    # batch dim a pure broadcast), so fold it into lane-dense per-layer (P, H) K / V:
    # columns [2l*H, (2l+1)*H) are layer-l keys, [(2l+1)*H, (2l+2)*H) are values.
    prefix_emb = normal((P, 2 * L * H))

    for l in range(L):
        slab = put(slab, f"wqkv{l}", normal((H, 3 * H)))   # fused Q|K|V (== separate wq/wk/wv)
        slab = put(slab, f"bqkv{l}", jnp.zeros((1, 3 * H)))
        slab = put(slab, f"wo{l}", normal((H, H)))
        slab = put(slab, f"bo{l}", jnp.zeros((1, H)))
        slab = put(slab, f"ln1{l}", ln_rows)
        slab = put(slab, f"w1{l}", normal((H, FF)))
        slab = put(slab, f"b1{l}", jnp.zeros((1, FF)))
        slab = put(slab, f"w2{l}", normal((FF, H)))
        slab = put(slab, f"b2{l}", jnp.zeros((1, H)))
        slab = put(slab, f"ln2{l}", ln_rows)
        slab = put(slab, f"pk{l}", prefix_emb[:, (2 * l) * H:(2 * l + 1) * H])
        slab = put(slab, f"pv{l}", prefix_emb[:, (2 * l + 1) * H:(2 * l + 2) * H])

    # classifier padded to CPAD lanes (zeros in pad columns -> exact real logits)
    wc = normal((H, NUM_LABELS))
    wc_pad = jnp.zeros((H, CPAD), jnp.float32).at[:, :NUM_LABELS].set(wc)
    slab = put(slab, "wc", wc_pad)
    slab = put(slab, "bc", jnp.zeros((1, CPAD)))
    return slab


# -------------------------------------- forward ---------------------------------------
def bert_prefix_forward(slab, input_ids, attention_mask, token_type_ids, labels):
    batch, seq = input_ids.shape            # static under jit; kernel specialized to B, S

    # pack all int token data into one small buffer: [id | type | label | attn_mask]
    tok = jnp.stack([input_ids.reshape(-1), token_type_ids.reshape(-1),
                     labels.reshape(-1), attention_mask.reshape(-1)],
                    axis=1).astype(jnp.int32)                              # (B*S, 4)
    amask3 = attention_mask.reshape(batch, 1, seq).astype(jnp.int32)       # (B, 1, S)

    logits_pad, loss = _fused_call(slab, tok, amask3)
    logits = logits_pad[:, :NUM_LABELS].reshape(batch, seq, NUM_LABELS)
    return logits, loss[0, 0]


@jax.jit
def token_classification_forward(slab, data):
    logits, loss = bert_prefix_forward(
        slab, data["input_ids"], data["attention_mask"],
        data["token_type_ids"], data["labels"])
    # matches: return ([data['labels']], [logits], [logits], [loss])
    return ([data["labels"]], [logits], [logits], [loss])


# TODO(synk): the LSTM branch of TokenClassificationModel (LSTM encoder + h_n mean +
# MLP classifier) is not implemented here; only the transformer (P-Tuning v2 prefix)
# branch is.

if __name__ == "__main__":
    key = jax.random.PRNGKey(0)
    pkey, ikey, lkey = jax.random.split(key, 3)
    slab = init_params(pkey)

    input_ids = jax.random.randint(ikey, (B, S), 0, VOCAB, dtype=jnp.int32)
    token_type_ids = jnp.zeros((B, S), jnp.int32)
    attention_mask = jnp.ones((B, S), jnp.int32).at[1, S - 2:].set(0)  # pad tail of batch 1
    labels = jax.random.randint(lkey, (B, S), 0, NUM_LABELS, dtype=jnp.int32)

    data = dict(input_ids=input_ids, attention_mask=attention_mask,
                token_type_ids=token_type_ids, labels=labels)

    out_labels, out_logits, out_logits2, out_loss = token_classification_forward(slab, data)
    jax.block_until_ready((out_logits[0], out_loss[0]))

    assert out_logits[0].shape == (B, S, NUM_LABELS)
    assert out_loss[0].shape == ()
    assert bool(jnp.isfinite(out_loss[0]))
    print("KERNEL_OK")
</pallas_src>

<mosaic_0001>
module attributes {stable_mosaic.version = 11 : i64} {
  func.func @_fused_forward_kernel(%arg0: i32, %arg1: memref<672x128xf32, #tpu.memory_space<vmem>>, %arg2: memref<16x4xi32, #tpu.memory_space<vmem>>, %arg3: memref<2x1x8xi32, #tpu.memory_space<vmem>>, %arg4: memref<16x128xf32, #tpu.memory_space<vmem>>, %arg5: memref<1x1xf32, #tpu.memory_space<vmem>>, %arg6: memref<4x2x8x8xf32, #tpu.memory_space<vmem>>, %arg7: memref<4x2x12x8xf32, #tpu.memory_space<vmem>>, %arg8: memref<4x2x12x8xf32, #tpu.memory_space<vmem>>) attributes {dimension_semantics = [#tpu.dimension_semantics<arbitrary>], iteration_bounds = array<i64: 1>, scalar_prefetch = 0 : i64, scratch_operands = 3 : i64, tpu.core_type = #tpu.core_type<tc>, window_params = [{pipeline_mode = #tpu.pipeline_mode<synchronous>, transform_indices = @transform_0, window_bounds = array<i64: 672, 128>}, {pipeline_mode = #tpu.pipeline_mode<synchronous>, transform_indices = @transform_1, window_bounds = array<i64: 16, 4>}, {pipeline_mode = #tpu.pipeline_mode<synchronous>, transform_indices = @transform_2, window_bounds = array<i64: 2, 1, 8>}, {pipeline_mode = #tpu.pipeline_mode<synchronous>, transform_indices = @transform_3, window_bounds = array<i64: 16, 128>}, {pipeline_mode = #tpu.pipeline_mode<synchronous>, transform_indices = @transform_4, window_bounds = array<i64: 1, 1>}]} {
    %c0 = arith.constant 0 : index
    %c0_0 = arith.constant 0 : index
    %0 = vector.load %arg2[%c0, %c0_0] : memref<16x4xi32, #tpu.memory_space<vmem>>, vector<16x1xi32>
    %c0_1 = arith.constant 0 : index
    %c1 = arith.constant 1 : index
    %1 = vector.load %arg2[%c0_1, %c1] : memref<16x4xi32, #tpu.memory_space<vmem>>, vector<16x1xi32>
    %c0_2 = arith.constant 0 : index
    %c2 = arith.constant 2 : index
    %2 = vector.load %arg2[%c0_2, %c2] : memref<16x4xi32, #tpu.memory_space<vmem>>, vector<16x1xi32>
    %c0_3 = arith.constant 0 : index
    %c3 = arith.constant 3 : index
    %3 = vector.load %arg2[%c0_3, %c3] : memref<16x4xi32, #tpu.memory_space<vmem>>, vector<16x1xi32>
    %4 = tpu.iota {dimensions = array<i32: 1>} : vector<16x100xi32>
    %5 = vector.broadcast %0 : vector<16x1xi32> to vector<16x100xi32>
    %6 = arith.cmpi eq, %4, %5 : vector<16x100xi32>
    %7 = arith.extui %6 : vector<16x100xi1> to vector<16x100xi32>
    %8 = arith.sitofp %7 : vector<16x100xi32> to vector<16x100xf32>
    %c0_4 = arith.constant 0 : index
    %c0_5 = arith.constant 0 : index
    %9 = vector.load %arg1[%c0_4, %c0_5] : memref<672x128xf32, #tpu.memory_space<vmem>>, vector<100x32xf32>
    %cst = arith.constant dense<0.000000e+00> : vector<16x32xf32>
    %10 = tpu.matmul %8, %9, %cst {dimension_numbers = #tpu.dot_dimension_numbers<[1], [0], [0], [1], [0, 0, 1, 1], [], []>} : vector<16x100xf32>, vector<100x32xf32>, vector<16x32xf32> -> vector<16x32xf32>
    %c108 = arith.constant 108 : index
    %c0_6 = arith.constant 0 : index
    %11 = vector.load %arg1[%c108, %c0_6] : memref<672x128xf32, #tpu.memory_space<vmem>>, vector<8x32xf32>
    %12 = tpu.concatenate %11, %11 in 0 : vector<8x32xf32>, vector<8x32xf32> -> vector<16x32xf32>
    %c168 = arith.constant 168 : index
    %c0_7 = arith.constant 0 : index
    %13 = vector.load %arg1[%c168, %c0_7] : memref<672x128xf32, #tpu.memory_space<vmem>>, vector<2x32xf32>
    %14 = arith.sitofp %1 : vector<16x1xi32> to vector<16x1xf32>
    %15 = vector.extract_strided_slice %13 {offsets = [0, 0], sizes = [1, 32], strides = [1, 1]} : vector<2x32xf32> to vector<1x32xf32>
    %cst_8 = arith.constant 1.000000e+00 : f32
    %16 = vector.broadcast %cst_8 : f32 to vector<16x1xf32>
    %17 = arith.subf %16, %14 : vector<16x1xf32>
    %18 = vector.broadcast %15 : vector<1x32xf32> to vector<16x32xf32>
    %19 = vector.broadcast %17 : vector<16x1xf32> to vector<16x32xf32>
    %20 = arith.mulf %18, %19 : vector<16x32xf32>
    %21 = vector.extract_strided_slice %13 {offsets = [1, 0], sizes = [1, 32], strides = [1, 1]} : vector<2x32xf32> to vector<1x32xf32>
    %22 = vector.broadcast %21 : vector<1x32xf32> to vector<16x32xf32>
    %23 = vector.broadcast %14 : vector<16x1xf32> to vector<16x32xf32>
    %24 = arith.mulf %22, %23 : vector<16x32xf32>
    %25 = arith.addf %20, %24 : vector<16x32xf32>
    %26 = arith.addf %10, %12 : vector<16x32xf32>
    %27 = arith.addf %26, %25 : vector<16x32xf32>
    %c176 = arith.constant 176 : index
    %c0_9 = arith.constant 0 : index
    %28 = vector.load %arg1[%c176, %c0_9] : memref<672x128xf32, #tpu.memory_space<vmem>>, vector<2x32xf32>
    %cst_10 = arith.constant dense<0.000000e+00> : vector<16xf32>
    %29 = vector.multi_reduction <add>, %27, %cst_10 [1] : vector<16x32xf32> to vector<16xf32>
    %30 = vector.shape_cast %29 : vector<16xf32> to vector<16x1xf32>
    %cst_11 = arith.constant 3.200000e+01 : f32
    %31 = vector.broadcast %cst_11 : f32 to vector<16x1xf32>
    %32 = arith.divf %30, %31 : vector<16x1xf32>
    %33 = vector.broadcast %32 : vector<16x1xf32> to vector<16x32xf32>
    %34 = arith.subf %27, %33 : vector<16x32xf32>
    %35 = arith.mulf %34, %34 : vector<16x32xf32>
    %cst_12 = arith.constant dense<0.000000e+00> : vector<16xf32>
    %36 = vector.multi_reduction <add>, %35, %cst_12 [1] : vector<16x32xf32> to vector<16xf32>
    %37 = vector.shape_cast %36 : vector<16xf32> to vector<16x1xf32>
    %cst_13 = arith.constant 3.200000e+01 : f32
    %38 = vector.broadcast %cst_13 : f32 to vector<16x1xf32>
    %39 = arith.divf %37, %38 : vector<16x1xf32>
    %40 = vector.broadcast %32 : vector<16x1xf32> to vector<16x32xf32>
    %41 = arith.subf %27, %40 : vector<16x32xf32>
    %cst_14 = arith.constant 9.99999996E-13 : f32
    %42 = vector.broadcast %cst_14 : f32 to vector<16x1xf32>
    %43 = arith.addf %39, %42 : vector<16x1xf32>
    %44 = math.rsqrt %43 : vector<16x1xf32>
    %45 = vector.broadcast %44 : vector<16x1xf32> to vector<16x32xf32>
    %46 = arith.mulf %41, %45 : vector<16x32xf32>
    %47 = vector.extract_strided_slice %28 {offsets = [0, 0], sizes = [1, 32], strides = [1, 1]} : vector<2x32xf32> to vector<1x32xf32>
    %48 = vector.broadcast %47 : vector<1x32xf32> to vector<16x32xf32>
    %49 = arith.mulf %46, %48 : vector<16x32xf32>
    %50 = vector.extract_strided_slice %28 {offsets = [1, 0], sizes = [1, 32], strides = [1, 1]} : vector<2x32xf32> to vector<1x32xf32>
    %51 = vector.broadcast %50 : vector<1x32xf32> to vector<16x32xf32>
    %52 = arith.addf %49, %51 : vector<16x32xf32>
    %c0_15 = arith.constant 0 : index
    %c0_16 = arith.constant 0 : index
    %c0_17 = arith.constant 0 : index
    %53 = vector.load %arg3[%c0_15, %c0_16, %c0_17] : memref<2x1x8xi32, #tpu.memory_space<vmem>>, vector<2x1x8xi32>
    %54 = arith.sitofp %53 : vector<2x1x8xi32> to vector<2x1x8xf32>
    %cst_18 = arith.constant 1.000000e+00 : f32
    %55 = vector.broadcast %cst_18 : f32 to vector<2x1x8xf32>
    %56 = arith.subf %55, %54 : vector<2x1x8xf32>
    %cst_19 = arith.constant -1.000000e+04 : f32
    %57 = vector.broadcast %cst_19 : f32 to vector<2x1x8xf32>
    %58 = arith.mulf %56, %57 : vector<2x1x8xf32>
    %cst_20 = arith.constant 0.000000e+00 : f32
    %59 = vector.broadcast %cst_20 : f32 to vector<2x1x4xf32>
    %60 = tpu.concatenate %58, %59 in 2 : vector<2x1x8xf32>, vector<2x1x4xf32> -> vector<2x1x12xf32>
    %61 = tpu.concatenate %60, %60, %60, %60 in 0 : vector<2x1x12xf32>, vector<2x1x12xf32>, vector<2x1x12xf32>, vector<2x1x12xf32> -> vector<8x1x12xf32>
    %c184 = arith.constant 184 : index
    %c0_21 = arith.constant 0 : index
    %62 = vector.load %arg1[%c184, %c0_21] : memref<672x128xf32, #tpu.memory_space<vmem>>, vector<32x96xf32>
    %cst_22 = arith.constant dense<0.000000e+00> : vector<16x96xf32>
    %63 = tpu.matmul %52, %62, %cst_22 {dimension_numbers = #tpu.dot_dimension_numbers<[1], [0], [0], [1], [0, 0, 1, 1], [], []>} : vector<16x32xf32>, vector<32x96xf32>, vector<16x96xf32> -> vector<16x96xf32>
    %c216 = arith.constant 216 : index
    %c0_23 = arith.constant 0 : index
    %64 = vector.load %arg1[%c216, %c0_23] : memref<672x128xf32, #tpu.memory_space<vmem>>, vector<1x96xf32>
    %65 = vector.broadcast %64 : vector<1x96xf32> to vector<16x96xf32>
    %66 = arith.addf %63, %65 : vector<16x96xf32>
    %c392 = arith.constant 392 : index
    %c0_24 = arith.constant 0 : index
    %67 = vector.load %arg1[%c392, %c0_24] : memref<672x128xf32, #tpu.memory_space<vmem>>, vector<4x32xf32>
    %c400 = arith.constant 400 : index
    %c0_25 = arith.constant 0 : index
    %68 = vector.load %arg1[%c400, %c0_25] : memref<672x128xf32, #tpu.memory_space<vmem>>, vector<4x32xf32>
    %69 = vector.extract_strided_slice %66 {offsets = [0, 0], sizes = [16, 8], strides = [1, 1]} : vector<16x96xf32> to vector<16x8xf32>
    %70 = vector.shape_cast %69 : vector<16x8xf32> to vector<2x8x8xf32>
    %c0_26 = arith.constant 0 : index
    %c0_27 = arith.constant 0 : index
    %c0_28 = arith.constant 0 : index
    %c0_29 = arith.constant 0 : index
    %71 = vector.load %arg6[%c0_26, %c0_27, %c0_28, %c0_29] : memref<4x2x8x8xf32, #tpu.memory_space<vmem>>, vector<1x2x8x8xf32>
    %72 = vector.shape_cast %71 : vector<1x2x8x8xf32> to vector<2x8x8xf32>
    %73 = vector.shape_cast %70 : vector<2x8x8xf32> to vector<1x2x8x8xf32>
    tpu.vector_store %arg6[%c0_26, %c0_27, %c0_28, %c0_29], %73 {strides = array<i32>} : memref<4x2x8x8xf32, #tpu.memory_space<vmem>>, vector<1x2x8x8xf32>,
    %74 = vector.extract_strided_slice %66 {offsets = [0, 32], sizes = [16, 8], strides = [1, 1]} : vector<16x96xf32> to vector<16x8xf32>
    %75 = vector.shape_cast %74 : vector<16x8xf32> to vector<2x8x8xf32>
    %c0_30 = arith.constant 0 : index
    %c0_31 = arith.constant 0 : index
    %c0_32 = arith.constant 0 : index
    %c0_33 = arith.constant 0 : index
    %76 = vector.load %arg7[%c0_30, %c0_31, %c0_32, %c0_33] : memref<4x2x12x8xf32, #tpu.memory_space<vmem>>, vector<1x2x8x8xf32>
    %77 = vector.shape_cast %76 : vector<1x2x8x8xf32> to vector<2x8x8xf32>
    %78 = vector.shape_cast %75 : vector<2x8x8xf32> to vector<1x2x8x8xf32>
    tpu.vector_store %arg7[%c0_30, %c0_31, %c0_32, %c0_33], %78 {strides = array<i32>} : memref<4x2x12x8xf32, #tpu.memory_space<vmem>>, vector<1x2x8x8xf32>,
    %79 = vector.extract_strided_slice %66 {offsets = [0, 64], sizes = [16, 8], strides = [1, 1]} : vector<16x96xf32> to vector<16x8xf32>
    %80 = vector.shape_cast %79 : vector<16x8xf32> to vector<2x8x8xf32>
    %c0_34 = arith.constant 0 : index
    %c0_35 = arith.constant 0 : index
    %c0_36 = arith.constant 0 : index
    %c0_37 = arith.constant 0 : index
    %81 = vector.load %arg8[%c0_34, %c0_35, %c0_36, %c0_37] : memref<4x2x12x8xf32, #tpu.memory_space<vmem>>, vector<1x2x8x8xf32>
    %82 = vector.shape_cast %81 : vector<1x2x8x8xf32> to vector<2x8x8xf32>
    %83 = vector.shape_cast %80 : vector<2x8x8xf32> to vector<1x2x8x8xf32>
    tpu.vector_store %arg8[%c0_34, %c0_35, %c0_36, %c0_37], %83 {strides = array<i32>} : memref<4x2x12x8xf32, #tpu.memory_space<vmem>>, vector<1x2x8x8xf32>,
    %84 = vector.extract_strided_slice %67 {offsets = [0, 0], sizes = [4, 8], strides = [1, 1]} : vector<4x32xf32> to vector<4x8xf32>
    %85 = vector.shape_cast %84 : vector<4x8xf32> to vector<1x4x8xf32>
    %86 = vector.shape_cast %85 : vector<1x4x8xf32> to vector<1x4x8xf32>
    %87 = vector.broadcast %86 : vector<1x4x8xf32> to vector<2x4x8xf32>
    %c0_38 = arith.constant 0 : index
    %c0_39 = arith.constant 0 : index
    %c8 = arith.constant 8 : index
    %c0_40 = arith.constant 0 : index
    %88 = vector.load %arg7[%c0_38, %c0_39, %c8, %c0_40] : memref<4x2x12x8xf32, #tpu.memory_space<vmem>>, vector<1x2x4x8xf32>
    %89 = vector.shape_cast %88 : vector<1x2x4x8xf32> to vector<2x4x8xf32>
    %90 = vector.shape_cast %87 : vector<2x4x8xf32> to vector<1x2x4x8xf32>
    tpu.vector_store %arg7[%c0_38, %c0_39, %c8, %c0_40], %90 {strides = array<i32>} : memref<4x2x12x8xf32, #tpu.memory_space<vmem>>, vector<1x2x4x8xf32>,
    %91 = vector.extract_strided_slice %68 {offsets = [0, 0], sizes = [4, 8], strides = [1, 1]} : vector<4x32xf32> to vector<4x8xf32>
    %92 = vector.shape_cast %91 : vector<4x8xf32> to vector<1x4x8xf32>
    %93 = vector.shape_cast %92 : vector<1x4x8xf32> to vector<1x4x8xf32>
    %94 = vector.broadcast %93 : vector<1x4x8xf32> to vector<2x4x8xf32>
    %c0_41 = arith.constant 0 : index
    %c0_42 = arith.constant 0 : index
    %c8_43 = arith.constant 8 : index
    %c0_44 = arith.constant 0 : index
    %95 = vector.load %arg8[%c0_41, %c0_42, %c8_43, %c0_44] : memref<4x2x12x8xf32, #tpu.memory_space<vmem>>, vector<1x2x4x8xf32>
    %96 = vector.shape_cast %95 : vector<1x2x4x8xf32> to vector<2x4x8xf32>
    %97 = vector.shape_cast %94 : vector<2x4x8xf32> to vector<1x2x4x8xf32>
    tpu.vector_store %arg8[%c0_41, %c0_42, %c8_43, %c0_44], %97 {strides = array<i32>} : memref<4x2x12x8xf32, #tpu.memory_space<vmem>>, vector<1x2x4x8xf32>,
    %98 = vector.extract_strided_slice %66 {offsets = [0, 8], sizes = [16, 8], strides = [1, 1]} : vector<16x96xf32> to vector<16x8xf32>
    %99 = vector.shape_cast %98 : vector<16x8xf32> to vector<2x8x8xf32>
    %c1_45 = arith.constant 1 : index
    %c0_46 = arith.constant 0 : index
    %c0_47 = arith.constant 0 : index
    %c0_48 = arith.constant 0 : index
    %100 = vector.load %arg6[%c1_45, %c0_46, %c0_47, %c0_48] : memref<4x2x8x8xf32, #tpu.memory_space<vmem>>, vector<1x2x8x8xf32>
    %101 = vector.shape_cast %100 : vector<1x2x8x8xf32> to vector<2x8x8xf32>
    %102 = vector.shape_cast %99 : vector<2x8x8xf32> to vector<1x2x8x8xf32>
    tpu.vector_store %arg6[%c1_45, %c0_46, %c0_47, %c0_48], %102 {strides = array<i32>} : memref<4x2x8x8xf32, #tpu.memory_space<vmem>>, vector<1x2x8x8xf32>,
    %103 = vector.extract_strided_slice %66 {offsets = [0, 40], sizes = [16, 8], strides = [1, 1]} : vector<16x96xf32> to vector<16x8xf32>
    %104 = vector.shape_cast %103 : vector<16x8xf32> to vector<2x8x8xf32>
    %c1_49 = arith.constant 1 : index
    %c0_50 = arith.constant 0 : index
    %c0_51 = arith.constant 0 : index
    %c0_52 = arith.constant 0 : index
    %105 = vector.load %arg7[%c1_49, %c0_50, %c0_51, %c0_52] : memref<4x2x12x8xf32, #tpu.memory_space<vmem>>, vector<1x2x8x8xf32>
    %106 = vector.shape_cast %105 : vector<1x2x8x8xf32> to vector<2x8x8xf32>
    %107 = vector.shape_cast %104 : vector<2x8x8xf32> to vector<1x2x8x8xf32>
    tpu.vector_store %arg7[%c1_49, %c0_50, %c0_51, %c0_52], %107 {strides = array<i32>} : memref<4x2x12x8xf32, #tpu.memory_space<vmem>>, vector<1x2x8x8xf32>,
    %108 = vector.extract_strided_slice %66 {offsets = [0, 72], sizes = [16, 8], strides = [1, 1]} : vector<16x96xf32> to vector<16x8xf32>
    %109 = vector.shape_cast %108 : vector<16x8xf32> to vector<2x8x8xf32>
    %c1_53 = arith.constant 1 : index
    %c0_54 = arith.constant 0 : index
    %c0_55 = arith.constant 0 : index
    %c0_56 = arith.constant 0 : index
    %110 = vector.load %arg8[%c1_53, %c0_54, %c0_55, %c0_56] : memref<4x2x12x8xf32, #tpu.memory_space<vmem>>, vector<1x2x8x8xf32>
    %111 = vector.shape_cast %110 : vector<1x2x8x8xf32> to vector<2x8x8xf32>
    %112 = vector.shape_cast %109 : vector<2x8x8xf32> to vector<1x2x8x8xf32>
    tpu.vector_store %arg8[%c1_53, %c0_54, %c0_55, %c0_56], %112 {strides = array<i32>} : memref<4x2x12x8xf32, #tpu.memory_space<vmem>>, vector<1x2x8x8xf32>,
    %113 = vector.extract_strided_slice %67 {offsets = [0, 8], sizes = [4, 8], strides = [1, 1]} : vector<4x32xf32> to vector<4x8xf32>
    %114 = vector.shape_cast %113 : vector<4x8xf32> to vector<1x4x8xf32>
    %115 = vector.shape_cast %114 : vector<1x4x8xf32> to vector<1x4x8xf32>
    %116 = vector.broadcast %115 : vector<1x4x8xf32> to vector<2x4x8xf32>
    %c1_57 = arith.constant 1 : index
    %c0_58 = arith.constant 0 : index
    %c8_59 = arith.constant 8 : index
    %c0_60 = arith.constant 0 : index
    %117 = vector.load %arg7[%c1_57, %c0_58, %c8_59, %c0_60] : memref<4x2x12x8xf32, #tpu.memory_space<vmem>>, vector<1x2x4x8xf32>
    %118 = vector.shape_cast %117 : vector<1x2x4x8xf32> to vector<2x4x8xf32>
    %119 = vector.shape_cast %116 : vector<2x4x8xf32> to vector<1x2x4x8xf32>
    tpu.vector_store %arg7[%c1_57, %c0_58, %c8_59, %c0_60], %119 {strides = array<i32>} : memref<4x2x12x8xf32, #tpu.memory_space<vmem>>, vector<1x2x4x8xf32>,
    %120 = vector.extract_strided_slice %68 {offsets = [0, 8], sizes = [4, 8], strides = [1, 1]} : vector<4x32xf32> to vector<4x8xf32>
    %121 = vector.shape_cast %120 : vector<4x8xf32> to vector<1x4x8xf32>
    %122 = vector.shape_cast %121 : vector<1x4x8xf32> to vector<1x4x8xf32>
    %123 = vector.broadcast %122 : vector<1x4x8xf32> to vector<2x4x8xf32>
    %c1_61 = arith.constant 1 : index
    %c0_62 = arith.constant 0 : index
    %c8_63 = arith.constant 8 : index
    %c0_64 = arith.constant 0 : index
    %124 = vector.load %arg8[%c1_61, %c0_62, %c8_63, %c0_64] : memref<4x2x12x8xf32, #tpu.memory_space<vmem>>, vector<1x2x4x8xf32>
    %125 = vector.shape_cast %124 : vector<1x2x4x8xf32> to vector<2x4x8xf32>
    %126 = vector.shape_cast %123 : vector<2x4x8xf32> to vector<1x2x4x8xf32>
    tpu.vector_store %arg8[%c1_61, %c0_62, %c8_63, %c0_64], %126 {strides = array<i32>} : memref<4x2x12x8xf32, #tpu.memory_space<vmem>>, vector<1x2x4x8xf32>,
    %127 = vector.extract_strided_slice %66 {offsets = [0, 16], sizes = [16, 8], strides = [1, 1]} : vector<16x96xf32> to vector<16x8xf32>
    %128 = vector.shape_cast %127 : vector<16x8xf32> to vector<2x8x8xf32>
    %c2_65 = arith.constant 2 : index
    %c0_66 = arith.constant 0 : index
    %c0_67 = arith.constant 0 : index
    %c0_68 = arith.constant 0 : index
    %129 = vector.load %arg6[%c2_65, %c0_66, %c0_67, %c0_68] : memref<4x2x8x8xf32, #tpu.memory_space<vmem>>, vector<1x2x8x8xf32>
    %130 = vector.shape_cast %129 : vector<1x2x8x8xf32> to vector<2x8x8xf32>
    %131 = vector.shape_cast %128 : vector<2x8x8xf32> to vector<1x2x8x8xf32>
    tpu.vector_store %arg6[%c2_65, %c0_66, %c0_67, %c0_68], %131 {strides = array<i32>} : memref<4x2x8x8xf32, #tpu.memory_space<vmem>>, vector<1x2x8x8xf32>,
    %132 = vector.extract_strided_slice %66 {offsets = [0, 48], sizes = [16, 8], strides = [1, 1]} : vector<16x96xf32> to vector<16x8xf32>
    %133 = vector.shape_cast %132 : vector<16x8xf32> to vector<2x8x8xf32>
    %c2_69 = arith.constant 2 : index
    %c0_70 = arith.constant 0 : index
    %c0_71 = arith.constant 0 : index
    %c0_72 = arith.constant 0 : index
    %134 = vector.load %arg7[%c2_69, %c0_70, %c0_71, %c0_72] : memref<4x2x12x8xf32, #tpu.memory_space<vmem>>, vector<1x2x8x8xf32>
    %135 = vector.shape_cast %134 : vector<1x2x8x8xf32> to vector<2x8x8xf32>
    %136 = vector.shape_cast %133 : vector<2x8x8xf32> to vector<1x2x8x8xf32>
    tpu.vector_store %arg7[%c2_69, %c0_70, %c0_71, %c0_72], %136 {strides = array<i32>} : memref<4x2x12x8xf32, #tpu.memory_space<vmem>>, vector<1x2x8x8xf32>,
    %137 = vector.extract_strided_slice %66 {offsets = [0, 80], sizes = [16, 8], strides = [1, 1]} : vector<16x96xf32> to vector<16x8xf32>
    %138 = vector.shape_cast %137 : vector<16x8xf32> to vector<2x8x8xf32>
    %c2_73 = arith.constant 2 : index
    %c0_74 = arith.constant 0 : index
    %c0_75 = arith.constant 0 : index
    %c0_76 = arith.constant 0 : index
    %139 = vector.load %arg8[%c2_73, %c0_74, %c0_75, %c0_76] : memref<4x2x12x8xf32, #tpu.memory_space<vmem>>, vector<1x2x8x8xf32>
    %140 = vector.shape_cast %139 : vector<1x2x8x8xf32> to vector<2x8x8xf32>
    %141 = vector.shape_cast %138 : vector<2x8x8xf32> to vector<1x2x8x8xf32>
    tpu.vector_store %arg8[%c2_73, %c0_74, %c0_75, %c0_76], %141 {strides = array<i32>} : memref<4x2x12x8xf32, #tpu.memory_space<vmem>>, vector<1x2x8x8xf32>,
    %142 = vector.extract_strided_slice %67 {offsets = [0, 16], sizes = [4, 8], strides = [1, 1]} : vector<4x32xf32> to vector<4x8xf32>
    %143 = vector.shape_cast %142 : vector<4x8xf32> to vector<1x4x8xf32>
    %144 = vector.shape_cast %143 : vector<1x4x8xf32> to vector<1x4x8xf32>
    %145 = vector.broadcast %144 : vector<1x4x8xf32> to vector<2x4x8xf32>
    %c2_77 = arith.constant 2 : index
    %c0_78 = arith.constant 0 : index
    %c8_79 = arith.constant 8 : index
    %c0_80 = arith.constant 0 : index
    %146 = vector.load %arg7[%c2_77, %c0_78, %c8_79, %c0_80] : memref<4x2x12x8xf32, #tpu.memory_space<vmem>>, vector<1x2x4x8xf32>
    %147 = vector.shape_cast %146 : vector<1x2x4x8xf32> to vector<2x4x8xf32>
    %148 = vector.shape_cast %145 : vector<2x4x8xf32> to vector<1x2x4x8xf32>
    tpu.vector_store %arg7[%c2_77, %c0_78, %c8_79, %c0_80], %148 {strides = array<i32>} : memref<4x2x12x8xf32, #tpu.memory_space<vmem>>, vector<1x2x4x8xf32>,
    %149 = vector.extract_strided_slice %68 {offsets = [0, 16], sizes = [4, 8], strides = [1, 1]} : vector<4x32xf32> to vector<4x8xf32>
    %150 = vector.shape_cast %149 : vector<4x8xf32> to vector<1x4x8xf32>
    %151 = vector.shape_cast %150 : vector<1x4x8xf32> to vector<1x4x8xf32>
    %152 = vector.broadcast %151 : vector<1x4x8xf32> to vector<2x4x8xf32>
    %c2_81 = arith.constant 2 : index
    %c0_82 = arith.constant 0 : index
    %c8_83 = arith.constant 8 : index
    %c0_84 = arith.constant 0 : index
    %153 = vector.load %arg8[%c2_81, %c0_82, %c8_83, %c0_84] : memref<4x2x12x8xf32, #tpu.memory_space<vmem>>, vector<1x2x4x8xf32>
    %154 = vector.shape_cast %153 : vector<1x2x4x8xf32> to vector<2x4x8xf32>
    %155 = vector.shape_cast %152 : vector<2x4x8xf32> to vector<1x2x4x8xf32>
    tpu.vector_store %arg8[%c2_81, %c0_82, %c8_83, %c0_84], %155 {strides = array<i32>} : memref<4x2x12x8xf32, #tpu.memory_space<vmem>>, vector<1x2x4x8xf32>,
    %156 = vector.extract_strided_slice %66 {offsets = [0, 24], sizes = [16, 8], strides = [1, 1]} : vector<16x96xf32> to vector<16x8xf32>
    %157 = vector.shape_cast %156 : vector<16x8xf32> to vector<2x8x8xf32>
    %c3_85 = arith.constant 3 : index
    %c0_86 = arith.constant 0 : index
    %c0_87 = arith.constant 0 : index
    %c0_88 = arith.constant 0 : index
    %158 = vector.load %arg6[%c3_85, %c0_86, %c0_87, %c0_88] : memref<4x2x8x8xf32, #tpu.memory_space<vmem>>, vector<1x2x8x8xf32>
    %159 = vector.shape_cast %158 : vector<1x2x8x8xf32> to vector<2x8x8xf32>
    %160 = vector.shape_cast %157 : vector<2x8x8xf32> to vector<1x2x8x8xf32>
    tpu.vector_store %arg6[%c3_85, %c0_86, %c0_87, %c0_88], %160 {strides = array<i32>} : memref<4x2x8x8xf32, #tpu.memory_space<vmem>>, vector<1x2x8x8xf32>,
    %161 = vector.extract_strided_slice %66 {offsets = [0, 56], sizes = [16, 8], strides = [1, 1]} : vector<16x96xf32> to vector<16x8xf32>
    %162 = vector.shape_cast %161 : vector<16x8xf32> to vector<2x8x8xf32>
    %c3_89 = arith.constant 3 : index
    %c0_90 = arith.constant 0 : index
    %c0_91 = arith.constant 0 : index
    %c0_92 = arith.constant 0 : index
    %163 = vector.load %arg7[%c3_89, %c0_90, %c0_91, %c0_92] : memref<4x2x12x8xf32, #tpu.memory_space<vmem>>, vector<1x2x8x8xf32>
    %164 = vector.shape_cast %163 : vector<1x2x8x8xf32> to vector<2x8x8xf32>
    %165 = vector.shape_cast %162 : vector<2x8x8xf32> to vector<1x2x8x8xf32>
    tpu.vector_store %arg7[%c3_89, %c0_90, %c0_91, %c0_92], %165 {strides = array<i32>} : memref<4x2x12x8xf32, #tpu.memory_space<vmem>>, vector<1x2x8x8xf32>,
    %166 = vector.extract_strided_slice %66 {offsets = [0, 88], sizes = [16, 8], strides = [1, 1]} : vector<16x96xf32> to vector<16x8xf32>
    %167 = vector.shape_cast %166 : vector<16x8xf32> to vector<2x8x8xf32>
    %c3_93 = arith.constant 3 : index
    %c0_94 = arith.constant 0 : index
    %c0_95 = arith.constant 0 : index
    %c0_96 = arith.constant 0 : index
    %168 = vector.load %arg8[%c3_93, %c0_94, %c0_95, %c0_96] : memref<4x2x12x8xf32, #tpu.memory_space<vmem>>, vector<1x2x8x8xf32>
    %169 = vector.shape_cast %168 : vector<1x2x8x8xf32> to vector<2x8x8xf32>
    %170 = vector.shape_cast %167 : vector<2x8x8xf32> to vector<1x2x8x8xf32>
    tpu.vector_store %arg8[%c3_93, %c0_94, %c0_95, %c0_96], %170 {strides = array<i32>} : memref<4x2x12x8xf32, #tpu.memory_space<vmem>>, vector<1x2x8x8xf32>,
    %171 = vector.extract_strided_slice %67 {offsets = [0, 24], sizes = [4, 8], strides = [1, 1]} : vector<4x32xf32> to vector<4x8xf32>
    %172 = vector.shape_cast %171 : vector<4x8xf32> to vector<1x4x8xf32>
    %173 = vector.shape_cast %172 : vector<1x4x8xf32> to vector<1x4x8xf32>
    %174 = vector.broadcast %173 : vector<1x4x8xf32> to vector<2x4x8xf32>
    %c3_97 = arith.constant 3 : index
    %c0_98 = arith.constant 0 : index
    %c8_99 = arith.constant 8 : index
    %c0_100 = arith.constant 0 : index
    %175 = vector.load %arg7[%c3_97, %c0_98, %c8_99, %c0_100] : memref<4x2x12x8xf32, #tpu.memory_space<vmem>>, vector<1x2x4x8xf32>
    %176 = vector.shape_cast %175 : vector<1x2x4x8xf32> to vector<2x4x8xf32>
    %177 = vector.shape_cast %174 : vector<2x4x8xf32> to vector<1x2x4x8xf32>
    tpu.vector_store %arg7[%c3_97, %c0_98, %c8_99, %c0_100], %177 {strides = array<i32>} : memref<4x2x12x8xf32, #tpu.memory_space<vmem>>, vector<1x2x4x8xf32>,
    %178 = vector.extract_strided_slice %68 {offsets = [0, 24], sizes = [4, 8], strides = [1, 1]} : vector<4x32xf32> to vector<4x8xf32>
    %179 = vector.shape_cast %178 : vector<4x8xf32> to vector<1x4x8xf32>
    %180 = vector.shape_cast %179 : vector<1x4x8xf32> to vector<1x4x8xf32>
    %181 = vector.broadcast %180 : vector<1x4x8xf32> to vector<2x4x8xf32>
    %c3_101 = arith.constant 3 : index
    %c0_102 = arith.constant 0 : index
    %c8_103 = arith.constant 8 : index
    %c0_104 = arith.constant 0 : index
    %182 = vector.load %arg8[%c3_101, %c0_102, %c8_103, %c0_104] : memref<4x2x12x8xf32, #tpu.memory_space<vmem>>, vector<1x2x4x8xf32>
    %183 = vector.shape_cast %182 : vector<1x2x4x8xf32> to vector<2x4x8xf32>
    %184 = vector.shape_cast %181 : vector<2x4x8xf32> to vector<1x2x4x8xf32>
    tpu.vector_store %arg8[%c3_101, %c0_102, %c8_103, %c0_104], %184 {strides = array<i32>} : memref<4x2x12x8xf32, #tpu.memory_space<vmem>>, vector<1x2x4x8xf32>,
    %c0_105 = arith.constant 0 : index
    %c0_106 = arith.constant 0 : index
    %c0_107 = arith.constant 0 : index
    %c0_108 = arith.constant 0 : index
    %185 = vector.load %arg6[%c0_105, %c0_106, %c0_107, %c0_108] : memref<4x2x8x8xf32, #tpu.memory_space<vmem>>, vector<4x2x8x8xf32>
    %186 = vector.shape_cast %185 : vector<4x2x8x8xf32> to vector<8x8x8xf32>
    %c0_109 = arith.constant 0 : index
    %c0_110 = arith.constant 0 : index
    %c0_111 = arith.constant 0 : index
    %c0_112 = arith.constant 0 : index
    %187 = vector.load %arg7[%c0_109, %c0_110, %c0_111, %c0_112] : memref<4x2x12x8xf32, #tpu.memory_space<vmem>>, vector<4x2x12x8xf32>
    %188 = vector.shape_cast %187 : vector<4x2x12x8xf32> to vector<8x12x8xf32>
    %c0_113 = arith.constant 0 : index
    %c0_114 = arith.constant 0 : index
    %c0_115 = arith.constant 0 : index
    %c0_116 = arith.constant 0 : index
    %189 = vector.load %arg8[%c0_113, %c0_114, %c0_115, %c0_116] : memref<4x2x12x8xf32, #tpu.memory_space<vmem>>, vector<4x2x12x8xf32>
    %190 = vector.shape_cast %189 : vector<4x2x12x8xf32> to vector<8x12x8xf32>
    "tpu.trace_start"() <{level = 10 : i32, message = "bqd,bkd->bqk"}> : () -> ()
    %cst_117 = arith.constant dense<0.000000e+00> : vector<8x8x12xf32>
    %191 = tpu.matmul %186, %188, %cst_117 {dimension_numbers = #tpu.dot_dimension_numbers<[2], [2], [1], [1], [0, 0, 0, 1, 1, 1], [0], [0]>} : vector<8x8x8xf32>, vector<8x12x8xf32>, vector<8x8x12xf32> -> vector<8x8x12xf32>
    "tpu.trace_stop"() : () -> ()
    %cst_118 = arith.constant 0.353553385 : f32
    %192 = vector.broadcast %cst_118 : f32 to vector<8x8x12xf32>
    %193 = arith.mulf %191, %192 : vector<8x8x12xf32>
    %194 = vector.broadcast %61 : vector<8x1x12xf32> to vector<8x8x12xf32>
    %195 = arith.addf %193, %194 : vector<8x8x12xf32>
    %cst_119 = arith.constant dense<0xFF800000> : vector<8x8xf32>
    %196 = vector.multi_reduction <maximumf>, %195, %cst_119 [2] : vector<8x8x12xf32> to vector<8x8xf32>
    %197 = vector.shape_cast %196 : vector<8x8xf32> to vector<8x8x1xf32>
    %198 = vector.broadcast %197 : vector<8x8x1xf32> to vector<8x8x12xf32>
    %199 = arith.subf %195, %198 : vector<8x8x12xf32>
    %200 = math.exp %199 : vector<8x8x12xf32>
    %cst_120 = arith.constant dense<0.000000e+00> : vector<8x8xf32>
    %201 = vector.multi_reduction <add>, %200, %cst_120 [2] : vector<8x8x12xf32> to vector<8x8xf32>
    %202 = vector.shape_cast %201 : vector<8x8xf32> to vector<8x8x1xf32>
    %203 = tpu.reciprocal %202 {approx = true} : vector<8x8x1xf32> -> vector<8x8x1xf32>
    %204 = vector.broadcast %203 : vector<8x8x1xf32> to vector<8x8x12xf32>
    %205 = arith.mulf %200, %204 : vector<8x8x12xf32>
    "tpu.trace_start"() <{level = 10 : i32, message = "bqk,bkd->bqd"}> : () -> ()
    %cst_121 = arith.constant dense<0.000000e+00> : vector<8x8x8xf32>
    %206 = tpu.matmul %205, %190, %cst_121 {dimension_numbers = #tpu.dot_dimension_numbers<[2], [1], [1], [2], [0, 0, 0, 1, 1, 2], [0], [0]>} : vector<8x8x12xf32>, vector<8x12x8xf32>, vector<8x8x8xf32> -> vector<8x8x8xf32>
    "tpu.trace_stop"() : () -> ()
    %207 = vector.extract_strided_slice %206 {offsets = [0, 0, 0], sizes = [2, 8, 8], strides = [1, 1, 1]} : vector<8x8x8xf32> to vector<2x8x8xf32>
    %208 = vector.shape_cast %207 : vector<2x8x8xf32> to vector<16x8xf32>
    %209 = vector.extract_strided_slice %206 {offsets = [2, 0, 0], sizes = [2, 8, 8], strides = [1, 1, 1]} : vector<8x8x8xf32> to vector<2x8x8xf32>
    %210 = vector.shape_cast %209 : vector<2x8x8xf32> to vector<16x8xf32>
    %211 = vector.extract_strided_slice %206 {offsets = [4, 0, 0], sizes = [2, 8, 8], strides = [1, 1, 1]} : vector<8x8x8xf32> to vector<2x8x8xf32>
    %212 = vector.shape_cast %211 : vector<2x8x8xf32> to vector<16x8xf32>
    %213 = vector.extract_strided_slice %206 {offsets = [6, 0, 0], sizes = [2, 8, 8], strides = [1, 1, 1]} : vector<8x8x8xf32> to vector<2x8x8xf32>
    %214 = vector.shape_cast %213 : vector<2x8x8xf32> to vector<16x8xf32>
    %215 = tpu.concatenate %208, %210, %212, %214 in 1 : vector<16x8xf32>, vector<16x8xf32>, vector<16x8xf32>, vector<16x8xf32> -> vector<16x32xf32>
    %c224 = arith.constant 224 : index
    %c0_122 = arith.constant 0 : index
    %216 = vector.load %arg1[%c224, %c0_122] : memref<672x128xf32, #tpu.memory_space<vmem>>, vector<32x32xf32>
    %cst_123 = arith.constant dense<0.000000e+00> : vector<16x32xf32>
    %217 = tpu.matmul %215, %216, %cst_123 {dimension_numbers = #tpu.dot_dimension_numbers<[1], [0], [0], [1], [0, 0, 1, 1], [], []>} : vector<16x32xf32>, vector<32x32xf32>, vector<16x32xf32> -> vector<16x32xf32>
    %c256 = arith.constant 256 : index
    %c0_124 = arith.constant 0 : index
    %218 = vector.load %arg1[%c256, %c0_124] : memref<672x128xf32, #tpu.memory_space<vmem>>, vector<1x32xf32>
    %219 = vector.broadcast %218 : vector<1x32xf32> to vector<16x32xf32>
    %220 = arith.addf %217, %219 : vector<16x32xf32>
    %221 = arith.addf %220, %52 : vector<16x32xf32>
    %c264 = arith.constant 264 : index
    %c0_125 = arith.constant 0 : index
    %222 = vector.load %arg1[%c264, %c0_125] : memref<672x128xf32, #tpu.memory_space<vmem>>, vector<2x32xf32>
    %cst_126 = arith.constant dense<0.000000e+00> : vector<16xf32>
    %223 = vector.multi_reduction <add>, %221, %cst_126 [1] : vector<16x32xf32> to vector<16xf32>
    %224 = vector.shape_cast %223 : vector<16xf32> to vector<16x1xf32>
    %cst_127 = arith.constant 3.200000e+01 : f32
    %225 = vector.broadcast %cst_127 : f32 to vector<16x1xf32>
    %226 = arith.divf %224, %225 : vector<16x1xf32>
    %227 = vector.broadcast %226 : vector<16x1xf32> to vector<16x32xf32>
    %228 = arith.subf %221, %227 : vector<16x32xf32>
    %229 = arith.mulf %228, %228 : vector<16x32xf32>
    %cst_128 = arith.constant dense<0.000000e+00> : vector<16xf32>
    %230 = vector.multi_reduction <add>, %229, %cst_128 [1] : vector<16x32xf32> to vector<16xf32>
    %231 = vector.shape_cast %230 : vector<16xf32> to vector<16x1xf32>
    %cst_129 = arith.constant 3.200000e+01 : f32
    %232 = vector.broadcast %cst_129 : f32 to vector<16x1xf32>
    %233 = arith.divf %231, %232 : vector<16x1xf32>
    %234 = vector.broadcast %226 : vector<16x1xf32> to vector<16x32xf32>
    %235 = arith.subf %221, %234 : vector<16x32xf32>
    %cst_130 = arith.constant 9.99999996E-13 : f32
    %236 = vector.broadcast %cst_130 : f32 to vector<16x1xf32>
    %237 = arith.addf %233, %236 : vector<16x1xf32>
    %238 = math.rsqrt %237 : vector<16x1xf32>
    %239 = vector.broadcast %238 : vector<16x1xf32> to vector<16x32xf32>
    %240 = arith.mulf %235, %239 : vector<16x32xf32>
    %241 = vector.extract_strided_slice %222 {offsets = [0, 0], sizes = [1, 32], strides = [1, 1]} : vector<2x32xf32> to vector<1x32xf32>
    %242 = vector.broadcast %241 : vector<1x32xf32> to vector<16x32xf32>
    %243 = arith.mulf %240, %242 : vector<16x32xf32>
    %244 = vector.extract_strided_slice %222 {offsets = [1, 0], sizes = [1, 32], strides = [1, 1]} : vector<2x32xf32> to vector<1x32xf32>
    %245 = vector.broadcast %244 : vector<1x32xf32> to vector<16x32xf32>
    %246 = arith.addf %243, %245 : vector<16x32xf32>
    %c272 = arith.constant 272 : index
    %c0_131 = arith.constant 0 : index
    %247 = vector.load %arg1[%c272, %c0_131] : memref<672x128xf32, #tpu.memory_space<vmem>>, vector<32x64xf32>
    %cst_132 = arith.constant dense<0.000000e+00> : vector<16x64xf32>
    %248 = tpu.matmul %246, %247, %cst_132 {dimension_numbers = #tpu.dot_dimension_numbers<[1], [0], [0], [1], [0, 0, 1, 1], [], []>} : vector<16x32xf32>, vector<32x64xf32>, vector<16x64xf32> -> vector<16x64xf32>
    %c304 = arith.constant 304 : index
    %c0_133 = arith.constant 0 : index
    %249 = vector.load %arg1[%c304, %c0_133] : memref<672x128xf32, #tpu.memory_space<vmem>>, vector<1x64xf32>
    %250 = vector.broadcast %249 : vector<1x64xf32> to vector<16x64xf32>
    %251 = arith.addf %248, %250 : vector<16x64xf32>
    %cst_134 = arith.constant 0.707106769 : f32
    %252 = vector.broadcast %cst_134 : f32 to vector<16x64xf32>
    %253 = arith.mulf %251, %252 : vector<16x64xf32>
    %254 = math.absf %253 : vector<16x64xf32>
    %cst_135 = arith.constant 0.327591091 : f32
    %255 = vector.broadcast %cst_135 : f32 to vector<16x64xf32>
    %256 = arith.mulf %255, %254 : vector<16x64xf32>
    %cst_136 = arith.constant 1.000000e+00 : f32
    %257 = vector.broadcast %cst_136 : f32 to vector<16x64xf32>
    %258 = arith.addf %257, %256 : vector<16x64xf32>
    %cst_137 = arith.constant 1.000000e+00 : f32
    %259 = vector.broadcast %cst_137 : f32 to vector<16x64xf32>
    %260 = arith.divf %259, %258 : vector<16x64xf32>
    %cst_138 = arith.constant 1.06140542 : f32
    %261 = vector.broadcast %cst_138 : f32 to vector<16x64xf32>
    %262 = arith.mulf %261, %260 : vector<16x64xf32>
    %cst_139 = arith.constant 1.45315206 : f32
    %263 = vector.broadcast %cst_139 : f32 to vector<16x64xf32>
    %264 = arith.subf %262, %263 : vector<16x64xf32>
    %265 = arith.mulf %264, %260 : vector<16x64xf32>
    %cst_140 = arith.constant 1.42141378 : f32
    %266 = vector.broadcast %cst_140 : f32 to vector<16x64xf32>
    %267 = arith.addf %265, %266 : vector<16x64xf32>
    %268 = arith.mulf %267, %260 : vector<16x64xf32>
    %cst_141 = arith.constant 0.284496725 : f32
    %269 = vector.broadcast %cst_141 : f32 to vector<16x64xf32>
    %270 = arith.subf %268, %269 : vector<16x64xf32>
    %271 = arith.mulf %270, %260 : vector<16x64xf32>
    %cst_142 = arith.constant 0.254829586 : f32
    %272 = vector.broadcast %cst_142 : f32 to vector<16x64xf32>
    %273 = arith.addf %271, %272 : vector<16x64xf32>
    %274 = arith.mulf %273, %260 : vector<16x64xf32>
    %cst_143 = arith.constant 0.000000e+00 : f32
    %275 = vector.broadcast %cst_143 : f32 to vector<16x64xf32>
    %276 = arith.subf %275, %254 : vector<16x64xf32>
    %277 = arith.mulf %276, %254 : vector<16x64xf32>
    %278 = math.exp %277 : vector<16x64xf32>
    %279 = arith.mulf %274, %278 : vector<16x64xf32>
    %cst_144 = arith.constant 1.000000e+00 : f32
    %280 = vector.broadcast %cst_144 : f32 to vector<16x64xf32>
    %281 = arith.subf %280, %279 : vector<16x64xf32>
    %cst_145 = arith.constant 0.000000e+00 : f32
    %282 = vector.broadcast %cst_145 : f32 to vector<16x64xf32>
    %283 = arith.cmpf oge, %253, %282 : vector<16x64xf32>
    %cst_146 = arith.constant 0.000000e+00 : f32
    %284 = vector.broadcast %cst_146 : f32 to vector<16x64xf32>
    %285 = arith.subf %284, %281 : vector<16x64xf32>
    %286 = arith.select %283, %281, %285 : vector<16x64xi1>, vector<16x64xf32>
    %cst_147 = arith.constant 5.000000e-01 : f32
    %287 = vector.broadcast %cst_147 : f32 to vector<16x64xf32>
    %288 = arith.mulf %287, %251 : vector<16x64xf32>
    %cst_148 = arith.constant 1.000000e+00 : f32
    %289 = vector.broadcast %cst_148 : f32 to vector<16x64xf32>
    %290 = arith.addf %289, %286 : vector<16x64xf32>
    %291 = arith.mulf %288, %290 : vector<16x64xf32>
    %c312 = arith.constant 312 : index
    %c0_149 = arith.constant 0 : index
    %292 = vector.load %arg1[%c312, %c0_149] : memref<672x128xf32, #tpu.memory_space<vmem>>, vector<64x32xf32>
    %cst_150 = arith.constant dense<0.000000e+00> : vector<16x32xf32>
    %293 = tpu.matmul %291, %292, %cst_150 {dimension_numbers = #tpu.dot_dimension_numbers<[1], [0], [0], [1], [0, 0, 1, 1], [], []>} : vector<16x64xf32>, vector<64x32xf32>, vector<16x32xf32> -> vector<16x32xf32>
    %c376 = arith.constant 376 : index
    %c0_151 = arith.constant 0 : index
    %294 = vector.load %arg1[%c376, %c0_151] : memref<672x128xf32, #tpu.memory_space<vmem>>, vector<1x32xf32>
    %295 = vector.broadcast %294 : vector<1x32xf32> to vector<16x32xf32>
    %296 = arith.addf %293, %295 : vector<16x32xf32>
    %297 = arith.addf %296, %246 : vector<16x32xf32>
    %c384 = arith.constant 384 : index
    %c0_152 = arith.constant 0 : index
    %298 = vector.load %arg1[%c384, %c0_152] : memref<672x128xf32, #tpu.memory_space<vmem>>, vector<2x32xf32>
    %cst_153 = arith.constant dense<0.000000e+00> : vector<16xf32>
    %299 = vector.multi_reduction <add>, %297, %cst_153 [1] : vector<16x32xf32> to vector<16xf32>
    %300 = vector.shape_cast %299 : vector<16xf32> to vector<16x1xf32>
    %cst_154 = arith.constant 3.200000e+01 : f32
    %301 = vector.broadcast %cst_154 : f32 to vector<16x1xf32>
    %302 = arith.divf %300, %301 : vector<16x1xf32>
    %303 = vector.broadcast %302 : vector<16x1xf32> to vector<16x32xf32>
    %304 = arith.subf %297, %303 : vector<16x32xf32>
    %305 = arith.mulf %304, %304 : vector<16x32xf32>
    %cst_155 = arith.constant dense<0.000000e+00> : vector<16xf32>
    %306 = vector.multi_reduction <add>, %305, %cst_155 [1] : vector<16x32xf32> to vector<16xf32>
    %307 = vector.shape_cast %306 : vector<16xf32> to vector<16x1xf32>
    %cst_156 = arith.constant 3.200000e+01 : f32
    %308 = vector.broadcast %cst_156 : f32 to vector<16x1xf32>
    %309 = arith.divf %307, %308 : vector<16x1xf32>
    %310 = vector.broadcast %302 : vector<16x1xf32> to vector<16x32xf32>
    %311 = arith.subf %297, %310 : vector<16x32xf32>
    %cst_157 = arith.constant 9.99999996E-13 : f32
    %312 = vector.broadcast %cst_157 : f32 to vector<16x1xf32>
    %313 = arith.addf %309, %312 : vector<16x1xf32>
    %314 = math.rsqrt %313 : vector<16x1xf32>
    %315 = vector.broadcast %314 : vector<16x1xf32> to vector<16x32xf32>
    %316 = arith.mulf %311, %315 : vector<16x32xf32>
    %317 = vector.extract_strided_slice %298 {offsets = [0, 0], sizes = [1, 32], strides = [1, 1]} : vector<2x32xf32> to vector<1x32xf32>
    %318 = vector.broadcast %317 : vector<1x32xf32> to vector<16x32xf32>
    %319 = arith.mulf %316, %318 : vector<16x32xf32>
    %320 = vector.extract_strided_slice %298 {offsets = [1, 0], sizes = [1, 32], strides = [1, 1]} : vector<2x32xf32> to vector<1x32xf32>
    %321 = vector.broadcast %320 : vector<1x32xf32> to vector<16x32xf32>
    %322 = arith.addf %319, %321 : vector<16x32xf32>
    %c408 = arith.constant 408 : index
    %c0_158 = arith.constant 0 : index
    %323 = vector.load %arg1[%c408, %c0_158] : memref<672x128xf32, #tpu.memory_space<vmem>>, vector<32x96xf32>
    %cst_159 = arith.constant dense<0.000000e+00> : vector<16x96xf32>
    %324 = tpu.matmul %322, %323, %cst_159 {dimension_numbers = #tpu.dot_dimension_numbers<[1], [0], [0], [1], [0, 0, 1, 1], [], []>} : vector<16x32xf32>, vector<32x96xf32>, vector<16x96xf32> -> vector<16x96xf32>
    %c440 = arith.constant 440 : index
    %c0_160 = arith.constant 0 : index
    %325 = vector.load %arg1[%c440, %c0_160] : memref<672x128xf32, #tpu.memory_space<vmem>>, vector<1x96xf32>
    %326 = vector.broadcast %325 : vector<1x96xf32> to vector<16x96xf32>
    %327 = arith.addf %324, %326 : vector<16x96xf32>
    %c616 = arith.constant 616 : index
    %c0_161 = arith.constant 0 : index
    %328 = vector.load %arg1[%c616, %c0_161] : memref<672x128xf32, #tpu.memory_space<vmem>>, vector<4x32xf32>
    %c624 = arith.constant 624 : index
    %c0_162 = arith.constant 0 : index
    %329 = vector.load %arg1[%c624, %c0_162] : memref<672x128xf32, #tpu.memory_space<vmem>>, vector<4x32xf32>
    %330 = vector.extract_strided_slice %327 {offsets = [0, 0], sizes = [16, 8], strides = [1, 1]} : vector<16x96xf32> to vector<16x8xf32>
    %331 = vector.shape_cast %330 : vector<16x8xf32> to vector<2x8x8xf32>
    %c0_163 = arith.constant 0 : index
    %c0_164 = arith.constant 0 : index
    %c0_165 = arith.constant 0 : index
    %c0_166 = arith.constant 0 : index
    %332 = vector.load %arg6[%c0_163, %c0_164, %c0_165, %c0_166] : memref<4x2x8x8xf32, #tpu.memory_space<vmem>>, vector<1x2x8x8xf32>
    %333 = vector.shape_cast %332 : vector<1x2x8x8xf32> to vector<2x8x8xf32>
    %334 = vector.shape_cast %331 : vector<2x8x8xf32> to vector<1x2x8x8xf32>
    tpu.vector_store %arg6[%c0_163, %c0_164, %c0_165, %c0_166], %334 {strides = array<i32>} : memref<4x2x8x8xf32, #tpu.memory_space<vmem>>, vector<1x2x8x8xf32>,
    %335 = vector.extract_strided_slice %327 {offsets = [0, 32], sizes = [16, 8], strides = [1, 1]} : vector<16x96xf32> to vector<16x8xf32>
    %336 = vector.shape_cast %335 : vector<16x8xf32> to vector<2x8x8xf32>
    %c0_167 = arith.constant 0 : index
    %c0_168 = arith.constant 0 : index
    %c0_169 = arith.constant 0 : index
    %c0_170 = arith.constant 0 : index
    %337 = vector.load %arg7[%c0_167, %c0_168, %c0_169, %c0_170] : memref<4x2x12x8xf32, #tpu.memory_space<vmem>>, vector<1x2x8x8xf32>
    %338 = vector.shape_cast %337 : vector<1x2x8x8xf32> to vector<2x8x8xf32>
    %339 = vector.shape_cast %336 : vector<2x8x8xf32> to vector<1x2x8x8xf32>
    tpu.vector_store %arg7[%c0_167, %c0_168, %c0_169, %c0_170], %339 {strides = array<i32>} : memref<4x2x12x8xf32, #tpu.memory_space<vmem>>, vector<1x2x8x8xf32>,
    %340 = vector.extract_strided_slice %327 {offsets = [0, 64], sizes = [16, 8], strides = [1, 1]} : vector<16x96xf32> to vector<16x8xf32>
    %341 = vector.shape_cast %340 : vector<16x8xf32> to vector<2x8x8xf32>
    %c0_171 = arith.constant 0 : index
    %c0_172 = arith.constant 0 : index
    %c0_173 = arith.constant 0 : index
    %c0_174 = arith.constant 0 : index
    %342 = vector.load %arg8[%c0_171, %c0_172, %c0_173, %c0_174] : memref<4x2x12x8xf32, #tpu.memory_space<vmem>>, vector<1x2x8x8xf32>
    %343 = vector.shape_cast %342 : vector<1x2x8x8xf32> to vector<2x8x8xf32>
    %344 = vector.shape_cast %341 : vector<2x8x8xf32> to vector<1x2x8x8xf32>
    tpu.vector_store %arg8[%c0_171, %c0_172, %c0_173, %c0_174], %344 {strides = array<i32>} : memref<4x2x12x8xf32, #tpu.memory_space<vmem>>, vector<1x2x8x8xf32>,
    %345 = vector.extract_strided_slice %328 {offsets = [0, 0], sizes = [4, 8], strides = [1, 1]} : vector<4x32xf32> to vector<4x8xf32>
    %346 = vector.shape_cast %345 : vector<4x8xf32> to vector<1x4x8xf32>
    %347 = vector.shape_cast %346 : vector<1x4x8xf32> to vector<1x4x8xf32>
    %348 = vector.broadcast %347 : vector<1x4x8xf32> to vector<2x4x8xf32>
    %c0_175 = arith.constant 0 : index
    %c0_176 = arith.constant 0 : index
    %c8_177 = arith.constant 8 : index
    %c0_178 = arith.constant 0 : index
    %349 = vector.load %arg7[%c0_175, %c0_176, %c8_177, %c0_178] : memref<4x2x12x8xf32, #tpu.memory_space<vmem>>, vector<1x2x4x8xf32>
    %350 = vector.shape_cast %349 : vector<1x2x4x8xf32> to vector<2x4x8xf32>
    %351 = vector.shape_cast %348 : vector<2x4x8xf32> to vector<1x2x4x8xf32>
    tpu.vector_store %arg7[%c0_175, %c0_176, %c8_177, %c0_178], %351 {strides = array<i32>} : memref<4x2x12x8xf32, #tpu.memory_space<vmem>>, vector<1x2x4x8xf32>,
    %352 = vector.extract_strided_slice %329 {offsets = [0, 0], sizes = [4, 8], strides = [1, 1]} : vector<4x32xf32> to vector<4x8xf32>
    %353 = vector.shape_cast %352 : vector<4x8xf32> to vector<1x4x8xf32>
    %354 = vector.shape_cast %353 : vector<1x4x8xf32> to vector<1x4x8xf32>
    %355 = vector.broadcast %354 : vector<1x4x8xf32> to vector<2x4x8xf32>
    %c0_179 = arith.constant 0 : index
    %c0_180 = arith.constant 0 : index
    %c8_181 = arith.constant 8 : index
    %c0_182 = arith.constant 0 : index
    %356 = vector.load %arg8[%c0_179, %c0_180, %c8_181, %c0_182] : memref<4x2x12x8xf32, #tpu.memory_space<vmem>>, vector<1x2x4x8xf32>
    %357 = vector.shape_cast %356 : vector<1x2x4x8xf32> to vector<2x4x8xf32>
    %358 = vector.shape_cast %355 : vector<2x4x8xf32> to vector<1x2x4x8xf32>
    tpu.vector_store %arg8[%c0_179, %c0_180, %c8_181, %c0_182], %358 {strides = array<i32>} : memref<4x2x12x8xf32, #tpu.memory_space<vmem>>, vector<1x2x4x8xf32>,
    %359 = vector.extract_strided_slice %327 {offsets = [0, 8], sizes = [16, 8], strides = [1, 1]} : vector<16x96xf32> to vector<16x8xf32>
    %360 = vector.shape_cast %359 : vector<16x8xf32> to vector<2x8x8xf32>
    %c1_183 = arith.constant 1 : index
    %c0_184 = arith.constant 0 : index
    %c0_185 = arith.constant 0 : index
    %c0_186 = arith.constant 0 : index
    %361 = vector.load %arg6[%c1_183, %c0_184, %c0_185, %c0_186] : memref<4x2x8x8xf32, #tpu.memory_space<vmem>>, vector<1x2x8x8xf32>
    %362 = vector.shape_cast %361 : vector<1x2x8x8xf32> to vector<2x8x8xf32>
    %363 = vector.shape_cast %360 : vector<2x8x8xf32> to vector<1x2x8x8xf32>
    tpu.vector_store %arg6[%c1_183, %c0_184, %c0_185, %c0_186], %363 {strides = array<i32>} : memref<4x2x8x8xf32, #tpu.memory_space<vmem>>, vector<1x2x8x8xf32>,
    %364 = vector.extract_strided_slice %327 {offsets = [0, 40], sizes = [16, 8], strides = [1, 1]} : vector<16x96xf32> to vector<16x8xf32>
    %365 = vector.shape_cast %364 : vector<16x8xf32> to vector<2x8x8xf32>
    %c1_187 = arith.constant 1 : index
    %c0_188 = arith.constant 0 : index
    %c0_189 = arith.constant 0 : index
    %c0_190 = arith.constant 0 : index
    %366 = vector.load %arg7[%c1_187, %c0_188, %c0_189, %c0_190] : memref<4x2x12x8xf32, #tpu.memory_space<vmem>>, vector<1x2x8x8xf32>
    %367 = vector.shape_cast %366 : vector<1x2x8x8xf32> to vector<2x8x8xf32>
    %368 = vector.shape_cast %365 : vector<2x8x8xf32> to vector<1x2x8x8xf32>
    tpu.vector_store %arg7[%c1_187, %c0_188, %c0_189, %c0_190], %368 {strides = array<i32>} : memref<4x2x12x8xf32, #tpu.memory_space<vmem>>, vector<1x2x8x8xf32>,
    %369 = vector.extract_strided_slice %327 {offsets = [0, 72], sizes = [16, 8], strides = [1, 1]} : vector<16x96xf32> to vector<16x8xf32>
    %370 = vector.shape_cast %369 : vector<16x8xf32> to vector<2x8x8xf32>
    %c1_191 = arith.constant 1 : index
    %c0_192 = arith.constant 0 : index
    %c0_193 = arith.constant 0 : index
    %c0_194 = arith.constant 0 : index
    %371 = vector.load %arg8[%c1_191, %c0_192, %c0_193, %c0_194] : memref<4x2x12x8xf32, #tpu.memory_space<vmem>>, vector<1x2x8x8xf32>
    %372 = vector.shape_cast %371 : vector<1x2x8x8xf32> to vector<2x8x8xf32>
    %373 = vector.shape_cast %370 : vector<2x8x8xf32> to vector<1x2x8x8xf32>
    tpu.vector_store %arg8[%c1_191, %c0_192, %c0_193, %c0_194], %373 {strides = array<i32>} : memref<4x2x12x8xf32, #tpu.memory_space<vmem>>, vector<1x2x8x8xf32>,
    %374 = vector.extract_strided_slice %328 {offsets = [0, 8], sizes = [4, 8], strides = [1, 1]} : vector<4x32xf32> to vector<4x8xf32>
    %375 = vector.shape_cast %374 : vector<4x8xf32> to vector<1x4x8xf32>
    %376 = vector.shape_cast %375 : vector<1x4x8xf32> to vector<1x4x8xf32>
    %377 = vector.broadcast %376 : vector<1x4x8xf32> to vector<2x4x8xf32>
    %c1_195 = arith.constant 1 : index
    %c0_196 = arith.constant 0 : index
    %c8_197 = arith.constant 8 : index
    %c0_198 = arith.constant 0 : index
    %378 = vector.load %arg7[%c1_195, %c0_196, %c8_197, %c0_198] : memref<4x2x12x8xf32, #tpu.memory_space<vmem>>, vector<1x2x4x8xf32>
    %379 = vector.shape_cast %378 : vector<1x2x4x8xf32> to vector<2x4x8xf32>
    %380 = vector.shape_cast %377 : vector<2x4x8xf32> to vector<1x2x4x8xf32>
    tpu.vector_store %arg7[%c1_195, %c0_196, %c8_197, %c0_198], %380 {strides = array<i32>} : memref<4x2x12x8xf32, #tpu.memory_space<vmem>>, vector<1x2x4x8xf32>,
    %381 = vector.extract_strided_slice %329 {offsets = [0, 8], sizes = [4, 8], strides = [1, 1]} : vector<4x32xf32> to vector<4x8xf32>
    %382 = vector.shape_cast %381 : vector<4x8xf32> to vector<1x4x8xf32>
    %383 = vector.shape_cast %382 : vector<1x4x8xf32> to vector<1x4x8xf32>
    %384 = vector.broadcast %383 : vector<1x4x8xf32> to vector<2x4x8xf32>
    %c1_199 = arith.constant 1 : index
    %c0_200 = arith.constant 0 : index
    %c8_201 = arith.constant 8 : index
    %c0_202 = arith.constant 0 : index
    %385 = vector.load %arg8[%c1_199, %c0_200, %c8_201, %c0_202] : memref<4x2x12x8xf32, #tpu.memory_space<vmem>>, vector<1x2x4x8xf32>
    %386 = vector.shape_cast %385 : vector<1x2x4x8xf32> to vector<2x4x8xf32>
    %387 = vector.shape_cast %384 : vector<2x4x8xf32> to vector<1x2x4x8xf32>
    tpu.vector_store %arg8[%c1_199, %c0_200, %c8_201, %c0_202], %387 {strides = array<i32>} : memref<4x2x12x8xf32, #tpu.memory_space<vmem>>, vector<1x2x4x8xf32>,
    %388 = vector.extract_strided_slice %327 {offsets = [0, 16], sizes = [16, 8], strides = [1, 1]} : vector<16x96xf32> to vector<16x8xf32>
    %389 = vector.shape_cast %388 : vector<16x8xf32> to vector<2x8x8xf32>
    %c2_203 = arith.constant 2 : index
    %c0_204 = arith.constant 0 : index
    %c0_205 = arith.constant 0 : index
    %c0_206 = arith.constant 0 : index
    %390 = vector.load %arg6[%c2_203, %c0_204, %c0_205, %c0_206] : memref<4x2x8x8xf32, #tpu.memory_space<vmem>>, vector<1x2x8x8xf32>
    %391 = vector.shape_cast %390 : vector<1x2x8x8xf32> to vector<2x8x8xf32>
    %392 = vector.shape_cast %389 : vector<2x8x8xf32> to vector<1x2x8x8xf32>
    tpu.vector_store %arg6[%c2_203, %c0_204, %c0_205, %c0_206], %392 {strides = array<i32>} : memref<4x2x8x8xf32, #tpu.memory_space<vmem>>, vector<1x2x8x8xf32>,
    %393 = vector.extract_strided_slice %327 {offsets = [0, 48], sizes = [16, 8], strides = [1, 1]} : vector<16x96xf32> to vector<16x8xf32>
    %394 = vector.shape_cast %393 : vector<16x8xf32> to vector<2x8x8xf32>
    %c2_207 = arith.constant 2 : index
    %c0_208 = arith.constant 0 : index
    %c0_209 = arith.constant 0 : index
    %c0_210 = arith.constant 0 : index
    %395 = vector.load %arg7[%c2_207, %c0_208, %c0_209, %c0_210] : memref<4x2x12x8xf32, #tpu.memory_space<vmem>>, vector<1x2x8x8xf32>
    %396 = vector.shape_cast %395 : vector<1x2x8x8xf32> to vector<2x8x8xf32>
    %397 = vector.shape_cast %394 : vector<2x8x8xf32> to vector<1x2x8x8xf32>
    tpu.vector_store %arg7[%c2_207, %c0_208, %c0_209, %c0_210], %397 {strides = array<i32>} : memref<4x2x12x8xf32, #tpu.memory_space<vmem>>, vector<1x2x8x8xf32>,
    %398 = vector.extract_strided_slice %327 {offsets = [0, 80], sizes = [16, 8], strides = [1, 1]} : vector<16x96xf32> to vector<16x8xf32>
    %399 = vector.shape_cast %398 : vector<16x8xf32> to vector<2x8x8xf32>
    %c2_211 = arith.constant 2 : index
    %c0_212 = arith.constant 0 : index
    %c0_213 = arith.constant 0 : index
    %c0_214 = arith.constant 0 : index
    %400 = vector.load %arg8[%c2_211, %c0_212, %c0_213, %c0_214] : memref<4x2x12x8xf32, #tpu.memory_space<vmem>>, vector<1x2x8x8xf32>
    %401 = vector.shape_cast %400 : vector<1x2x8x8xf32> to vector<2x8x8xf32>
    %402 = vector.shape_cast %399 : vector<2x8x8xf32> to vector<1x2x8x8xf32>
    tpu.vector_store %arg8[%c2_211, %c0_212, %c0_213, %c0_214], %402 {strides = array<i32>} : memref<4x2x12x8xf32, #tpu.memory_space<vmem>>, vector<1x2x8x8xf32>,
    %403 = vector.extract_strided_slice %328 {offsets = [0, 16], sizes = [4, 8], strides = [1, 1]} : vector<4x32xf32> to vector<4x8xf32>
    %404 = vector.shape_cast %403 : vector<4x8xf32> to vector<1x4x8xf32>
    %405 = vector.shape_cast %404 : vector<1x4x8xf32> to vector<1x4x8xf32>
    %406 = vector.broadcast %405 : vector<1x4x8xf32> to vector<2x4x8xf32>
    %c2_215 = arith.constant 2 : index
    %c0_216 = arith.constant 0 : index
    %c8_217 = arith.constant 8 : index
    %c0_218 = arith.constant 0 : index
    %407 = vector.load %arg7[%c2_215, %c0_216, %c8_217, %c0_218] : memref<4x2x12x8xf32, #tpu.memory_space<vmem>>, vector<1x2x4x8xf32>
    %408 = vector.shape_cast %407 : vector<1x2x4x8xf32> to vector<2x4x8xf32>
    %409 = vector.shape_cast %406 : vector<2x4x8xf32> to vector<1x2x4x8xf32>
    tpu.vector_store %arg7[%c2_215, %c0_216, %c8_217, %c0_218], %409 {strides = array<i32>} : memref<4x2x12x8xf32, #tpu.memory_space<vmem>>, vector<1x2x4x8xf32>,
    %410 = vector.extract_strided_slice %329 {offsets = [0, 16], sizes = [4, 8], strides = [1, 1]} : vector<4x32xf32> to vector<4x8xf32>
    %411 = vector.shape_cast %410 : vector<4x8xf32> to vector<1x4x8xf32>
    %412 = vector.shape_cast %411 : vector<1x4x8xf32> to vector<1x4x8xf32>
    %413 = vector.broadcast %412 : vector<1x4x8xf32> to vector<2x4x8xf32>
    %c2_219 = arith.constant 2 : index
    %c0_220 = arith.constant 0 : index
    %c8_221 = arith.constant 8 : index
    %c0_222 = arith.constant 0 : index
    %414 = vector.load %arg8[%c2_219, %c0_220, %c8_221, %c0_222] : memref<4x2x12x8xf32, #tpu.memory_space<vmem>>, vector<1x2x4x8xf32>
    %415 = vector.shape_cast %414 : vector<1x2x4x8xf32> to vector<2x4x8xf32>
    %416 = vector.shape_cast %413 : vector<2x4x8xf32> to vector<1x2x4x8xf32>
    tpu.vector_store %arg8[%c2_219, %c0_220, %c8_221, %c0_222], %416 {strides = array<i32>} : memref<4x2x12x8xf32, #tpu.memory_space<vmem>>, vector<1x2x4x8xf32>,
    %417 = vector.extract_strided_slice %327 {offsets = [0, 24], sizes = [16, 8], strides = [1, 1]} : vector<16x96xf32> to vector<16x8xf32>
    %418 = vector.shape_cast %417 : vector<16x8xf32> to vector<2x8x8xf32>
    %c3_223 = arith.constant 3 : index
    %c0_224 = arith.constant 0 : index
    %c0_225 = arith.constant 0 : index
    %c0_226 = arith.constant 0 : index
    %419 = vector.load %arg6[%c3_223, %c0_224, %c0_225, %c0_226] : memref<4x2x8x8xf32, #tpu.memory_space<vmem>>, vector<1x2x8x8xf32>
    %420 = vector.shape_cast %419 : vector<1x2x8x8xf32> to vector<2x8x8xf32>
    %421 = vector.shape_cast %418 : vector<2x8x8xf32> to vector<1x2x8x8xf32>
    tpu.vector_store %arg6[%c3_223, %c0_224, %c0_225, %c0_226], %421 {strides = array<i32>} : memref<4x2x8x8xf32, #tpu.memory_space<vmem>>, vector<1x2x8x8xf32>,
    %422 = vector.extract_strided_slice %327 {offsets = [0, 56], sizes = [16, 8], strides = [1, 1]} : vector<16x96xf32> to vector<16x8xf32>
    %423 = vector.shape_cast %422 : vector<16x8xf32> to vector<2x8x8xf32>
    %c3_227 = arith.constant 3 : index
    %c0_228 = arith.constant 0 : index
    %c0_229 = arith.constant 0 : index
    %c0_230 = arith.constant 0 : index
    %424 = vector.load %arg7[%c3_227, %c0_228, %c0_229, %c0_230] : memref<4x2x12x8xf32, #tpu.memory_space<vmem>>, vector<1x2x8x8xf32>
    %425 = vector.shape_cast %424 : vector<1x2x8x8xf32> to vector<2x8x8xf32>
    %426 = vector.shape_cast %423 : vector<2x8x8xf32> to vector<1x2x8x8xf32>
    tpu.vector_store %arg7[%c3_227, %c0_228, %c0_229, %c0_230], %426 {strides = array<i32>} : memref<4x2x12x8xf32, #tpu.memory_space<vmem>>, vector<1x2x8x8xf32>,
    %427 = vector.extract_strided_slice %327 {offsets = [0, 88], sizes = [16, 8], strides = [1, 1]} : vector<16x96xf32> to vector<16x8xf32>
    %428 = vector.shape_cast %427 : vector<16x8xf32> to vector<2x8x8xf32>
    %c3_231 = arith.constant 3 : index
    %c0_232 = arith.constant 0 : index
    %c0_233 = arith.constant 0 : index
    %c0_234 = arith.constant 0 : index
    %429 = vector.load %arg8[%c3_231, %c0_232, %c0_233, %c0_234] : memref<4x2x12x8xf32, #tpu.memory_space<vmem>>, vector<1x2x8x8xf32>
    %430 = vector.shape_cast %429 : vector<1x2x8x8xf32> to vector<2x8x8xf32>
    %431 = vector.shape_cast %428 : vector<2x8x8xf32> to vector<1x2x8x8xf32>
    tpu.vector_store %arg8[%c3_231, %c0_232, %c0_233, %c0_234], %431 {strides = array<i32>} : memref<4x2x12x8xf32, #tpu.memory_space<vmem>>, vector<1x2x8x8xf32>,
    %432 = vector.extract_strided_slice %328 {offsets = [0, 24], sizes = [4, 8], strides = [1, 1]} : vector<4x32xf32> to vector<4x8xf32>
    %433 = vector.shape_cast %432 : vector<4x8xf32> to vector<1x4x8xf32>
    %434 = vector.shape_cast %433 : vector<1x4x8xf32> to vector<1x4x8xf32>
    %435 = vector.broadcast %434 : vector<1x4x8xf32> to vector<2x4x8xf32>
    %c3_235 = arith.constant 3 : index
    %c0_236 = arith.constant 0 : index
    %c8_237 = arith.constant 8 : index
    %c0_238 = arith.constant 0 : index
    %436 = vector.load %arg7[%c3_235, %c0_236, %c8_237, %c0_238] : memref<4x2x12x8xf32, #tpu.memory_space<vmem>>, vector<1x2x4x8xf32>
    %437 = vector.shape_cast %436 : vector<1x2x4x8xf32> to vector<2x4x8xf32>
    %438 = vector.shape_cast %435 : vector<2x4x8xf32> to vector<1x2x4x8xf32>
    tpu.vector_store %arg7[%c3_235, %c0_236, %c8_237, %c0_238], %438 {strides = array<i32>} : memref<4x2x12x8xf32, #tpu.memory_space<vmem>>, vector<1x2x4x8xf32>,
    %439 = vector.extract_strided_slice %329 {offsets = [0, 24], sizes = [4, 8], strides = [1, 1]} : vector<4x32xf32> to vector<4x8xf32>
    %440 = vector.shape_cast %439 : vector<4x8xf32> to vector<1x4x8xf32>
    %441 = vector.shape_cast %440 : vector<1x4x8xf32> to vector<1x4x8xf32>
    %442 = vector.broadcast %441 : vector<1x4x8xf32> to vector<2x4x8xf32>
    %c3_239 = arith.constant 3 : index
    %c0_240 = arith.constant 0 : index
    %c8_241 = arith.constant 8 : index
    %c0_242 = arith.constant 0 : index
    %443 = vector.load %arg8[%c3_239, %c0_240, %c8_241, %c0_242] : memref<4x2x12x8xf32, #tpu.memory_space<vmem>>, vector<1x2x4x8xf32>
    %444 = vector.shape_cast %443 : vector<1x2x4x8xf32> to vector<2x4x8xf32>
    %445 = vector.shape_cast %442 : vector<2x4x8xf32> to vector<1x2x4x8xf32>
    tpu.vector_store %arg8[%c3_239, %c0_240, %c8_241, %c0_242], %445 {strides = array<i32>} : memref<4x2x12x8xf32, #tpu.memory_space<vmem>>, vector<1x2x4x8xf32>,
    %c0_243 = arith.constant 0 : index
    %c0_244 = arith.constant 0 : index
    %c0_245 = arith.constant 0 : index
    %c0_246 = arith.constant 0 : index
    %446 = vector.load %arg6[%c0_243, %c0_244, %c0_245, %c0_246] : memref<4x2x8x8xf32, #tpu.memory_space<vmem>>, vector<4x2x8x8xf32>
    %447 = vector.shape_cast %446 : vector<4x2x8x8xf32> to vector<8x8x8xf32>
    %c0_247 = arith.constant 0 : index
    %c0_248 = arith.constant 0 : index
    %c0_249 = arith.constant 0 : index
    %c0_250 = arith.constant 0 : index
    %448 = vector.load %arg7[%c0_247, %c0_248, %c0_249, %c0_250] : memref<4x2x12x8xf32, #tpu.memory_space<vmem>>, vector<4x2x12x8xf32>
    %449 = vector.shape_cast %448 : vector<4x2x12x8xf32> to vector<8x12x8xf32>
    %c0_251 = arith.constant 0 : index
    %c0_252 = arith.constant 0 : index
    %c0_253 = arith.constant 0 : index
    %c0_254 = arith.constant 0 : index
    %450 = vector.load %arg8[%c0_251, %c0_252, %c0_253, %c0_254] : memref<4x2x12x8xf32, #tpu.memory_space<vmem>>, vector<4x2x12x8xf32>
    %451 = vector.shape_cast %450 : vector<4x2x12x8xf32> to vector<8x12x8xf32>
    "tpu.trace_start"() <{level = 10 : i32, message = "bqd,bkd->bqk"}> : () -> ()
    %cst_255 = arith.constant dense<0.000000e+00> : vector<8x8x12xf32>
    %452 = tpu.matmul %447, %449, %cst_255 {dimension_numbers = #tpu.dot_dimension_numbers<[2], [2], [1], [1], [0, 0, 0, 1, 1, 1], [0], [0]>} : vector<8x8x8xf32>, vector<8x12x8xf32>, vector<8x8x12xf32> -> vector<8x8x12xf32>
    "tpu.trace_stop"() : () -> ()
    %cst_256 = arith.constant 0.353553385 : f32
    %453 = vector.broadcast %cst_256 : f32 to vector<8x8x12xf32>
    %454 = arith.mulf %452, %453 : vector<8x8x12xf32>
    %455 = vector.broadcast %61 : vector<8x1x12xf32> to vector<8x8x12xf32>
    %456 = arith.addf %454, %455 : vector<8x8x12xf32>
    %cst_257 = arith.constant dense<0xFF800000> : vector<8x8xf32>
    %457 = vector.multi_reduction <maximumf>, %456, %cst_257 [2] : vector<8x8x12xf32> to vector<8x8xf32>
    %458 = vector.shape_cast %457 : vector<8x8xf32> to vector<8x8x1xf32>
    %459 = vector.broadcast %458 : vector<8x8x1xf32> to vector<8x8x12xf32>
    %460 = arith.subf %456, %459 : vector<8x8x12xf32>
    %461 = math.exp %460 : vector<8x8x12xf32>
    %cst_258 = arith.constant dense<0.000000e+00> : vector<8x8xf32>
    %462 = vector.multi_reduction <add>, %461, %cst_258 [2] : vector<8x8x12xf32> to vector<8x8xf32>
    %463 = vector.shape_cast %462 : vector<8x8xf32> to vector<8x8x1xf32>
    %464 = tpu.reciprocal %463 {approx = true} : vector<8x8x1xf32> -> vector<8x8x1xf32>
    %465 = vector.broadcast %464 : vector<8x8x1xf32> to vector<8x8x12xf32>
    %466 = arith.mulf %461, %465 : vector<8x8x12xf32>
    "tpu.trace_start"() <{level = 10 : i32, message = "bqk,bkd->bqd"}> : () -> ()
    %cst_259 = arith.constant dense<0.000000e+00> : vector<8x8x8xf32>
    %467 = tpu.matmul %466, %451, %cst_259 {dimension_numbers = #tpu.dot_dimension_numbers<[2], [1], [1], [2], [0, 0, 0, 1, 1, 2], [0], [0]>} : vector<8x8x12xf32>, vector<8x12x8xf32>, vector<8x8x8xf32> -> vector<8x8x8xf32>
    "tpu.trace_stop"() : () -> ()
    %468 = vector.extract_strided_slice %467 {offsets = [0, 0, 0], sizes = [2, 8, 8], strides = [1, 1, 1]} : vector<8x8x8xf32> to vector<2x8x8xf32>
    %469 = vector.shape_cast %468 : vector<2x8x8xf32> to vector<16x8xf32>
    %470 = vector.extract_strided_slice %467 {offsets = [2, 0, 0], sizes = [2, 8, 8], strides = [1, 1, 1]} : vector<8x8x8xf32> to vector<2x8x8xf32>
    %471 = vector.shape_cast %470 : vector<2x8x8xf32> to vector<16x8xf32>
    %472 = vector.extract_strided_slice %467 {offsets = [4, 0, 0], sizes = [2, 8, 8], strides = [1, 1, 1]} : vector<8x8x8xf32> to vector<2x8x8xf32>
    %473 = vector.shape_cast %472 : vector<2x8x8xf32> to vector<16x8xf32>
    %474 = vector.extract_strided_slice %467 {offsets = [6, 0, 0], sizes = [2, 8, 8], strides = [1, 1, 1]} : vector<8x8x8xf32> to vector<2x8x8xf32>
    %475 = vector.shape_cast %474 : vector<2x8x8xf32> to vector<16x8xf32>
    %476 = tpu.concatenate %469, %471, %473, %475 in 1 : vector<16x8xf32>, vector<16x8xf32>, vector<16x8xf32>, vector<16x8xf32> -> vector<16x32xf32>
    %c448 = arith.constant 448 : index
    %c0_260 = arith.constant 0 : index
    %477 = vector.load %arg1[%c448, %c0_260] : memref<672x128xf32, #tpu.memory_space<vmem>>, vector<32x32xf32>
    %cst_261 = arith.constant dense<0.000000e+00> : vector<16x32xf32>
    %478 = tpu.matmul %476, %477, %cst_261 {dimension_numbers = #tpu.dot_dimension_numbers<[1], [0], [0], [1], [0, 0, 1, 1], [], []>} : vector<16x32xf32>, vector<32x32xf32>, vector<16x32xf32> -> vector<16x32xf32>
    %c480 = arith.constant 480 : index
    %c0_262 = arith.constant 0 : index
    %479 = vector.load %arg1[%c480, %c0_262] : memref<672x128xf32, #tpu.memory_space<vmem>>, vector<1x32xf32>
    %480 = vector.broadcast %479 : vector<1x32xf32> to vector<16x32xf32>
    %481 = arith.addf %478, %480 : vector<16x32xf32>
    %482 = arith.addf %481, %322 : vector<16x32xf32>
    %c488 = arith.constant 488 : index
    %c0_263 = arith.constant 0 : index
    %483 = vector.load %arg1[%c488, %c0_263] : memref<672x128xf32, #tpu.memory_space<vmem>>, vector<2x32xf32>
    %cst_264 = arith.constant dense<0.000000e+00> : vector<16xf32>
    %484 = vector.multi_reduction <add>, %482, %cst_264 [1] : vector<16x32xf32> to vector<16xf32>
    %485 = vector.shape_cast %484 : vector<16xf32> to vector<16x1xf32>
    %cst_265 = arith.constant 3.200000e+01 : f32
    %486 = vector.broadcast %cst_265 : f32 to vector<16x1xf32>
    %487 = arith.divf %485, %486 : vector<16x1xf32>
    %488 = vector.broadcast %487 : vector<16x1xf32> to vector<16x32xf32>
    %489 = arith.subf %482, %488 : vector<16x32xf32>
    %490 = arith.mulf %489, %489 : vector<16x32xf32>
    %cst_266 = arith.constant dense<0.000000e+00> : vector<16xf32>
    %491 = vector.multi_reduction <add>, %490, %cst_266 [1] : vector<16x32xf32> to vector<16xf32>
    %492 = vector.shape_cast %491 : vector<16xf32> to vector<16x1xf32>
    %cst_267 = arith.constant 3.200000e+01 : f32
    %493 = vector.broadcast %cst_267 : f32 to vector<16x1xf32>
    %494 = arith.divf %492, %493 : vector<16x1xf32>
    %495 = vector.broadcast %487 : vector<16x1xf32> to vector<16x32xf32>
    %496 = arith.subf %482, %495 : vector<16x32xf32>
    %cst_268 = arith.constant 9.99999996E-13 : f32
    %497 = vector.broadcast %cst_268 : f32 to vector<16x1xf32>
    %498 = arith.addf %494, %497 : vector<16x1xf32>
    %499 = math.rsqrt %498 : vector<16x1xf32>
    %500 = vector.broadcast %499 : vector<16x1xf32> to vector<16x32xf32>
    %501 = arith.mulf %496, %500 : vector<16x32xf32>
    %502 = vector.extract_strided_slice %483 {offsets = [0, 0], sizes = [1, 32], strides = [1, 1]} : vector<2x32xf32> to vector<1x32xf32>
    %503 = vector.broadcast %502 : vector<1x32xf32> to vector<16x32xf32>
    %504 = arith.mulf %501, %503 : vector<16x32xf32>
    %505 = vector.extract_strided_slice %483 {offsets = [1, 0], sizes = [1, 32], strides = [1, 1]} : vector<2x32xf32> to vector<1x32xf32>
    %506 = vector.broadcast %505 : vector<1x32xf32> to vector<16x32xf32>
    %507 = arith.addf %504, %506 : vector<16x32xf32>
    %c496 = arith.constant 496 : index
    %c0_269 = arith.constant 0 : index
    %508 = vector.load %arg1[%c496, %c0_269] : memref<672x128xf32, #tpu.memory_space<vmem>>, vector<32x64xf32>
    %cst_270 = arith.constant dense<0.000000e+00> : vector<16x64xf32>
    %509 = tpu.matmul %507, %508, %cst_270 {dimension_numbers = #tpu.dot_dimension_numbers<[1], [0], [0], [1], [0, 0, 1, 1], [], []>} : vector<16x32xf32>, vector<32x64xf32>, vector<16x64xf32> -> vector<16x64xf32>
    %c528 = arith.constant 528 : index
    %c0_271 = arith.constant 0 : index
    %510 = vector.load %arg1[%c528, %c0_271] : memref<672x128xf32, #tpu.memory_space<vmem>>, vector<1x64xf32>
    %511 = vector.broadcast %510 : vector<1x64xf32> to vector<16x64xf32>
    %512 = arith.addf %509, %511 : vector<16x64xf32>
    %cst_272 = arith.constant 0.707106769 : f32
    %513 = vector.broadcast %cst_272 : f32 to vector<16x64xf32>
    %514 = arith.mulf %512, %513 : vector<16x64xf32>
    %515 = math.absf %514 : vector<16x64xf32>
    %cst_273 = arith.constant 0.327591091 : f32
    %516 = vector.broadcast %cst_273 : f32 to vector<16x64xf32>
    %517 = arith.mulf %516, %515 : vector<16x64xf32>
    %cst_274 = arith.constant 1.000000e+00 : f32
    %518 = vector.broadcast %cst_274 : f32 to vector<16x64xf32>
    %519 = arith.addf %518, %517 : vector<16x64xf32>
    %cst_275 = arith.constant 1.000000e+00 : f32
    %520 = vector.broadcast %cst_275 : f32 to vector<16x64xf32>
    %521 = arith.divf %520, %519 : vector<16x64xf32>
    %cst_276 = arith.constant 1.06140542 : f32
    %522 = vector.broadcast %cst_276 : f32 to vector<16x64xf32>
    %523 = arith.mulf %522, %521 : vector<16x64xf32>
    %cst_277 = arith.constant 1.45315206 : f32
    %524 = vector.broadcast %cst_277 : f32 to vector<16x64xf32>
    %525 = arith.subf %523, %524 : vector<16x64xf32>
    %526 = arith.mulf %525, %521 : vector<16x64xf32>
    %cst_278 = arith.constant 1.42141378 : f32
    %527 = vector.broadcast %cst_278 : f32 to vector<16x64xf32>
    %528 = arith.addf %526, %527 : vector<16x64xf32>
    %529 = arith.mulf %528, %521 : vector<16x64xf32>
    %cst_279 = arith.constant 0.284496725 : f32
    %530 = vector.broadcast %cst_279 : f32 to vector<16x64xf32>
    %531 = arith.subf %529, %530 : vector<16x64xf32>
    %532 = arith.mulf %531, %521 : vector<16x64xf32>
    %cst_280 = arith.constant 0.254829586 : f32
    %533 = vector.broadcast %cst_280 : f32 to vector<16x64xf32>
    %534 = arith.addf %532, %533 : vector<16x64xf32>
    %535 = arith.mulf %534, %521 : vector<16x64xf32>
    %cst_281 = arith.constant 0.000000e+00 : f32
    %536 = vector.broadcast %cst_281 : f32 to vector<16x64xf32>
    %537 = arith.subf %536, %515 : vector<16x64xf32>
    %538 = arith.mulf %537, %515 : vector<16x64xf32>
    %539 = math.exp %538 : vector<16x64xf32>
    %540 = arith.mulf %535, %539 : vector<16x64xf32>
    %cst_282 = arith.constant 1.000000e+00 : f32
    %541 = vector.broadcast %cst_282 : f32 to vector<16x64xf32>
    %542 = arith.subf %541, %540 : vector<16x64xf32>
    %cst_283 = arith.constant 0.000000e+00 : f32
    %543 = vector.broadcast %cst_283 : f32 to vector<16x64xf32>
    %544 = arith.cmpf oge, %514, %543 : vector<16x64xf32>
    %cst_284 = arith.constant 0.000000e+00 : f32
    %545 = vector.broadcast %cst_284 : f32 to vector<16x64xf32>
    %546 = arith.subf %545, %542 : vector<16x64xf32>
    %547 = arith.select %544, %542, %546 : vector<16x64xi1>, vector<16x64xf32>
    %cst_285 = arith.constant 5.000000e-01 : f32
    %548 = vector.broadcast %cst_285 : f32 to vector<16x64xf32>
    %549 = arith.mulf %548, %512 : vector<16x64xf32>
    %cst_286 = arith.constant 1.000000e+00 : f32
    %550 = vector.broadcast %cst_286 : f32 to vector<16x64xf32>
    %551 = arith.addf %550, %547 : vector<16x64xf32>
    %552 = arith.mulf %549, %551 : vector<16x64xf32>
    %c536 = arith.constant 536 : index
    %c0_287 = arith.constant 0 : index
    %553 = vector.load %arg1[%c536, %c0_287] : memref<672x128xf32, #tpu.memory_space<vmem>>, vector<64x32xf32>
    %cst_288 = arith.constant dense<0.000000e+00> : vector<16x32xf32>
    %554 = tpu.matmul %552, %553, %cst_288 {dimension_numbers = #tpu.dot_dimension_numbers<[1], [0], [0], [1], [0, 0, 1, 1], [], []>} : vector<16x64xf32>, vector<64x32xf32>, vector<16x32xf32> -> vector<16x32xf32>
    %c600 = arith.constant 600 : index
    %c0_289 = arith.constant 0 : index
    %555 = vector.load %arg1[%c600, %c0_289] : memref<672x128xf32, #tpu.memory_space<vmem>>, vector<1x32xf32>
    %556 = vector.broadcast %555 : vector<1x32xf32> to vector<16x32xf32>
    %557 = arith.addf %554, %556 : vector<16x32xf32>
    %558 = arith.addf %557, %507 : vector<16x32xf32>
    %c608 = arith.constant 608 : index
    %c0_290 = arith.constant 0 : index
    %559 = vector.load %arg1[%c608, %c0_290] : memref<672x128xf32, #tpu.memory_space<vmem>>, vector<2x32xf32>
    %cst_291 = arith.constant dense<0.000000e+00> : vector<16xf32>
    %560 = vector.multi_reduction <add>, %558, %cst_291 [1] : vector<16x32xf32> to vector<16xf32>
    %561 = vector.shape_cast %560 : vector<16xf32> to vector<16x1xf32>
    %cst_292 = arith.constant 3.200000e+01 : f32
    %562 = vector.broadcast %cst_292 : f32 to vector<16x1xf32>
    %563 = arith.divf %561, %562 : vector<16x1xf32>
    %564 = vector.broadcast %563 : vector<16x1xf32> to vector<16x32xf32>
    %565 = arith.subf %558, %564 : vector<16x32xf32>
    %566 = arith.mulf %565, %565 : vector<16x32xf32>
    %cst_293 = arith.constant dense<0.000000e+00> : vector<16xf32>
    %567 = vector.multi_reduction <add>, %566, %cst_293 [1] : vector<16x32xf32> to vector<16xf32>
    %568 = vector.shape_cast %567 : vector<16xf32> to vector<16x1xf32>
    %cst_294 = arith.constant 3.200000e+01 : f32
    %569 = vector.broadcast %cst_294 : f32 to vector<16x1xf32>
    %570 = arith.divf %568, %569 : vector<16x1xf32>
    %571 = vector.broadcast %563 : vector<16x1xf32> to vector<16x32xf32>
    %572 = arith.subf %558, %571 : vector<16x32xf32>
    %cst_295 = arith.constant 9.99999996E-13 : f32
    %573 = vector.broadcast %cst_295 : f32 to vector<16x1xf32>
    %574 = arith.addf %570, %573 : vector<16x1xf32>
    %575 = math.rsqrt %574 : vector<16x1xf32>
    %576 = vector.broadcast %575 : vector<16x1xf32> to vector<16x32xf32>
    %577 = arith.mulf %572, %576 : vector<16x32xf32>
    %578 = vector.extract_strided_slice %559 {offsets = [0, 0], sizes = [1, 32], strides = [1, 1]} : vector<2x32xf32> to vector<1x32xf32>
    %579 = vector.broadcast %578 : vector<1x32xf32> to vector<16x32xf32>
    %580 = arith.mulf %577, %579 : vector<16x32xf32>
    %581 = vector.extract_strided_slice %559 {offsets = [1, 0], sizes = [1, 32], strides = [1, 1]} : vector<2x32xf32> to vector<1x32xf32>
    %582 = vector.broadcast %581 : vector<1x32xf32> to vector<16x32xf32>
    %583 = arith.addf %580, %582 : vector<16x32xf32>
    %c632 = arith.constant 632 : index
    %c0_296 = arith.constant 0 : index
    %584 = vector.load %arg1[%c632, %c0_296] : memref<672x128xf32, #tpu.memory_space<vmem>>, vector<32x128xf32>
    %cst_297 = arith.constant dense<0.000000e+00> : vector<16x128xf32>
    %585 = tpu.matmul %583, %584, %cst_297 {dimension_numbers = #tpu.dot_dimension_numbers<[1], [0], [0], [1], [0, 0, 1, 1], [], []>} : vector<16x32xf32>, vector<32x128xf32>, vector<16x128xf32> -> vector<16x128xf32>
    %c664 = arith.constant 664 : index
    %c0_298 = arith.constant 0 : index
    %586 = vector.load %arg1[%c664, %c0_298] : memref<672x128xf32, #tpu.memory_space<vmem>>, vector<1x128xf32>
    %587 = vector.broadcast %586 : vector<1x128xf32> to vector<16x128xf32>
    %588 = arith.addf %585, %587 : vector<16x128xf32>
    %c0_299 = arith.constant 0 : index
    %c0_300 = arith.constant 0 : index
    %589 = vector.load %arg4[%c0_299, %c0_300] : memref<16x128xf32, #tpu.memory_space<vmem>>, vector<16x128xf32>
    tpu.vector_store %arg4[%c0_299, %c0_300], %588 {strides = array<i32>} : memref<16x128xf32, #tpu.memory_space<vmem>>, vector<16x128xf32>,
    %c1_i32 = arith.constant 1 : i32
    %590 = vector.broadcast %c1_i32 : i32 to vector<16x1xi32>
    %591 = arith.cmpi eq, %3, %590 : vector<16x1xi32>
    %c-100_i32 = arith.constant -100 : i32
    %592 = vector.broadcast %c-100_i32 : i32 to vector<16x1xi32>
    %593 = arith.select %591, %2, %592 : vector<16x1xi1>, vector<16x1xi32>
    %594 = tpu.iota {dimensions = array<i32: 1>} : vector<16x128xi32>
    %c5_i32 = arith.constant 5 : i32
    %595 = vector.broadcast %c5_i32 : i32 to vector<16x128xi32>
    %596 = arith.cmpi slt, %594, %595 : vector<16x128xi32>
    %cst_301 = arith.constant -1.000000e+30 : f32
    %597 = vector.broadcast %cst_301 : f32 to vector<16x128xf32>
    %598 = arith.select %596, %588, %597 : vector<16x128xi1>, vector<16x128xf32>
    %cst_302 = arith.constant dense<0xFF800000> : vector<16xf32>
    %599 = vector.multi_reduction <maximumf>, %598, %cst_302 [1] : vector<16x128xf32> to vector<16xf32>
    %600 = vector.shape_cast %599 : vector<16xf32> to vector<16x1xf32>
    %601 = vector.broadcast %600 : vector<16x1xf32> to vector<16x128xf32>
    %602 = arith.subf %598, %601 : vector<16x128xf32>
    %603 = math.exp %602 : vector<16x128xf32>
    %cst_303 = arith.constant dense<0.000000e+00> : vector<16xf32>
    %604 = vector.multi_reduction <add>, %603, %cst_303 [1] : vector<16x128xf32> to vector<16xf32>
    %605 = vector.shape_cast %604 : vector<16xf32> to vector<16x1xf32>
    %606 = math.log %605 : vector<16x1xf32>
    %607 = arith.addf %606, %600 : vector<16x1xf32>
    %608 = vector.broadcast %593 : vector<16x1xi32> to vector<16x128xi32>
    %609 = arith.cmpi eq, %594, %608 : vector<16x128xi32>
    %610 = arith.extui %609 : vector<16x128xi1> to vector<16x128xi32>
    %611 = arith.sitofp %610 : vector<16x128xi32> to vector<16x128xf32>
    %612 = vector.broadcast %607 : vector<16x1xf32> to vector<16x128xf32>
    %613 = arith.subf %598, %612 : vector<16x128xf32>
    %614 = arith.mulf %611, %613 : vector<16x128xf32>
    %cst_304 = arith.constant dense<0.000000e+00> : vector<16xf32>
    %615 = vector.multi_reduction <add>, %614, %cst_304 [1] : vector<16x128xf32> to vector<16xf32>
    %616 = vector.shape_cast %615 : vector<16xf32> to vector<16x1xf32>
    %cst_305 = arith.constant 0.000000e+00 : f32
    %617 = vector.broadcast %cst_305 : f32 to vector<16x1xf32>
    %618 = arith.subf %617, %616 : vector<16x1xf32>
    %c-100_i32_306 = arith.constant -100 : i32
    %619 = vector.broadcast %c-100_i32_306 : i32 to vector<16x1xi32>
    %620 = arith.cmpi ne, %593, %619 : vector<16x1xi32>
    %621 = arith.extui %620 : vector<16x1xi1> to vector<16x1xi32>
    %622 = arith.sitofp %621 : vector<16x1xi32> to vector<16x1xf32>
    %623 = arith.mulf %618, %622 : vector<16x1xf32>
    %624 = vector.shape_cast %623 : vector<16x1xf32> to vector<1x16x1xf32>
    %cst_307 = arith.constant dense<0.000000e+00> : vector<1xf32>
    %625 = vector.multi_reduction <add>, %624, %cst_307 [1, 2] : vector<1x16x1xf32> to vector<1xf32>
    %626 = vector.shape_cast %625 : vector<1xf32> to vector<1x1x1xf32>
    %627 = vector.extract %626[0, 0, 0] : f32 from vector<1x1x1xf32>
    %628 = vector.broadcast %627 : f32 to vector<1x1xf32>
    %629 = vector.shape_cast %622 : vector<16x1xf32> to vector<1x16x1xf32>
    %cst_308 = arith.constant dense<0.000000e+00> : vector<1xf32>
    %630 = vector.multi_reduction <add>, %629, %cst_308 [1, 2] : vector<1x16x1xf32> to vector<1xf32>
    %631 = vector.shape_cast %630 : vector<1xf32> to vector<1x1x1xf32>
    %632 = vector.extract %631[0, 0, 0] : f32 from vector<1x1x1xf32>
    %633 = vector.broadcast %632 : f32 to vector<1x1xf32>
    %634 = arith.divf %628, %633 : vector<1x1xf32>
    %c0_309 = arith.constant 0 : index
    %c0_310 = arith.constant 0 : index
    %635 = vector.load %arg5[%c0_309, %c0_310] : memref<1x1xf32, #tpu.memory_space<vmem>>, vector<1x1xf32>
    tpu.vector_store %arg5[%c0_309, %c0_310], %634 {strides = array<i32>} : memref<1x1xf32, #tpu.memory_space<vmem>>, vector<1x1xf32>,
    return
  }
  func.func @transform_0(%arg0: i32) -> (i32, i32) {
    %c0_i32 = arith.constant 0 : i32
    %c0_i32_0 = arith.constant 0 : i32
    %c0_i32_1 = arith.constant 0 : i32
    return %c0_i32, %c0_i32_0 : i32, i32
  }
  func.func @transform_1(%arg0: i32) -> (i32, i32) {
    %c0_i32 = arith.constant 0 : i32
    %c0_i32_0 = arith.constant 0 : i32
    %c0_i32_1 = arith.constant 0 : i32
    return %c0_i32, %c0_i32_0 : i32, i32
  }
  func.func @transform_2(%arg0: i32) -> (i32, i32, i32) {
    %c0_i32 = arith.constant 0 : i32
    %c0_i32_0 = arith.constant 0 : i32
    %c0_i32_1 = arith.constant 0 : i32
    %c0_i32_2 = arith.constant 0 : i32
    return %c0_i32, %c0_i32_0, %c0_i32_1 : i32, i32, i32
  }
  func.func @transform_3(%arg0: i32) -> (i32, i32) {
    %c0_i32 = arith.constant 0 : i32
    %c0_i32_0 = arith.constant 0 : i32
    %c0_i32_1 = arith.constant 0 : i32
    return %c0_i32, %c0_i32_0 : i32, i32
  }
  func.func @transform_4(%arg0: i32) -> (i32, i32) {
    %c0_i32 = arith.constant 0 : i32
    %c0_i32_0 = arith.constant 0 : i32
    %c0_i32_1 = arith.constant 0 : i32
    return %c0_i32, %c0_i32_0 : i32, i32
  }
}

</mosaic_0001>

<bundles_post_ra>
// kernel: token_classification_forward.1
= control target key start
LH: loop header
LB: loop body
LE: loop exit
PB: predicated region body
PF: predicated region fallthrough
CT: control target
= control target key end

     0   :  { %10 = vsyncpa [#allocation6], 0  ;;  %s6440_s0 = inlined_call_operand.hbm [shape: f32[672,128], index: 0, kind: input, shape index: {}]   ;;  %s6441_s1 = inlined_call_operand.vmem [shape: s32[16,4], index: 1, kind: input, shape index: {}]   ;;  %s6442_s2 = inlined_call_operand.vmem [shape: s32[2,1,8], index: 2, kind: input, shape index: {}]   ;;  %s6443_s3 = inlined_call_operand.vmem [shape: f32[16,128], index: 3, kind: output, shape index: {0}]   ;;  %s6444_s4 = inlined_call_operand.hbm [shape: f32[1,1], index: 4, kind: output, shape index: {1}]  }
   0x1   :  { %11 = vsyncpa [#allocation7], 0  ;;  %s5674_s15 = smov [#allocation5]   ;;  %s5626_s19 = scalar_lea.hbm %s6440_s0, 10752 }
   0x2   :  { %s17_s16 = sshll.u32 %s5674_s15, 4  ;;  %p5627_p0 = scmp.ne.s32.totalorder %s6440_s0, %s5626_s19  ;;  %s18_s16 = int_to_ptr.vmem [resolvable:$true] %s17_s16 }
   0x3   :  { %p5630_p1 = scmp.lt.u32.totalorder %s5626_s19, %s6440_s0 }
   0x5   :  { %p5632_p2 = pnand %p5630_p1, %p5627_p0 }
   0x7   :  { %5635 = shalt.err (!%p5632_p2)
}
   0x8   :  { %s5636_s24 = scalar_lea.vmem %s18_s16, 10752  ;;  %p5641_p4 = scmp.lt.s32.totalorder %s18_s16, %s18_s16 }
   0x9   :  { %p5637_p3 = scmp.ne.s32.totalorder %s18_s16, %s5636_s24  ;;  %p5642_p5 = scmp.lt.s32.totalorder %s5636_s24, %s5636_s24 }
   0xb   :  { %p5643_p6 = por %p5642_p5, %p5641_p4 }
   0xd   :  { %p5644_p7 = pnand %p5643_p6, %p5637_p3 }
   0xf   :  { %5647 = shalt.err (!%p5644_p7)
}
  0x10   :  { %s5675_s25 = smov 128   ;;  %s5676_s26 = smov 8  }
  0x11   :  { %23 = dma.hbm_to_vmem [thread:$0]  %s6440_s0, 10752, %s18_s16, [#allocation6], %s5675_s25, %s5675_s25, %s5676_s26  }
  0x12   :  { %5670 = dma.done.wait [#allocation6], 10752  }
  0x13   :  { %5671 = vsyncadd [#allocation6], 4294956544  ;;  %v5677_v0 = vmov 0   ;;  %v31_v1 = vld [vmem:[%s6441_s1] sm:$0xff]  ;;  %v48_v3 = vld [vmem:[#allocation5 + $0x8] sm:$0xff]  ;;  %v5678_v16 = vmov 1   ;;  %v33_v27 = vlaneseq }
  0x14   :  { %5504 = vset.pattern.permute.xlu0 %v5677_v0  ;;  %v47_v2 = vld [vmem:[#allocation5] sm:$0xff]  ;;  %v49_v4 = vld [vmem:[#allocation5 + $0x10] sm:$0xff]  ;;  %v50_v5 = vld [vmem:[#allocation5 + $0x18] sm:$0xff]  ;;  %v62_v14 = vcvt.s32.f32 %v31_v1  ;;  %5505 = vset.pattern.permute.xlu1 %v5678_v16  ;;  %vm107_vm0 = vcmask 1043456   ;;  %vm100_vm1 = vcmask 818176   ;;  %v5679_v30 = vmov 0.0  }
  0x15   :  { %36 = vperm.xlu0 %5504, %v31_v1   ;;  %v32_v6 = vld [vmem:[%s6441_s1 + $0x8] sm:$0xff]  ;;  %v5234_v7 = vpack.c.bf16 %v48_v3, %v47_v2  ;;  %v5238_v8 = vpack.c.bf16 %v50_v5, %v49_v4  ;;  %v51_v9 = vld [vmem:[#allocation5 + $0x20] sm:$0xff]  ;;  %v53_v12 = vld [vmem:[#allocation5 + $0x30] sm:$0xff]  ;;  %v5746_v28 = vand.u32 127, %v33_v27  ;;  %v67_v35 = vshrl.u32 %v33_v27, 7  ;;  %s5681_s0 = smov 96  }
  0x16   :  { %v52_v10 = vld [vmem:[#allocation5 + $0x28] sm:$0xff]  ;;  %v54_v13 = vld [vmem:[#allocation5 + $0x38] sm:$0xff]  ;;  %v63_v15 = vcvt.s32.f32 %v32_v6  ;;  %88 = vperm.xlu1 %5505, %v62_v14   ;;  %v64_v17 = vsub.f32 1.0, %v62_v14  ;;  %v55_v20 = vld [vmem:[#allocation5 + $0x40] sm:$0xff]  ;;  %vm189_vm4 = vcmask 261120   ;;  %vm352_vm5 = vcmask 60416  }
  0x17   :  { %5235 = vmatprep.subr.bf16.mxu0 %v5234_v7  ;;  %v5242_v11 = vpack.c.bf16 %v52_v10, %v51_v9  ;;  %v5246_v19 = vpack.c.bf16 %v54_v13, %v53_v12  ;;  %v56_v21 = vld [vmem:[#allocation5 + $0x48] sm:$0xff]  ;;  %v57_v23 = vld [vmem:[#allocation5 + $0x50] sm:$0xff]  ;;  %v58_v24 = vld [vmem:[#allocation5 + $0x58] sm:$0xff]  ;;  %v5752_v37 = vsub.s32 0, %v67_v35  ;;  %v5754_v38 = vsub.s32 1, %v67_v35  ;;  %s5682_s7 = smov 88  }
  0x18   :  { %5237 = vmatpush3.bf16.msra.mxu0 %v5234_v7  ;;  %v65_v18 = vsub.f32 1.0, %v63_v15  ;;  %v5250_v22 = vpack.c.bf16 %v56_v21, %v55_v20  ;;  %v5254_v25 = vpack.c.bf16 %v58_v24, %v57_v23  ;;  %v59_v26 = vld [vmem:[#allocation5 + $0x60] sm:$0xf]  ;;  %v61_v39 = vld [vmem:[#allocation5 + $0xa8] sm:$0x3]  ;;  %v60_v48 = vld [vmem:[#allocation5 + $0x6c] sm:$0xff] }
  0x19   :  { %39 = vperm.xlu0 %5504, %v32_v6   ;;  %5239 = vmatprep.subr.bf16.mxu0 %v5238_v8  ;;  %v85_v40 = vrot.slane %v61_v39, %v5754_v38  ;;  %v69_v41 = vrot.slane %v61_v39, %v5752_v37  ;;  %v240_v5 = vld [vmem:[#allocation5 + $0xb8] sm:$0xff]  ;;  %v241_v6 = vld [vmem:[#allocation5 + $0xc0] sm:$0xff]  ;;  %v242_v7 = vld [vmem:[#allocation5 + $0xc8] sm:$0xff]  ;;  %vm237_vm6 = vcmask 64512   ;;  %vm5683_vm7 = vmmov 0   ;;  %s5684_s8 = smov 120  }
  0x1a   :  { %72 = vperm.xlu1 %5505, %v64_v17   ;;  %v243_v9 = vld [vmem:[#allocation5 + $0xd0] sm:$0xff]  ;;  %s5685_s9 = smov 80   ;;  %s5686_s10 = smov 112   ;;  %vm5827_vm8 = vmpackc.low %vm237_vm6, %vm237_vm6  ;;  %vm1166_vm9 = vcmask 97280   ;;  %vm5693_vm10 = vmmov 1   ;;  %vm1892_vm12 = vcmask 195584  }
  0x1b   :  { %v5262_v10 = vpack.c.bf16 %v243_v9, %v242_v7  ;;  %v188_v17 = vld [vmem:[#allocation5 + $0xb0] sm:$0x3]  ;;  %s5687_s11 = smov 72   ;;  %s5688_s12 = smov 104   ;;  %vm5966_vm11 = vmpackc.low %vm107_vm0, %vm5693_vm10  ;;  %vm1889_vm13 = vcmask 130048   ;;  %vm4511_vm10 = vcmask 7168  }
  0x1c   :  { %5241 = vmatpush3.bf16.msra.mxu0 %v5238_v8  ;;  %v5258_v8 = vpack.c.bf16 %v241_v6, %v240_v5  ;;  %v226_v23 = vrot.slane %v188_v17, %v5754_v38  ;;  %s5690_s17 = smov 56   ;;  %s5691_s18 = smov 40  }
  0x1d   :  { %5243 = vmatprep.subr.bf16.mxu0 %v5242_v11  ;;  %5506 = vset.pattern.permute.xlu0 %v5678_v16  ;;  %s5692_s19 = smov 48   ;;  %s5694_s20 = smov 16  }
  0x1e   :  { %77 = vperm.xlu0 %5506, %v65_v18   ;;  %93 = vperm.xlu1 %5505, %v63_v15   ;;  %v220_v18 = vrot.slane %v188_v17, %v5752_v37  ;;  %s5695_s21 = smov 24   ;;  %s5696_s28 = smov 1  }
  0x1f   :  { %5259 = vmatprep.subr.bf16.mxu1 %v5258_v8  ;;  %s5699_s6 = smov [#allocation8]  }
  0x20   :  { %5245 = vmatpush3.bf16.msra.mxu0 %v5242_v11  ;;  %5261 = vmatpush3.bf16.msra.mxu1 %v5258_v8 }
  0x21   :  { %5247 = vmatprep.subr.bf16.mxu0 %v5246_v19  ;;  %5263 = vmatprep.subr.bf16.mxu1 %v5262_v10 }
  0x24   :  { %5249 = vmatpush3.bf16.msra.mxu0 %v5246_v19  ;;  %5265 = vmatpush3.bf16.msra.mxu1 %v5262_v10 }
  0x25   :  { %5251 = vmatprep.subr.bf16.mxu0 %v5250_v22 }
  0x28   :  { %5253 = vmatpush3.bf16.msra.mxu0 %v5250_v22 }
  0x29   :  { %5255 = vmatprep.subr.bf16.mxu0 %v5254_v25 }
  0x2c   :  { %5257 = vmatpush3.bf16.msra.mxu0 %v5254_v25 }
  0x2d   :  { %4890 = vmatprep.subr.msk.mxu0 %vm107_vm0, %v59_v26 }
  0x30   :  { %4891 = vmatpush3.msk.msra.mxu0 %vm107_vm0, %v59_v26  ;;  %vm2183_vm0 = vcmask 523264  }
  0x94   :  { %v37_v29 = vpop.permute.xlu0 %36 }
  0x95   :  { %vm41_vm2 = vcmp.eq.s32.totalorder %v5746_v28, %v37_v29  ;;  %v89_v34 = vpop.permute.xlu1 %88  ;;  %v330_v29 = vld [vmem:[#allocation5 + $0x188] sm:$0xf] }
  0x96   :  { %v4569_v31 = vsel %vm41_vm2, 1.0, %v5679_v30  ;;  %v96_v46 = vmul.f32 %v89_v34, %v85_v40  ;;  %353 = vst.msk [vmem:[#allocation3 + $0x8] sm:$0xf] %vm352_vm5, %v330_v29  ;;  %354 = vst.msk [vmem:[#allocation3 + $0x18] sm:$0xf] %vm352_vm5, %v330_v29 }
  0x97   :  { %4892 = vmatprep.mubr.msk.f32.mxu0 %vm100_vm1, %v4569_v31  ;;  %v4574_v31 = vld [vmem:[#allocation5 + $0xd8] ss:$0 sm:$0xff] }
  0x98   :  { %v40_v32 = vpop.permute.xlu0 %39 }
  0x99   :  { %vm42_vm3 = vcmp.eq.s32.totalorder %v5746_v28, %v40_v32  ;;  %v73_v36 = vpop.permute.xlu1 %72 }
  0x9a   :  { %v4570_v33 = vsel %vm42_vm3, 1.0, %v5679_v30  ;;  %v80_v47 = vmul.f32 %v73_v36, %v69_v41  ;;  %vm4450_vm3 = vcmp.lt.s32.totalorder %v5746_v28, 5 }
  0x9b   :  { %4893 = vmatmul.mubr.msk.f32.vlgmr.msra.gmra.mrb[0].mxu0 %vm100_vm1, %v4570_v33  ;;  %v5680_v33 = vmov 0.0|0.0  }
  0x9c   :  { %v98_v53 = vadd.f32 %v96_v46, %v80_v47  ;;  %5266 = vmatprep.subr.bf16.mxu1 %v5680_v33  ;;  %5278 = vmatprep.subr.bf16.mxu0 %v5680_v33 }
  0x9d   :  { %v78_v42 = vpop.permute.xlu0 %77  ;;  %v94_v43 = vpop.permute.xlu1 %93  ;;  %4931 = vmatprep.mubr.msk.f32.mxu0 %vm5683_vm7, %v5679_v30 }
  0x9e   :  { %v81_v44 = vmul.f32 %v78_v42, %v69_v41  ;;  %v97_v45 = vmul.f32 %v94_v43, %v85_v40  ;;  %v479_v43 = vld [vmem:[#allocation3 + $0x8] sm:$0xf] }
  0xa0   :  { %v99_v50 = vadd.f32 %v97_v45, %v81_v44 }
 0x16e   :  { %v4894_v49 = vpop.f32.mrb[0].mxu0 }
 0x16f   :  { %v183_v51 = vadd.f32 %v4894_v49, %v60_v48  ;;  %v177_v52 = vpop.f32.mrb[1].mxu0 }
 0x170   :  { %v178_v54 = vadd.f32 %v177_v52, %v60_v48 }
 0x171   :  { %v187_v55 = vadd.f32 %v183_v51, %v99_v50 }
 0x172   :  { %v186_v56 = vadd.f32 %v178_v54, %v98_v53 }
 0x173   :  { %v193_v57 = vsel %vm189_vm4, %v187_v55, 0.0 }
 0x174   :  { %194 = vadd.xlane.f32.xlu0 %v193_v57  ;;  %v190_v58 = vsel %vm189_vm4, %v186_v56, 0.0 }
 0x175   :  { %191 = vadd.xlane.f32.xlu1 %v190_v58 }
 0x201   :  { %v195_v59 = vpop.xlane.xlu0 %194 }
 0x202   :  { %v198_v60 = vmul.f32 0.03125, %v195_v59  ;;  %v192_v61 = vpop.xlane.xlu1 %191 }
 0x203   :  { %v197_v62 = vmul.f32 0.03125, %v192_v61 }
 0x204   :  { %v200_v63 = vsub.f32 %v187_v55, %v198_v60  ;;  %v481_v55 = vld [vmem:[#allocation3 + $0x18] sm:$0xf] }
 0x205   :  { %v199_v0 = vsub.f32 %v186_v56, %v197_v62 }
 0x206   :  { %v202_v1 = vmul.f32 %v200_v63, %v200_v63 }
 0x207   :  { %v201_v2 = vmul.f32 %v199_v0, %v199_v0 }
 0x208   :  { %v206_v3 = vsel %vm189_vm4, %v202_v1, 0.0 }
 0x209   :  { %207 = vadd.xlane.f32.xlu1 %v206_v3  ;;  %v203_v4 = vsel %vm189_vm4, %v201_v2, 0.0 }
 0x20a   :  { %204 = vadd.xlane.f32.xlu0 %v203_v4 }
 0x296   :  { %v208_v11 = vpop.xlane.xlu1 %207 }
 0x297   :  { %v210_v12 = vmul.f32 0.03125, %v208_v11  ;;  %v205_v13 = vpop.xlane.xlu0 %204 }
 0x298   :  { %v209_v14 = vmul.f32 0.03125, %v205_v13 }
 0x299   :  { %v212_v15 = vadd.f32 1e-12, %v210_v12 }
 0x29a   :  { %v211_v16 = vadd.f32 1e-12, %v209_v14 }
 0x29b   :  { %5514 = vrsqrt.f32 %v212_v15 }
 0x29c   :  { %5516 = vrsqrt.f32 %v211_v16 }
 0x2a5   :  { %v5515_v19 = vpop.eup %5514 }
 0x2a6   :  { %v5517_v20 = vpop.eup %5516  ;;  %v216_v21 = vmul.f32 %v5515_v19, %v200_v63 }
 0x2a7   :  { %v215_v22 = vmul.f32 %v5517_v20, %v199_v0 }
 0x2a8   :  { %v222_v24 = vmul.f32 %v220_v18, %v216_v21 }
 0x2a9   :  { %v221_v25 = vmul.f32 %v220_v18, %v215_v22 }
 0x2aa   :  { %v5766_v27 = vadd.f32 %v226_v23, %v222_v24 }
 0x2ab   :  { %v5764_v26 = vadd.f32 %v226_v23, %v221_v25  ;;  %v5893_v25 = vld [vmem:[#allocation5 + $0x190] sm:$0xf] }
 0x2ac   :  { %355 = vst.msk [vmem:[#allocation4 + $0x8] sm:$0xf] %vm352_vm5, %v5893_v25  ;;  %356 = vst.msk [vmem:[#allocation4 + $0x18] sm:$0xf] %vm352_vm5, %v5893_v25 }
 0x2ad   :  { %4903 = vmatprep.mubr.msk.f32.mxu1 %vm189_vm4, %v5764_v26 }
 0x2ae   :  { %4904 = vmatmul.mubr.msk.f32.vlgmr.msra.gmra.mrb[0].mxu1 %vm189_vm4, %v5766_v27 }
 0x2af   :  { %4910 = vmatprep.mubr.msk.f32.mxu1 %vm5683_vm7, %v5679_v30 }
 0x381   :  { %v4905_v32 = vpop.f32.mrb[0].mxu1 }
 0x382   :  { %v5776_v34 = vadd.f32 %v4905_v32, %v4574_v31  ;;  %v321_v35 = vpop.f32.mrb[1].mxu1 }
 0x383   :  { %v5778_v36 = vadd.f32 %v4574_v31, %v321_v35  ;;  %v229_v31 = vld [vmem:[%s6442_s2] sm:$0x1] }
 0x384   :  { %338 = vrot.lane.b32.xlu1 %v5776_v34, %s5681_s0  ;;  %333 = vst.msk [vmem:[#allocation2 + $0x8] sm:$0xff] %vm237_vm6, %v5776_v34  ;;  %v231_v35 = vcvt.s32.f32 %v229_v31 }
 0x385   :  { %336 = vrot.lane.b32.xlu0 %v5778_v36, %s5681_s0  ;;  %332 = vst.msk [vmem:[#allocation2] sm:$0xff] %vm237_vm6, %v5778_v36 }
 0x388   :  { %368 = vrot.lane.b32.xlu1 %v5776_v34, %s5682_s7 }
 0x389   :  { %385 = vrot.lane.b32.xlu0 %v330_v29, %s5684_s8 }
 0x38b   :  { %v471_v6 = vld [vmem:[#allocation2 + $0x8] sm:$0xff] }
 0x38c   :  { %366 = vrot.lane.b32.xlu1 %v5778_v36, %s5682_s7  ;;  %v470_v58 = vld [vmem:[#allocation2] sm:$0xff] }
 0x38d   :  { %407 = vrot.lane.b32.xlu0 %v5776_v34, %s5685_s9 }
 0x390   :  { %423 = vrot.lane.b32.xlu1 %v330_v29, %s5686_s10 }
 0x391   :  { %405 = vrot.lane.b32.xlu0 %v5778_v36, %s5685_s9 }
 0x394   :  { %357 = vrot.lane.b32.xlu1 %v5778_v36, %s5684_s8 }
 0x395   :  { %359 = vrot.lane.b32.xlu0 %v5776_v34, %s5684_s8 }
 0x398   :  { %444 = vrot.lane.b32.xlu1 %v5776_v34, %s5687_s11 }
 0x399   :  { %460 = vrot.lane.b32.xlu0 %v330_v29, %s5688_s12  ;;  %v230_v29 = vld [vmem:[%s6442_s2 + $0x1] sm:$0x1]  ;;  %s5689_s2 = smov 64  }
 0x39a   :  { %v232_v32 = vcvt.s32.f32 %v230_v29 }
 0x39c   :  { %442 = vrot.lane.b32.xlu1 %v5778_v36, %s5687_s11 }
 0x39d   :  { %396 = vrot.lane.b32.xlu0 %v5778_v36, %s5686_s10 }
 0x3a0   :  { %398 = vrot.lane.b32.xlu1 %v5776_v34, %s5686_s10 }
 0x3a1   :  { %433 = vrot.lane.b32.xlu0 %v5778_v36, %s5688_s12 }
 0x3a4   :  { %435 = vrot.lane.b32.xlu1 %v5776_v34, %s5688_s12 }
 0x3f6   :  { %v339_v39 = vpop.permute.xlu1 %338 }
 0x3f7   :  { %343 = vst.msk [vmem:[#allocation3 + $0x10] sm:$0xff] %vm237_vm6, %v339_v39  ;;  %v337_v40 = vpop.permute.xlu0 %336  ;;  %v234_v39 = vsub.f32 1.0, %v232_v32 }
 0x3f8   :  { %342 = vst.msk [vmem:[#allocation3] sm:$0xff] %vm237_vm6, %v337_v40  ;;  %v233_v40 = vsub.f32 1.0, %v231_v35 }
 0x3fa   :  { %v369_v41 = vpop.permute.xlu1 %368 }
 0x3fb   :  { %374 = vst.msk [vmem:[#allocation3 + $0x30] sm:$0xff] %vm237_vm6, %v369_v41  ;;  %v386_v42 = vpop.permute.xlu0 %385  ;;  %v236_v41 = vmul.f32 -10000.0, %v234_v39 }
 0x3fc   :  { %388 = vst.msk [vmem:[#allocation3 + $0x28] sm:$0xf] %vm352_vm5, %v386_v42  ;;  %389 = vst.msk [vmem:[#allocation3 + $0x38] sm:$0xf] %vm352_vm5, %v386_v42 }
 0x3fe   :  { %v367_v44 = vpop.permute.xlu1 %366  ;;  %v480_v54 = vld [vmem:[#allocation3 + $0x10] sm:$0xff] }
 0x3ff   :  { %373 = vst.msk [vmem:[#allocation3 + $0x20] sm:$0xff] %vm237_vm6, %v367_v44  ;;  %v408_v45 = vpop.permute.xlu0 %407  ;;  %v478_v46 = vld [vmem:[#allocation3] sm:$0xff]  ;;  %v5271_v59 = vpack.c.bf16 %v481_v55, %v480_v54  ;;  %v235_v44 = vmul.f32 -10000.0, %v233_v40 }
 0x400   :  { %413 = vst.msk [vmem:[#allocation3 + $0x50] sm:$0xff] %vm237_vm6, %v408_v45  ;;  %v5267_v48 = vpack.c.bf16 %v479_v43, %v478_v46  ;;  %v239_v45 = vsel %vm237_vm6, %v236_v41, 0.0 }
 0x401   :  { %v238_v46 = vsel %vm237_vm6, %v235_v44, 0.0  ;;  %v495_v44 = vld [vmem:[#allocation4 + $0x8] sm:$0xf] }
 0x402   :  { %v424_v49 = vpop.permute.xlu1 %423  ;;  %5269 = vmatpush3.bf16.xpose.msk.msra.mxu1 %vm5827_vm8, %v5267_v48  ;;  %v484_v50 = vld [vmem:[#allocation3 + $0x30] sm:$0xff]  ;;  %v5908_v48 = vrot.slane %v239_v45, %v5752_v37  ;;  %v5911_v54 = vrot.slane %v238_v46, %v5752_v37 }
 0x403   :  { %426 = vst.msk [vmem:[#allocation3 + $0x48] sm:$0xf] %vm352_vm5, %v424_v49  ;;  %427 = vst.msk [vmem:[#allocation3 + $0x58] sm:$0xf] %vm352_vm5, %v424_v49  ;;  %v406_v51 = vpop.permute.xlu0 %405  ;;  %v485_v52 = vld [vmem:[#allocation3 + $0x38] sm:$0xf]  ;;  %5270 = vmatprep.subr.bf16.mxu1 %v5680_v33 }
 0x404   :  { %412 = vst.msk [vmem:[#allocation3 + $0x40] sm:$0xff] %vm237_vm6, %v406_v51  ;;  %v5279_v53 = vpack.c.bf16 %v485_v52, %v484_v50  ;;  %v483_v0 = vld [vmem:[#allocation3 + $0x28] sm:$0xf] }
 0x406   :  { %v358_v56 = vpop.permute.xlu1 %357  ;;  %5281 = vmatpush3.bf16.xpose.msk.msra.mxu0 %vm5827_vm8, %v5279_v53  ;;  %v482_v63 = vld [vmem:[#allocation3 + $0x20] sm:$0xff] }
 0x407   :  { %364 = vst.msk [vmem:[#allocation2 + $0x10] sm:$0xff] %vm237_vm6, %v358_v56  ;;  %v360_v57 = vpop.permute.xlu0 %359  ;;  %5286 = vmatprep.subr.bf16.mxu0 %v5680_v33  ;;  %v488_v2 = vld [vmem:[#allocation3 + $0x50] sm:$0xff]  ;;  %v5275_v7 = vpack.c.bf16 %v483_v0, %v482_v63 }
 0x408   :  { %365 = vst.msk [vmem:[#allocation2 + $0x18] sm:$0xff] %vm237_vm6, %v360_v57 }
 0x409   :  { %4911 = vmatmul.mubr.msk.f32.vlgmr.msra.gmra.mrb[2].mxu1 %vm237_vm6, %v470_v58 }
 0x40a   :  { %v445_v60 = vpop.permute.xlu1 %444  ;;  %5273 = vmatpush3.bf16.xpose.msk.msra.mxu1 %vm5827_vm8, %v5271_v59  ;;  %4917 = vmatprep.mubr.msk.f32.mxu1 %vm5683_vm7, %v5679_v30  ;;  %v489_v62 = vld [vmem:[#allocation3 + $0x58] sm:$0xf]  ;;  %v487_v11 = vld [vmem:[#allocation3 + $0x48] sm:$0xf] }
 0x40b   :  { %450 = vst.msk [vmem:[#allocation3 + $0x70] sm:$0xff] %vm237_vm6, %v445_v60  ;;  %v461_v61 = vpop.permute.xlu0 %460  ;;  %5274 = vmatprep.subr.bf16.mxu1 %v5680_v33  ;;  %v5287_v5 = vpack.c.bf16 %v489_v62, %v488_v2  ;;  %v486_v10 = vld [vmem:[#allocation3 + $0x40] sm:$0xff] }
 0x40c   :  { %463 = vst.msk [vmem:[#allocation3 + $0x68] sm:$0xf] %vm352_vm5, %v461_v61  ;;  %464 = vst.msk [vmem:[#allocation3 + $0x78] sm:$0xf] %vm352_vm5, %v461_v61  ;;  %v5283_v16 = vpack.c.bf16 %v487_v11, %v486_v10 }
 0x40e   :  { %v443_v1 = vpop.permute.xlu1 %442  ;;  %v472_v15 = vld [vmem:[#allocation2 + $0x10] sm:$0xff] }
 0x40f   :  { %449 = vst.msk [vmem:[#allocation3 + $0x60] sm:$0xff] %vm237_vm6, %v443_v1  ;;  %v397_v3 = vpop.permute.xlu0 %396  ;;  %v473_v4 = vld [vmem:[#allocation2 + $0x18] sm:$0xff] }
 0x410   :  { %403 = vst.msk [vmem:[#allocation2 + $0x20] sm:$0xff] %vm237_vm6, %v397_v3  ;;  %4932 = vmatmul.mubr.msk.f32.vlgmr.msra.gmra.mrb[2].mxu0 %vm237_vm6, %v473_v4 }
 0x411   :  { %5289 = vmatpush3.bf16.xpose.msk.msra.mxu0 %vm5827_vm8, %v5287_v5  ;;  %4918 = vmatmul.mubr.msk.f32.vlgmr.msra.gmra.mrb[4].mxu1 %vm237_vm6, %v471_v6 }
 0x412   :  { %v399_v8 = vpop.permute.xlu1 %398  ;;  %5277 = vmatpush3.bf16.xpose.msk.msra.mxu1 %vm5827_vm8, %v5275_v7  ;;  %4924 = vmatprep.mubr.msk.f32.mxu1 %vm5683_vm7, %v5679_v30  ;;  %v492_v13 = vld [vmem:[#allocation3 + $0x70] sm:$0xff] }
 0x413   :  { %404 = vst.msk [vmem:[#allocation2 + $0x28] sm:$0xff] %vm237_vm6, %v399_v8  ;;  %v434_v9 = vpop.permute.xlu0 %433  ;;  %5282 = vmatprep.subr.bf16.mxu1 %v5680_v33  ;;  %4945 = vmatprep.mubr.msk.f32.mxu0 %vm5683_vm7, %v5679_v30  ;;  %v493_v14 = vld [vmem:[#allocation3 + $0x78] sm:$0xf]  ;;  %v491_v20 = vld [vmem:[#allocation3 + $0x68] sm:$0xf] }
 0x414   :  { %440 = vst.msk [vmem:[#allocation2 + $0x30] sm:$0xff] %vm237_vm6, %v434_v9  ;;  %5294 = vmatprep.subr.bf16.mxu0 %v5680_v33  ;;  %v5295_v18 = vpack.c.bf16 %v493_v14, %v492_v13 }
 0x416   :  { %v436_v12 = vpop.permute.xlu1 %435  ;;  %v490_v19 = vld [vmem:[#allocation3 + $0x60] sm:$0xff] }
 0x417   :  { %441 = vst.msk [vmem:[#allocation2 + $0x38] sm:$0xff] %vm237_vm6, %v436_v12  ;;  %v474_v21 = vld [vmem:[#allocation2 + $0x20] sm:$0xff]  ;;  %v5291_v22 = vpack.c.bf16 %v491_v20, %v490_v19 }
 0x419   :  { %4925 = vmatmul.mubr.msk.f32.vlgmr.msra.gmra.mrb[6].mxu1 %vm237_vm6, %v472_v15 }
 0x41a   :  { %5285 = vmatpush3.bf16.xpose.msk.msra.mxu1 %vm5827_vm8, %v5283_v16  ;;  %v475_v17 = vld [vmem:[#allocation2 + $0x28] sm:$0xff]  ;;  %4938 = vmatprep.mubr.msk.f32.mxu1 %vm5683_vm7, %v5679_v30 }
 0x41b   :  { %4946 = vmatmul.mubr.msk.f32.vlgmr.msra.gmra.mrb[4].mxu0 %vm237_vm6, %v475_v17  ;;  %5290 = vmatprep.subr.bf16.mxu1 %v5680_v33  ;;  %v476_v24 = vld [vmem:[#allocation2 + $0x30] sm:$0xff] }
 0x41c   :  { %5297 = vmatpush3.bf16.xpose.msk.msra.mxu0 %vm5827_vm8, %v5295_v18  ;;  %4959 = vmatprep.mubr.msk.f32.mxu0 %vm5683_vm7, %v5679_v30 }
 0x41d   :  { %5298 = vmatprep.subr.bf16.mxu0 %v5680_v33 }
 0x41e   :  { %v477_v23 = vld [vmem:[#allocation2 + $0x38] sm:$0xff] }
 0x421   :  { %4939 = vmatmul.mubr.msk.f32.vlgmr.msra.gmra.mrb[8].mxu1 %vm237_vm6, %v474_v21 }
 0x422   :  { %5293 = vmatpush3.bf16.xpose.msk.msra.mxu1 %vm5827_vm8, %v5291_v22  ;;  %4952 = vmatprep.mubr.msk.f32.mxu1 %vm5683_vm7, %v5679_v30 }
 0x423   :  { %4960 = vmatmul.mubr.msk.f32.vlgmr.msra.gmra.mrb[6].mxu0 %vm237_vm6, %v477_v23  ;;  %5306 = vmatprep.subr.bf16.mxu1 %v5680_v33 }
 0x424   :  { %4966 = vmatprep.mubr.msk.f32.mxu0 %vm5683_vm7, %v5679_v30 }
 0x429   :  { %4953 = vmatmul.mubr.msk.f32.vlgmr.msra.gmra.mrb[10].mxu1 %vm237_vm6, %v476_v24 }
 0x42a   :  { %4980 = vmatprep.mubr.msk.f32.mxu1 %vm5683_vm7, %v5679_v30 }
 0x4dc   :  { %v585_v42 = vpop.f32.mrb[2].mxu1 }
 0x4dd   :  { %v4912_v43 = vpop.f32.mrb[3].mxu1  ;;  %v1142_v50 = vmul.f32 0.35355338, %v585_v42 }
 0x4df   :  { %v1158_v60 = vadd.f32 %v5911_v54, %v1142_v50 }
 0x4e1   :  { %v1167_v63 = vsel %vm1166_vm9, %v1158_v60, -inf }
 0x4e3   :  { %v822_v49 = vpop.f32.mrb[2].mxu0 }
 0x4e4   :  { %v1145_v51 = vmul.f32 0.35355338, %v822_v49  ;;  %v664_v52 = vpop.f32.mrb[4].mxu1  ;;  %v4933_v53 = vpop.f32.mrb[3].mxu0 }
 0x4e5   :  { %v1143_v55 = vmul.f32 0.35355338, %v664_v52  ;;  %v4919_v56 = vpop.f32.mrb[5].mxu1 }
 0x4e6   :  { %v1161_v57 = vadd.f32 %v5908_v48, %v1145_v51 }
 0x4e7   :  { %v5915_v58 = vadd.f32 %v5908_v48, %v1143_v55 }
 0x4e8   :  { %v1176_v59 = vsel %vm1166_vm9, %v1161_v57, -inf }
 0x4e9   :  { %1177 = vmax.xlane.f32.xlu0 %v1176_v59  ;;  %v1170_v61 = vsel %vm1166_vm9, %v5915_v58, -inf }
 0x4ea   :  { %1171 = vmax.xlane.f32.xlu1 %v1170_v61 }
 0x4ec   :  { %v743_v62 = vpop.f32.mrb[6].mxu1 }
 0x4ed   :  { %1168 = vmax.xlane.f32.xlu0 %v1167_v63  ;;  %v4926_v0 = vpop.f32.mrb[7].mxu1  ;;  %v1144_v2 = vmul.f32 0.35355338, %v743_v62 }
 0x4ee   :  { %v980_v1 = vpop.f32.mrb[4].mxu0 }
 0x4ef   :  { %v1147_v3 = vmul.f32 0.35355338, %v980_v1  ;;  %v4947_v4 = vpop.f32.mrb[5].mxu0  ;;  %v5925_v7 = vadd.f32 %v5911_v54, %v1144_v2 }
 0x4f1   :  { %v1163_v5 = vadd.f32 %v5908_v48, %v1147_v3  ;;  %v1173_v13 = vsel %vm1166_vm9, %v5925_v7, -inf }
 0x4f3   :  { %v1182_v6 = vsel %vm1166_vm9, %v1163_v5, -inf }
 0x4f4   :  { %1183 = vmax.xlane.f32.xlu0 %v1182_v6  ;;  %v901_v8 = vpop.f32.mrb[8].mxu1 }
 0x4f5   :  { %v4940_v9 = vpop.f32.mrb[9].mxu1  ;;  %v1146_v18 = vmul.f32 0.35355338, %v901_v8 }
 0x4f6   :  { %v1138_v10 = vpop.f32.mrb[6].mxu0 }
 0x4f7   :  { %v1149_v11 = vmul.f32 0.35355338, %v1138_v10  ;;  %v4961_v12 = vpop.f32.mrb[7].mxu0  ;;  %v5947_v20 = vadd.f32 %v5911_v54, %v1146_v18 }
 0x4f8   :  { %1174 = vmax.xlane.f32.xlu0 %v1173_v13 }
 0x4f9   :  { %v5930_v14 = vadd.f32 %v5908_v48, %v1149_v11  ;;  %v1179_v21 = vsel %vm1166_vm9, %v5947_v20, -inf }
 0x4fb   :  { %344 = vrot.lane.b32.xlu1 %v5778_v36, %s5689_s2  ;;  %v1188_v15 = vsel %vm1166_vm9, %v5930_v14, -inf }
 0x4fc   :  { %1189 = vmax.xlane.f32.xlu0 %v1188_v15  ;;  %v1059_v16 = vpop.f32.mrb[10].mxu1 }
 0x4fd   :  { %v4954_v17 = vpop.f32.mrb[11].mxu1  ;;  %v1148_v19 = vmul.f32 0.35355338, %v1059_v16 }
 0x4ff   :  { %375 = vrot.lane.b32.xlu1 %v5778_v36, %s5690_s17  ;;  %v5952_v22 = vadd.f32 %v5911_v54, %v1148_v19 }
 0x501   :  { %v1185_v23 = vsel %vm1166_vm9, %v5952_v22, -inf }
 0x503   :  { %391 = vrot.lane.b32.xlu1 %v5893_v25, %s5684_s8 }
 0x512   :  { %346 = vrot.lane.b32.xlu0 %v5776_v34, %s5689_s2 }
 0x516   :  { %428 = vrot.lane.b32.xlu0 %v5893_v25, %s5686_s10 }
 0x51a   :  { %451 = vrot.lane.b32.xlu0 %v5778_v36, %s5691_s18 }
 0x527   :  { %1180 = vmax.xlane.f32.xlu1 %v1179_v21 }
 0x52b   :  { %1186 = vmax.xlane.f32.xlu1 %v1185_v23 }
 0x53c   :  { %377 = vrot.lane.b32.xlu1 %v5776_v34, %s5690_s17 }
 0x540   :  { %414 = vrot.lane.b32.xlu1 %v5778_v36, %s5692_s19 }
 0x544   :  { %416 = vrot.lane.b32.xlu1 %v5776_v34, %s5692_s19 }
 0x576   :  { %v1178_v24 = vpop.xlane.xlu0 %1177 }
 0x577   :  { %v1194_v29 = vsub.f32 %v1161_v57, %v1178_v24  ;;  %v1172_v31 = vpop.xlane.xlu1 %1171 }
 0x578   :  { %v1192_v43 = vsub.f32 %v5915_v58, %v1172_v31 }
 0x579   :  { %v1205_v32 = vmul.f32 1.442695, %v1194_v29 }
 0x57a   :  { %v1169_v35 = vpop.xlane.xlu0 %1168  ;;  %v1201_v51 = vmul.f32 1.442695, %v1192_v43 }
 0x57b   :  { %5518 = vpow2.f32 %v1205_v32  ;;  %v1191_v39 = vsub.f32 %v1158_v60, %v1169_v35  ;;  %v345_v40 = vpop.permute.xlu1 %344 }
 0x57c   :  { %350 = vst.msk [vmem:[#allocation4] sm:$0xff] %vm237_vm6, %v345_v40 }
 0x57d   :  { %v1199_v41 = vmul.f32 1.442695, %v1191_v39 }
 0x57f   :  { %5520 = vpow2.f32 %v1199_v41  ;;  %v376_v42 = vpop.permute.xlu1 %375 }
 0x580   :  { %382 = vst.msk [vmem:[#allocation4 + $0x20] sm:$0xff] %vm237_vm6, %v376_v42  ;;  %v497_v42 = vld [vmem:[#allocation4 + $0x18] sm:$0xf] }
 0x581   :  { %v1184_v36 = vpop.xlane.xlu0 %1183 }
 0x582   :  { %v1196_v45 = vsub.f32 %v1163_v5, %v1184_v36 }
 0x583   :  { %v392_v49 = vpop.permute.xlu1 %391  ;;  %v494_v50 = vld [vmem:[#allocation4] sm:$0xff] }
 0x584   :  { %v1209_v52 = vmul.f32 1.442695, %v1196_v45  ;;  %394 = vst.msk [vmem:[#allocation4 + $0x28] sm:$0xf] %vm352_vm5, %v392_v49  ;;  %395 = vst.msk [vmem:[#allocation4 + $0x38] sm:$0xf] %vm352_vm5, %v392_v49  ;;  %v5299_v53 = vpack.c.bf16 %v495_v44, %v494_v50 }
 0x585   :  { %v5972_v55 = vpop.eup %5518  ;;  %v1175_v56 = vpop.xlane.xlu0 %1174 }
 0x586   :  { %5522 = vpow2.f32 %v1209_v52  ;;  %v1193_v57 = vsub.f32 %v5925_v7, %v1175_v56  ;;  %5301 = vmatpush3.bf16.msk.msra.mxu0 %vm5966_vm11, %v5299_v53  ;;  %v1224_v58 = vsel %vm1166_vm9, %v5972_v55, 0.0 }
 0x587   :  { %1225 = vadd.xlane.f32.xlu0 %v1224_v58  ;;  %5302 = vmatprep.subr.bf16.mxu0 %v5680_v33  ;;  %5524 = vpow2.f32 %v1201_v51  ;;  %v498_v0 = vld [vmem:[#allocation4 + $0x20] sm:$0xff] }
 0x588   :  { %v1203_v59 = vmul.f32 1.442695, %v1193_v57 }
 0x589   :  { %v5980_v60 = vpop.eup %5520  ;;  %v1190_v61 = vpop.xlane.xlu0 %1189 }
 0x58a   :  { %5526 = vpow2.f32 %v1203_v59  ;;  %v1198_v62 = vsub.f32 %v5930_v14, %v1190_v61  ;;  %v1215_v63 = vsel %vm1166_vm9, %v5980_v60, 0.0 }
 0x58b   :  { %1216 = vadd.xlane.f32.xlu1 %v1215_v63  ;;  %v499_v1 = vld [vmem:[#allocation4 + $0x28] sm:$0xf]  ;;  %v501_v56 = vld [vmem:[#allocation4 + $0x38] sm:$0xf] }
 0x58c   :  { %v1213_v2 = vmul.f32 1.442695, %v1198_v62  ;;  %v5307_v3 = vpack.c.bf16 %v499_v1, %v498_v0 }
 0x58d   :  { %v347_v4 = vpop.permute.xlu0 %346 }
 0x58e   :  { %5528 = vpow2.f32 %v1213_v2  ;;  %351 = vst.msk [vmem:[#allocation4 + $0x10] sm:$0xff] %vm237_vm6, %v347_v4  ;;  %5309 = vmatpush3.bf16.msk.msra.mxu1 %vm5966_vm11, %v5307_v3 }
 0x58f   :  { %5314 = vmatprep.subr.bf16.mxu1 %v5680_v33 }
 0x590   :  { %v5989_v5 = vpop.eup %5522 }
 0x591   :  { %v429_v6 = vpop.permute.xlu0 %428  ;;  %v1230_v7 = vsel %vm1166_vm9, %v5989_v5, 0.0  ;;  %v5525_v8 = vpop.eup %5524 }
 0x592   :  { %431 = vst.msk [vmem:[#allocation4 + $0x48] sm:$0xf] %vm352_vm5, %v429_v6  ;;  %432 = vst.msk [vmem:[#allocation4 + $0x58] sm:$0xf] %vm352_vm5, %v429_v6  ;;  %1231 = vadd.xlane.f32.xlu0 %v1230_v7  ;;  %v1218_v11 = vsel %vm1166_vm9, %v5525_v8, 0.0 }
 0x594   :  { %v5527_v9 = vpop.eup %5526 }
 0x595   :  { %v452_v10 = vpop.permute.xlu0 %451  ;;  %v1221_v12 = vsel %vm1166_vm9, %v5527_v9, 0.0  ;;  %v496_v41 = vld [vmem:[#allocation4 + $0x10] sm:$0xff] }
 0x596   :  { %458 = vst.msk [vmem:[#allocation4 + $0x60] sm:$0xff] %vm237_vm6, %v452_v10  ;;  %1219 = vadd.xlane.f32.xlu0 %v1218_v11  ;;  %1222 = vadd.xlane.f32.xlu1 %v1221_v12  ;;  %v5303_v49 = vpack.c.bf16 %v497_v42, %v496_v41  ;;  %v1897_v42 = vld [vmem:[#allocation5 + $0xf0] sm:$0xff] }
 0x598   :  { %v5998_v13 = vpop.eup %5528 }
 0x599   :  { %v1236_v14 = vsel %vm1166_vm9, %v5998_v13, 0.0  ;;  %v503_v51 = vld [vmem:[#allocation4 + $0x48] sm:$0xf]  ;;  %v505_v62 = vld [vmem:[#allocation4 + $0x58] sm:$0xf] }
 0x59a   :  { %1237 = vadd.xlane.f32.xlu0 %v1236_v14 }
 0x5b4   :  { %v1181_v15 = vpop.xlane.xlu1 %1180 }
 0x5b5   :  { %v1195_v16 = vsub.f32 %v5947_v20, %v1181_v15 }
 0x5b7   :  { %v1207_v17 = vmul.f32 1.442695, %v1195_v16 }
 0x5b8   :  { %v1187_v18 = vpop.xlane.xlu1 %1186 }
 0x5b9   :  { %5530 = vpow2.f32 %v1207_v17  ;;  %v1197_v19 = vsub.f32 %v5952_v22, %v1187_v18 }
 0x5bb   :  { %v1211_v21 = vmul.f32 1.442695, %v1197_v19 }
 0x5bc   :  { %v378_v23 = vpop.permute.xlu1 %377 }
 0x5bd   :  { %5532 = vpow2.f32 %v1211_v21  ;;  %383 = vst.msk [vmem:[#allocation4 + $0x30] sm:$0xff] %vm237_vm6, %v378_v23 }
 0x5c0   :  { %v415_v24 = vpop.permute.xlu1 %414 }
 0x5c1   :  { %421 = vst.msk [vmem:[#allocation4 + $0x40] sm:$0xff] %vm237_vm6, %v415_v24 }
 0x5c3   :  { %v6006_v29 = vpop.eup %5530 }
 0x5c4   :  { %v417_v31 = vpop.permute.xlu1 %416  ;;  %v1227_v32 = vsel %vm1166_vm9, %v6006_v29, 0.0 }
 0x5c5   :  { %422 = vst.msk [vmem:[#allocation4 + $0x50] sm:$0xff] %vm237_vm6, %v417_v31  ;;  %1228 = vadd.xlane.f32.xlu1 %v1227_v32 }
 0x5c7   :  { %v6011_v20 = vpop.eup %5532 }
 0x5c8   :  { %v1233_v22 = vsel %vm1166_vm9, %v6011_v20, 0.0  ;;  %v502_v50 = vld [vmem:[#allocation4 + $0x40] sm:$0xff] }
 0x5c9   :  { %1234 = vadd.xlane.f32.xlu0 %v1233_v22 }
 0x5cc   :  { %v504_v61 = vld [vmem:[#allocation4 + $0x50] sm:$0xff] }
 0x5cd   :  { %v5319_v1 = vpack.c.bf16 %v505_v62, %v504_v61 }
 0x5d6   :  { %465 = vrot.lane.b32.xlu1 %v5893_v25, %s5688_s12 }
 0x5df   :  { %453 = vrot.lane.b32.xlu0 %v5776_v34, %s5691_s18  ;;  %v500_v34 = vld [vmem:[#allocation4 + $0x30] sm:$0xff] }
 0x5e0   :  { %v5311_v59 = vpack.c.bf16 %v501_v56, %v500_v34 }
 0x614   :  { %v1226_v39 = vpop.xlane.xlu0 %1225 }
 0x618   :  { %v1217_v35 = vpop.xlane.xlu1 %1216 }
 0x619   :  { %5534 = vrcp.f32 %v1217_v35 }
 0x61f   :  { %v1232_v40 = vpop.xlane.xlu0 %1231 }
 0x623   :  { %v5535_v43 = vpop.eup %5534  ;;  %v1220_v36 = vpop.xlane.xlu0 %1219 }
 0x624   :  { %v1223_v44 = vpop.xlane.xlu1 %1222  ;;  %v1247_v45 = vmul.f32 %v5535_v43, %v5980_v60  ;;  %5536 = vrcp.f32 %v1220_v36  ;;  %v5315_v60 = vpack.c.bf16 %v503_v51, %v502_v50  ;;  %v1898_v43 = vld [vmem:[#allocation5 + $0xf8] sm:$0xff] }
 0x625   :  { %5538 = vrcp.f32 %v1223_v44  ;;  %v5334_v36 = vpack.c.bf16 %v1898_v43, %v1897_v42 }
 0x626   :  { %5540 = vrcp.f32 %v1226_v39  ;;  %4967 = vmatmul.mubr.msk.f32.vlgmr.msra.gmra.mrb[8].mxu0 %vm1166_vm9, %v1247_v45 }
 0x627   :  { %5305 = vmatpush3.bf16.msk.msra.mxu0 %vm5966_vm11, %v5303_v49  ;;  %4973 = vmatprep.mubr.msk.f32.mxu0 %vm5683_vm7, %v5679_v30  ;;  %5542 = vrcp.f32 %v1232_v40  ;;  %v1238_v2 = vpop.xlane.xlu0 %1237  ;;  %v1896_v40 = vld [vmem:[#allocation5 + $0xe8] sm:$0xff] }
 0x628   :  { %5310 = vmatprep.subr.bf16.mxu0 %v5680_v33 }
 0x62e   :  { %v5537_v25 = vpop.eup %5536 }
 0x62f   :  { %v5539_v52 = vpop.eup %5538  ;;  %v1248_v53 = vmul.f32 %v5537_v25, %v5525_v8 }
 0x630   :  { %v5541_v57 = vpop.eup %5540  ;;  %v1249_v58 = vmul.f32 %v5539_v52, %v5527_v9  ;;  %v506_v9 = vld [vmem:[#allocation4 + $0x60] sm:$0xff] }
 0x631   :  { %4974 = vmatmul.mubr.msk.f32.vlgmr.msra.gmra.mrb[10].mxu0 %vm1166_vm9, %v1248_v53  ;;  %v1250_v63 = vmul.f32 %v5541_v57, %v5972_v55  ;;  %v5543_v0 = vpop.eup %5542 }
 0x632   :  { %4981 = vmatmul.mubr.msk.f32.vlgmr.msra.gmra.mrb[12].mxu1 %vm1166_vm9, %v1249_v58  ;;  %5313 = vmatpush3.bf16.msk.msra.mxu0 %vm5966_vm11, %v5311_v59  ;;  %v1252_v55 = vmul.f32 %v5543_v0, %v5989_v5 }
 0x633   :  { %5317 = vmatpush3.bf16.msk.msra.mxu1 %vm5966_vm11, %v5315_v60  ;;  %4987 = vmatprep.mubr.msk.f32.mxu0 %vm5683_vm7, %v5679_v30 }
 0x634   :  { %5318 = vmatprep.subr.bf16.mxu0 %v5680_v33  ;;  %4994 = vmatprep.mubr.msk.f32.mxu1 %vm5683_vm7, %v5679_v30 }
 0x635   :  { %4988 = vmatmul.mubr.msk.f32.vlgmr.msra.gmra.mrb[12].mxu0 %vm1166_vm9, %v1250_v63  ;;  %5322 = vmatprep.subr.bf16.mxu1 %v5680_v33 }
 0x636   :  { %5321 = vmatpush3.bf16.msk.msra.mxu0 %vm5966_vm11, %v5319_v1  ;;  %5001 = vmatprep.mubr.msk.f32.mxu0 %vm5683_vm7, %v5679_v30  ;;  %v4617_v1 = vld [vmem:[#allocation5 + $0x100] ss:$0 sm:$0xff] }
 0x637   :  { %5326 = vmatprep.subr.bf16.mxu0 %v5680_v33 }
 0x639   :  { %5002 = vmatmul.mubr.msk.f32.vlgmr.msra.gmra.mrb[14].mxu0 %vm1166_vm9, %v1252_v55 }
 0x63a   :  { %5015 = vmatprep.mubr.msk.f32.mxu0 %vm5683_vm7, %v5679_v30 }
 0x652   :  { %v1229_v3 = vpop.xlane.xlu1 %1228 }
 0x653   :  { %5544 = vrcp.f32 %v1229_v3 }
 0x656   :  { %v1235_v4 = vpop.xlane.xlu0 %1234  ;;  %v466_v6 = vpop.permute.xlu1 %465 }
 0x657   :  { %5546 = vrcp.f32 %v1235_v4  ;;  %468 = vst.msk [vmem:[#allocation4 + $0x68] sm:$0xf] %vm352_vm5, %v466_v6  ;;  %469 = vst.msk [vmem:[#allocation4 + $0x78] sm:$0xf] %vm352_vm5, %v466_v6 }
 0x658   :  { %5548 = vrcp.f32 %v1238_v2 }
 0x65a   :  { %v454_v7 = vpop.permute.xlu0 %453 }
 0x65b   :  { %459 = vst.msk [vmem:[#allocation4 + $0x70] sm:$0xff] %vm237_vm6, %v454_v7 }
 0x65d   :  { %v5545_v5 = vpop.eup %5544 }
 0x65e   :  { %v1251_v8 = vmul.f32 %v5545_v5, %v6006_v29  ;;  %v507_v10 = vld [vmem:[#allocation4 + $0x68] sm:$0xf]  ;;  %v509_v12 = vld [vmem:[#allocation4 + $0x78] sm:$0xf] }
 0x65f   :  { %v5323_v11 = vpack.c.bf16 %v507_v10, %v506_v9 }
 0x660   :  { %4995 = vmatmul.mubr.msk.f32.vlgmr.msra.gmra.mrb[14].mxu1 %vm1166_vm9, %v1251_v8 }
 0x661   :  { %v5547_v14 = vpop.eup %5546  ;;  %5325 = vmatpush3.bf16.msk.msra.mxu1 %vm5966_vm11, %v5323_v11  ;;  %5008 = vmatprep.mubr.msk.f32.mxu1 %vm5683_vm7, %v5679_v30 }
 0x662   :  { %v1253_v15 = vmul.f32 %v5547_v14, %v6011_v20  ;;  %v508_v16 = vld [vmem:[#allocation4 + $0x70] sm:$0xff]  ;;  %v5549_v17 = vpop.eup %5548 }
 0x663   :  { %v5327_v18 = vpack.c.bf16 %v509_v12, %v508_v16  ;;  %v1254_v19 = vmul.f32 %v5549_v17, %v5998_v13  ;;  %v1895_v13 = vld [vmem:[#allocation5 + $0xe0] sm:$0xff] }
 0x664   :  { %5009 = vmatmul.mubr.msk.f32.vlgmr.msra.gmra.mrb[16].mxu1 %vm1166_vm9, %v1253_v15  ;;  %v5330_v41 = vpack.c.bf16 %v1896_v40, %v1895_v13  ;;  %v1987_v13 = vld [vmem:[#allocation5 + $0x108] sm:$0x3] }
 0x665   :  { %5329 = vmatpush3.bf16.msk.msra.mxu0 %vm5966_vm11, %v5327_v18  ;;  %v2017_v40 = vrot.slane %v1987_v13, %v5752_v37 }
 0x666   :  { %5331 = vmatprep.subr.bf16.mxu1 %v5330_v41 }
 0x667   :  { %5333 = vmatpush3.bf16.msra.mxu1 %v5330_v41 }
 0x668   :  { %5016 = vmatmul.mubr.msk.f32.vlgmr.msra.gmra.mrb[16].mxu0 %vm1166_vm9, %v1254_v19  ;;  %5335 = vmatprep.subr.bf16.mxu1 %v5334_v36  ;;  %v2027_v19 = vld [vmem:[#allocation5 + $0x118] sm:$0xff] }
 0x66b   :  { %5337 = vmatpush3.bf16.msra.mxu1 %v5334_v36 }
 0x6f9   :  { %v1327_v21 = vpop.f32.mrb[8].mxu0 }
 0x6fa   :  { %v4968_v23 = vpop.f32.mrb[9].mxu0 }
 0x6fb   :  { %v2028_v23 = vld [vmem:[#allocation5 + $0x120] sm:$0xff] }
 0x704   :  { %v1403_v24 = vpop.f32.mrb[10].mxu0 }
 0x705   :  { %v1479_v29 = vpop.f32.mrb[12].mxu1  ;;  %v4975_v31 = vpop.f32.mrb[11].mxu0 }
 0x706   :  { %1865 = vrot.lane.b32.xlu1 %v1479_v29, %s5676_s26  ;;  %v4982_v32 = vpop.f32.mrb[13].mxu1 }
 0x708   :  { %v1555_v20 = vpop.f32.mrb[12].mxu0 }
 0x709   :  { %1867 = vrot.lane.b32.xlu0 %v1555_v20, %s5676_s26  ;;  %v4989_v22 = vpop.f32.mrb[13].mxu0 }
 0x70c   :  { %v1707_v35 = vpop.f32.mrb[14].mxu0 }
 0x70d   :  { %1875 = vrot.lane.b32.xlu0 %v1707_v35, %s5694_s20  ;;  %v5003_v39 = vpop.f32.mrb[15].mxu0 }
 0x733   :  { %v1631_v44 = vpop.f32.mrb[14].mxu1 }
 0x734   :  { %1873 = vrot.lane.b32.xlu1 %v1631_v44, %s5694_s20  ;;  %v4996_v45 = vpop.f32.mrb[15].mxu1  ;;  %v2023_v44 = vrot.slane %v1987_v13, %v5754_v38 }
 0x737   :  { %v1783_v49 = vpop.f32.mrb[16].mxu1 }
 0x738   :  { %1881 = vrot.lane.b32.xlu1 %v1783_v49, %s5695_s21  ;;  %v5010_v34 = vpop.f32.mrb[17].mxu1 }
 0x73b   :  { %v1859_v25 = vpop.f32.mrb[16].mxu0 }
 0x73c   :  { %1883 = vrot.lane.b32.xlu0 %v1859_v25, %s5695_s21  ;;  %v5017_v50 = vpop.f32.mrb[17].mxu0 }
 0x73d   :  { %v2170_v50 = vld [vmem:[#allocation5 + $0x138] sm:$0xff] }
 0x778   :  { %v1866_v51 = vpop.permute.xlu1 %1865 }
 0x779   :  { %v1887_v56 = vsel %vm237_vm6, %v1327_v21, %v1866_v51  ;;  %v2171_v51 = vld [vmem:[#allocation5 + $0x140] sm:$0xff] }
 0x77b   :  { %v1868_v52 = vpop.permute.xlu0 %1867 }
 0x77c   :  { %v1888_v61 = vsel %vm237_vm6, %v1403_v24, %v1868_v52  ;;  %v2029_v24 = vld [vmem:[#allocation5 + $0x128] sm:$0xff]  ;;  %v5346_v52 = vpack.c.bf16 %v2171_v51, %v2170_v50 }
 0x77d   :  { %v5342_v29 = vpack.c.bf16 %v2029_v24, %v2028_v23 }
 0x77e   :  { %5347 = vmatprep.subr.bf16.mxu1 %v5346_v52 }
 0x77f   :  { %v1876_v57 = vpop.permute.xlu0 %1875 }
 0x780   :  { %v1891_v62 = vsel %vm1889_vm13, %v1888_v61, %v1876_v57  ;;  %v2176_v61 = vld [vmem:[#allocation5 + $0x168] sm:$0xff] }
 0x7a6   :  { %v1874_v53 = vpop.permute.xlu1 %1873 }
 0x7a7   :  { %v1890_v58 = vsel %vm1889_vm13, %v1887_v56, %v1874_v53  ;;  %v2172_v53 = vld [vmem:[#allocation5 + $0x148] sm:$0xff]  ;;  %v2173_v56 = vld [vmem:[#allocation5 + $0x150] sm:$0xff] }
 0x7a8   :  { %v5350_v57 = vpack.c.bf16 %v2173_v56, %v2172_v53 }
 0x7aa   :  { %v1882_v59 = vpop.permute.xlu1 %1881 }
 0x7ab   :  { %v1893_v60 = vsel %vm1892_vm12, %v1890_v58, %v1882_v59  ;;  %v2174_v58 = vld [vmem:[#allocation5 + $0x158] sm:$0xff]  ;;  %v2175_v59 = vld [vmem:[#allocation5 + $0x160] sm:$0xff] }
 0x7ac   :  { %5026 = vmatprep.mubr.msk.f32.mxu1 %vm189_vm4, %v1893_v60  ;;  %v5354_v60 = vpack.c.bf16 %v2175_v59, %v2174_v58 }
 0x7ae   :  { %v1884_v63 = vpop.permute.xlu0 %1883 }
 0x7af   :  { %v1894_v0 = vsel %vm1892_vm12, %v1891_v62, %v1884_v63  ;;  %v2177_v62 = vld [vmem:[#allocation5 + $0x170] sm:$0xff] }
 0x7b0   :  { %5027 = vmatmul.mubr.msk.f32.vlgmr.msra.gmra.mrb[18].mxu1 %vm189_vm4, %v1894_v0  ;;  %v5358_v63 = vpack.c.bf16 %v2177_v62, %v2176_v61  ;;  %v4620_v0 = vld [vmem:[#allocation5 + $0x130] ss:$0 sm:$0xff] }
 0x7b1   :  { %5349 = vmatpush3.bf16.msra.mxu1 %v5346_v52 }
 0x7b2   :  { %5351 = vmatprep.subr.bf16.mxu1 %v5350_v57 }
 0x7b5   :  { %5353 = vmatpush3.bf16.msra.mxu1 %v5350_v57 }
 0x7b6   :  { %5355 = vmatprep.subr.bf16.mxu1 %v5354_v60 }
 0x7b9   :  { %5357 = vmatpush3.bf16.msra.mxu1 %v5354_v60 }
 0x7ba   :  { %5359 = vmatprep.subr.bf16.mxu1 %v5358_v63 }
 0x7bd   :  { %5361 = vmatpush3.bf16.msra.mxu1 %v5358_v63 }
 0x7be   :  { %5374 = vmatprep.subr.bf16.mxu1 %v5680_v33 }
 0x883   :  { %v5028_v55 = vpop.f32.mrb[18].mxu1 }
 0x884   :  { %v1982_v2 = vadd.f32 %v5028_v55, %v4617_v1  ;;  %v1976_v3 = vpop.f32.mrb[19].mxu1 }
 0x885   :  { %v1977_v4 = vadd.f32 %v4617_v1, %v1976_v3 }
 0x886   :  { %v1986_v6 = vadd.f32 %v1982_v2, %v5766_v27 }
 0x887   :  { %v1985_v7 = vadd.f32 %v1977_v4, %v5764_v26  ;;  %v2026_v26 = vld [vmem:[#allocation5 + $0x110] sm:$0xff] }
 0x888   :  { %v1991_v5 = vsel %vm189_vm4, %v1986_v6, 0.0  ;;  %v5338_v21 = vpack.c.bf16 %v2027_v19, %v2026_v26 }
 0x889   :  { %1992 = vadd.xlane.f32.xlu0 %v1991_v5  ;;  %v1988_v8 = vsel %vm189_vm4, %v1985_v7, 0.0 }
 0x88a   :  { %1989 = vadd.xlane.f32.xlu1 %v1988_v8  ;;  %5339 = vmatprep.subr.bf16.mxu0 %v5338_v21 }
 0x88b   :  { %5341 = vmatpush3.bf16.msra.mxu0 %v5338_v21 }
 0x88c   :  { %5343 = vmatprep.subr.bf16.mxu0 %v5342_v29 }
 0x88f   :  { %5345 = vmatpush3.bf16.msra.mxu0 %v5342_v29 }
 0x916   :  { %v1993_v9 = vpop.xlane.xlu0 %1992 }
 0x917   :  { %v1995_v10 = vmul.f32 0.03125, %v1993_v9  ;;  %v1990_v11 = vpop.xlane.xlu1 %1989 }
 0x918   :  { %v1994_v12 = vmul.f32 0.03125, %v1990_v11 }
 0x919   :  { %v1997_v14 = vsub.f32 %v1986_v6, %v1995_v10 }
 0x91a   :  { %v1996_v15 = vsub.f32 %v1985_v7, %v1994_v12 }
 0x91b   :  { %v1999_v16 = vmul.f32 %v1997_v14, %v1997_v14 }
 0x91c   :  { %v1998_v17 = vmul.f32 %v1996_v15, %v1996_v15 }
 0x91d   :  { %v2003_v18 = vsel %vm189_vm4, %v1999_v16, 0.0 }
 0x91e   :  { %2004 = vadd.xlane.f32.xlu1 %v2003_v18  ;;  %v2000_v27 = vsel %vm189_vm4, %v1998_v17, 0.0 }
 0x91f   :  { %2001 = vadd.xlane.f32.xlu0 %v2000_v27 }
 0x9ab   :  { %v2005_v31 = vpop.xlane.xlu1 %2004 }
 0x9ac   :  { %v2007_v32 = vmul.f32 0.03125, %v2005_v31  ;;  %v2002_v20 = vpop.xlane.xlu0 %2001 }
 0x9ad   :  { %v2006_v22 = vmul.f32 0.03125, %v2002_v20 }
 0x9ae   :  { %v2009_v35 = vadd.f32 1e-12, %v2007_v32 }
 0x9af   :  { %v2008_v39 = vadd.f32 1e-12, %v2006_v22 }
 0x9b0   :  { %5550 = vrsqrt.f32 %v2009_v35 }
 0x9b1   :  { %5552 = vrsqrt.f32 %v2008_v39 }
 0x9ba   :  { %v5551_v41 = vpop.eup %5550 }
 0x9bb   :  { %v5553_v42 = vpop.eup %5552  ;;  %v2013_v43 = vmul.f32 %v5551_v41, %v1997_v14 }
 0x9bc   :  { %v2012_v36 = vmul.f32 %v5553_v42, %v1996_v15 }
 0x9bd   :  { %v2019_v45 = vmul.f32 %v2017_v40, %v2013_v43 }
 0x9be   :  { %v2018_v49 = vmul.f32 %v2017_v40, %v2012_v36 }
 0x9bf   :  { %v6088_v25 = vadd.f32 %v2023_v44, %v2019_v45 }
 0x9c0   :  { %v6086_v34 = vadd.f32 %v2023_v44, %v2018_v49 }
 0x9c2   :  { %5037 = vmatprep.mubr.msk.f32.mxu0 %vm189_vm4, %v6086_v34 }
 0x9c3   :  { %5038 = vmatmul.mubr.msk.f32.vlgmr.msra.gmra.mrb[18].mxu0 %vm189_vm4, %v6088_v25 }
 0xa96   :  { %v5039_v1 = vpop.f32.mrb[18].mxu0 }
 0xa97   :  { %v2113_v55 = vadd.f32 %v5039_v1, %v4620_v0  ;;  %v2107_v2 = vpop.f32.mrb[19].mxu0 }
 0xa98   :  { %v2108_v3 = vadd.f32 %v4620_v0, %v2107_v2  ;;  %v4627_v2 = vld [vmem:[#allocation5 + $0x178] ss:$0 sm:$0xff] }
 0xa99   :  { %v2117_v4 = vmul.f32 0.70710677, %v2113_v55  ;;  %v2165_v63 = vmul.f32 0.5, %v2113_v55 }
 0xa9a   :  { %v2116_v6 = vmul.f32 0.70710677, %v2108_v3  ;;  %v2164_v61 = vmul.f32 0.5, %v2108_v3 }
 0xa9b   :  { %v2119_v7 = vand.u32 2147483647, %v2117_v4  ;;  %vm2159_vm14 = vcmp.ge.f32.partialorder %v2117_v4, 0.0 }
 0xa9c   :  { %v2118_v5 = vand.u32 2147483647, %v2116_v6  ;;  %vm2158_vm15 = vcmp.ge.f32.partialorder %v2116_v6, 0.0 }
 0xa9d   :  { %v2121_v8 = vmul.f32 0.3275911, %v2119_v7  ;;  %v2147_v12 = vsub.f32 0.0, %v2119_v7 }
 0xa9e   :  { %v2120_v9 = vmul.f32 0.3275911, %v2118_v5  ;;  %v2146_v14 = vsub.f32 0.0, %v2118_v5 }
 0xa9f   :  { %v2123_v10 = vadd.f32 1.0, %v2121_v8  ;;  %v2149_v16 = vmul.f32 %v2147_v12, %v2119_v7 }
 0xaa0   :  { %v2122_v11 = vadd.f32 1.0, %v2120_v9  ;;  %v2148_v27 = vmul.f32 %v2146_v14, %v2118_v5 }
 0xaa1   :  { %5554 = vrcp.f32 %v2123_v10  ;;  %v2152_v21 = vmul.f32 1.442695, %v2149_v16 }
 0xaa2   :  { %5556 = vrcp.f32 %v2122_v11  ;;  %v2150_v29 = vmul.f32 1.442695, %v2148_v27 }
 0xaa3   :  { %5558 = vpow2.f32 %v2152_v21  ;;  %v2308_v21 = vld [vmem:[#allocation5 + $0x1a8] sm:$0xff] }
 0xaa4   :  { %5560 = vpow2.f32 %v2150_v29 }
 0xaab   :  { %v5555_v15 = vpop.eup %5554 }
 0xaac   :  { %v5557_v17 = vpop.eup %5556  ;;  %v2129_v18 = vmul.f32 1.0614054, %v5555_v15 }
 0xaad   :  { %v2128_v26 = vmul.f32 1.0614054, %v5557_v17  ;;  %v5559_v44 = vpop.eup %5558 }
 0xaae   :  { %v4624_v19 = vadd.f32 -1.4531521, %v2129_v18  ;;  %v5561_v49 = vpop.eup %5560 }
 0xaaf   :  { %v4623_v23 = vadd.f32 -1.4531521, %v2128_v26  ;;  %v2307_v26 = vld [vmem:[#allocation5 + $0x1a0] sm:$0xff] }
 0xab0   :  { %v2133_v24 = vmul.f32 %v5555_v15, %v4624_v19 }
 0xab1   :  { %v2132_v31 = vmul.f32 %v5557_v17, %v4623_v23  ;;  %v2309_v23 = vld [vmem:[#allocation5 + $0x1b0] sm:$0xff] }
 0xab2   :  { %v2135_v32 = vadd.f32 1.4214138, %v2133_v24  ;;  %v5366_v24 = vpack.c.bf16 %v2309_v23, %v2308_v21 }
 0xab3   :  { %v2134_v20 = vadd.f32 1.4214138, %v2132_v31 }
 0xab4   :  { %v2137_v22 = vmul.f32 %v5555_v15, %v2135_v32 }
 0xab5   :  { %v2136_v35 = vmul.f32 %v5557_v17, %v2134_v20 }
 0xab6   :  { %v4626_v39 = vadd.f32 -0.28449672, %v2137_v22 }
 0xab7   :  { %v4625_v13 = vadd.f32 -0.28449672, %v2136_v35 }
 0xab8   :  { %v2141_v40 = vmul.f32 %v5555_v15, %v4626_v39  ;;  %v2267_v39 = vld [vmem:[#allocation5 + $0x180] sm:$0x3] }
 0xab9   :  { %v2140_v41 = vmul.f32 %v5557_v17, %v4625_v13  ;;  %v2297_v13 = vrot.slane %v2267_v39, %v5752_v37 }
 0xaba   :  { %v2143_v42 = vadd.f32 0.2548296, %v2141_v40 }
 0xabb   :  { %v2142_v43 = vadd.f32 0.2548296, %v2140_v41 }
 0xabc   :  { %v2145_v36 = vmul.f32 %v5555_v15, %v2143_v42 }
 0xabd   :  { %v2144_v45 = vmul.f32 %v5557_v17, %v2142_v43 }
 0xabe   :  { %v2155_v50 = vmul.f32 %v5559_v44, %v2145_v36  ;;  %v2303_v36 = vrot.slane %v2267_v39, %v5754_v38 }
 0xabf   :  { %v2154_v51 = vmul.f32 %v5561_v49, %v2144_v45 }
 0xac0   :  { %v2157_v52 = vsub.f32 1.0, %v2155_v50 }
 0xac1   :  { %v2156_v53 = vsub.f32 1.0, %v2154_v51  ;;  %v2396_v51 = vld [vmem:[#allocation5 + $0x268] sm:$0xf] }
 0xac2   :  { %v2161_v56 = vsub.f32 0.0, %v2157_v52  ;;  %2418 = vst.msk [vmem:[#allocation3 + $0x8] sm:$0xf] %vm352_vm5, %v2396_v51  ;;  %2419 = vst.msk [vmem:[#allocation3 + $0x18] sm:$0xf] %vm352_vm5, %v2396_v51 }
 0xac3   :  { %v2160_v57 = vsub.f32 0.0, %v2156_v53 }
 0xac4   :  { %v2163_v58 = vsel %vm2159_vm14, %v2157_v52, %v2161_v56  ;;  %v6120_v52 = vld [vmem:[#allocation5 + $0x270] sm:$0xf] }
 0xac5   :  { %v2167_v59 = vadd.f32 1.0, %v2163_v58  ;;  %v2162_v60 = vsel %vm2158_vm15, %v2156_v53, %v2160_v57  ;;  %2420 = vst.msk [vmem:[#allocation4 + $0x8] sm:$0xf] %vm352_vm5, %v6120_v52  ;;  %2421 = vst.msk [vmem:[#allocation4 + $0x18] sm:$0xf] %vm352_vm5, %v6120_v52 }
 0xac6   :  { %v2166_v62 = vadd.f32 1.0, %v2162_v60  ;;  %v4630_v53 = vld [vmem:[#allocation5 + $0x1b8] ss:$0 sm:$0xff] }
 0xac7   :  { %v2169_v1 = vmul.f32 %v2167_v59, %v2165_v63 }
 0xac8   :  { %v2168_v0 = vmul.f32 %v2166_v62, %v2164_v61 }
 0xaca   :  { %5056 = vmatprep.mubr.msk.f32.mxu1 %vm2183_vm0, %v2168_v0  ;;  %v2537_v0 = vld [vmem:[#allocation3 + $0x18] sm:$0xf] }
 0xacb   :  { %5057 = vmatmul.mubr.msk.f32.vlgmr.msra.gmra.mrb[20].mxu1 %vm2183_vm0, %v2169_v1  ;;  %v2535_v1 = vld [vmem:[#allocation3 + $0x8] sm:$0xf] }
 0xacc   :  { %5081 = vmatprep.mubr.msk.f32.mxu1 %vm5683_vm7, %v5679_v30  ;;  %v2551_v47 = vld [vmem:[#allocation4 + $0x8] sm:$0xf] }
 0xb9e   :  { %v5058_v4 = vpop.f32.mrb[20].mxu1 }
 0xb9f   :  { %v2262_v7 = vadd.f32 %v5058_v4, %v4627_v2  ;;  %v2256_v5 = vpop.f32.mrb[21].mxu1 }
 0xba0   :  { %v2257_v6 = vadd.f32 %v4627_v2, %v2256_v5 }
 0xba1   :  { %v2266_v8 = vadd.f32 %v2262_v7, %v6088_v25 }
 0xba2   :  { %v2265_v3 = vadd.f32 %v2257_v6, %v6086_v34  ;;  %v2306_v34 = vld [vmem:[#allocation5 + $0x198] sm:$0xff] }
 0xba3   :  { %v2271_v55 = vsel %vm189_vm4, %v2266_v8, 0.0  ;;  %v5362_v19 = vpack.c.bf16 %v2307_v26, %v2306_v34 }
 0xba4   :  { %2272 = vadd.xlane.f32.xlu1 %v2271_v55  ;;  %v2268_v9 = vsel %vm189_vm4, %v2265_v3, 0.0 }
 0xba5   :  { %2269 = vadd.xlane.f32.xlu0 %v2268_v9  ;;  %5363 = vmatprep.subr.bf16.mxu0 %v5362_v19 }
 0xba6   :  { %5365 = vmatpush3.bf16.msra.mxu0 %v5362_v19 }
 0xba7   :  { %5367 = vmatprep.subr.bf16.mxu0 %v5366_v24 }
 0xbaa   :  { %5369 = vmatpush3.bf16.msra.mxu0 %v5366_v24 }
 0xbab   :  { %5370 = vmatprep.subr.bf16.mxu0 %v5680_v33 }
 0xc31   :  { %v2273_v10 = vpop.xlane.xlu1 %2272 }
 0xc32   :  { %v2275_v11 = vmul.f32 0.03125, %v2273_v10  ;;  %v2270_v12 = vpop.xlane.xlu0 %2269 }
 0xc33   :  { %v2274_v14 = vmul.f32 0.03125, %v2270_v12 }
 0xc34   :  { %v2277_v15 = vsub.f32 %v2266_v8, %v2275_v11 }
 0xc35   :  { %v2276_v16 = vsub.f32 %v2265_v3, %v2274_v14 }
 0xc36   :  { %v2279_v17 = vmul.f32 %v2277_v15, %v2277_v15 }
 0xc37   :  { %v2278_v18 = vmul.f32 %v2276_v16, %v2276_v16 }
 0xc38   :  { %v2283_v27 = vsel %vm189_vm4, %v2279_v17, 0.0 }
 0xc39   :  { %2284 = vadd.xlane.f32.xlu1 %v2283_v27  ;;  %v2280_v25 = vsel %vm189_vm4, %v2278_v18, 0.0 }
 0xc3a   :  { %2281 = vadd.xlane.f32.xlu0 %v2280_v25 }
 0xcc6   :  { %v2285_v29 = vpop.xlane.xlu1 %2284 }
 0xcc7   :  { %v2287_v31 = vmul.f32 0.03125, %v2285_v29  ;;  %v2282_v32 = vpop.xlane.xlu0 %2281 }
 0xcc8   :  { %v2286_v20 = vmul.f32 0.03125, %v2282_v32 }
 0xcc9   :  { %v2289_v22 = vadd.f32 1e-12, %v2287_v31 }
 0xcca   :  { %v2288_v35 = vadd.f32 1e-12, %v2286_v20 }
 0xccb   :  { %5562 = vrsqrt.f32 %v2289_v22 }
 0xccc   :  { %5564 = vrsqrt.f32 %v2288_v35 }
 0xcd5   :  { %v5563_v40 = vpop.eup %5562 }
 0xcd6   :  { %v5565_v41 = vpop.eup %5564  ;;  %v2293_v42 = vmul.f32 %v5563_v40, %v2277_v15 }
 0xcd7   :  { %v2292_v43 = vmul.f32 %v5565_v41, %v2276_v16 }
 0xcd8   :  { %v2299_v44 = vmul.f32 %v2297_v13, %v2293_v42 }
 0xcd9   :  { %v2298_v45 = vmul.f32 %v2297_v13, %v2292_v43 }
 0xcda   :  { %v6110_v50 = vadd.f32 %v2303_v36, %v2299_v44 }
 0xcdb   :  { %v6108_v49 = vadd.f32 %v2303_v36, %v2298_v45 }
 0xcdd   :  { %5067 = vmatprep.mubr.msk.f32.mxu0 %vm189_vm4, %v6108_v49 }
 0xcde   :  { %5068 = vmatmul.mubr.msk.f32.vlgmr.msra.gmra.mrb[20].mxu0 %vm189_vm4, %v6110_v50 }
 0xcdf   :  { %5074 = vmatprep.mubr.msk.f32.mxu0 %vm5683_vm7, %v5679_v30 }
 0xdb1   :  { %v5069_v56 = vpop.f32.mrb[20].mxu0 }
 0xdb2   :  { %v6126_v57 = vadd.f32 %v5069_v56, %v4630_v53  ;;  %v2387_v58 = vpop.f32.mrb[21].mxu0 }
 0xdb3   :  { %v6128_v59 = vadd.f32 %v4630_v53, %v2387_v58 }
 0xdb4   :  { %2399 = vst.msk [vmem:[#allocation2 + $0x8] sm:$0xff] %vm237_vm6, %v6126_v57  ;;  %2404 = vrot.lane.b32.xlu1 %v6126_v57, %s5681_s0 }
 0xdb5   :  { %2398 = vst.msk [vmem:[#allocation2] sm:$0xff] %vm237_vm6, %v6128_v59  ;;  %2402 = vrot.lane.b32.xlu0 %v6128_v59, %s5681_s0  ;;  %s4558_s0 = sshll.u32 %s5699_s6, 4  ;;  %s4559_s0 = int_to_ptr.vmem [resolvable:$true] %s4558_s0 }
 0xdb6   :  { %p5653_p9 = scmp.lt.s32.totalorder %s4559_s0, %s4559_s0 }
 0xdb8   :  { %2432 = vrot.lane.b32.xlu1 %v6126_v57, %s5682_s7 }
 0xdb9   :  { %2447 = vrot.lane.b32.xlu0 %v2396_v51, %s5684_s8 }
 0xdbb   :  { %v2527_v16 = vld [vmem:[#allocation2 + $0x8] sm:$0xff] }
 0xdbc   :  { %2430 = vrot.lane.b32.xlu1 %v6128_v59, %s5682_s7  ;;  %v2526_v27 = vld [vmem:[#allocation2] sm:$0xff]  ;;  %s5648_s7 = scalar_lea.vmem %s4559_s0, 16 }
 0xdbd   :  { %2468 = vrot.lane.b32.xlu0 %v6126_v57, %s5685_s9  ;;  %p5649_p8 = scmp.ne.s32.totalorder %s4559_s0, %s5648_s7 }
 0xdc0   :  { %2482 = vrot.lane.b32.xlu1 %v2396_v51, %s5686_s10 }
 0xdc1   :  { %2466 = vrot.lane.b32.xlu0 %v6128_v59, %s5685_s9 }
 0xdc4   :  { %2422 = vrot.lane.b32.xlu1 %v6128_v59, %s5684_s8 }
 0xdc5   :  { %2424 = vrot.lane.b32.xlu0 %v6126_v57, %s5684_s8 }
 0xdc8   :  { %2502 = vrot.lane.b32.xlu1 %v6126_v57, %s5687_s11 }
 0xdc9   :  { %2516 = vrot.lane.b32.xlu0 %v2396_v51, %s5688_s12 }
 0xdcc   :  { %2500 = vrot.lane.b32.xlu1 %v6128_v59, %s5687_s11 }
 0xdcd   :  { %2458 = vrot.lane.b32.xlu0 %v6128_v59, %s5686_s10 }
 0xdd0   :  { %2460 = vrot.lane.b32.xlu1 %v6126_v57, %s5686_s10 }
 0xdd1   :  { %2492 = vrot.lane.b32.xlu0 %v6128_v59, %s5688_s12 }
 0xdd4   :  { %2494 = vrot.lane.b32.xlu1 %v6126_v57, %s5688_s12 }
 0xdd5   :  { %2412 = vrot.lane.b32.xlu0 %v6126_v57, %s5689_s2 }
 0xdd8   :  { %2453 = vrot.lane.b32.xlu1 %v6120_v52, %s5684_s8  ;;  %s5652_s8 = scalar_lea.vmem %s4559_s0, 32 }
 0xdd9   :  { %p5654_p10 = scmp.lt.s32.totalorder %s5652_s8, %s5648_s7 }
 0xddb   :  { %p5655_p11 = por %p5654_p10, %p5653_p9 }
 0xddc   :  { %2410 = vrot.lane.b32.xlu1 %v6128_v59, %s5689_s2 }
 0xddd   :  { %p5656_p12 = pnand %p5655_p11, %p5649_p8 }
 0xde0   :  { %2438 = vrot.lane.b32.xlu1 %v6128_v59, %s5690_s17 }
 0xe26   :  { %v2405_v60 = vpop.permute.xlu1 %2404 }
 0xe27   :  { %2409 = vst.msk [vmem:[#allocation3 + $0x10] sm:$0xff] %vm237_vm6, %v2405_v60  ;;  %v2403_v61 = vpop.permute.xlu0 %2402 }
 0xe28   :  { %2408 = vst.msk [vmem:[#allocation3] sm:$0xff] %vm237_vm6, %v2403_v61 }
 0xe2a   :  { %v2433_v62 = vpop.permute.xlu1 %2432 }
 0xe2b   :  { %2437 = vst.msk [vmem:[#allocation3 + $0x30] sm:$0xff] %vm237_vm6, %v2433_v62  ;;  %v2448_v63 = vpop.permute.xlu0 %2447 }
 0xe2c   :  { %2450 = vst.msk [vmem:[#allocation3 + $0x28] sm:$0xf] %vm352_vm5, %v2448_v63  ;;  %2451 = vst.msk [vmem:[#allocation3 + $0x38] sm:$0xf] %vm352_vm5, %v2448_v63 }
 0xe2e   :  { %v2431_v2 = vpop.permute.xlu1 %2430  ;;  %v2536_v4 = vld [vmem:[#allocation3 + $0x10] sm:$0xff] }
 0xe2f   :  { %2436 = vst.msk [vmem:[#allocation3 + $0x20] sm:$0xff] %vm237_vm6, %v2431_v2  ;;  %v2469_v7 = vpop.permute.xlu0 %2468  ;;  %v5375_v5 = vpack.c.bf16 %v2537_v0, %v2536_v4  ;;  %v2534_v6 = vld [vmem:[#allocation3] sm:$0xff] }
 0xe30   :  { %2473 = vst.msk [vmem:[#allocation3 + $0x50] sm:$0xff] %vm237_vm6, %v2469_v7  ;;  %v5371_v8 = vpack.c.bf16 %v2535_v1, %v2534_v6 }
 0xe31   :  { %5377 = vmatpush3.bf16.xpose.msk.msra.mxu1 %vm5827_vm8, %v5375_v5 }
 0xe32   :  { %v2483_v3 = vpop.permute.xlu1 %2482  ;;  %5373 = vmatpush3.bf16.xpose.msk.msra.mxu0 %vm5827_vm8, %v5371_v8  ;;  %5382 = vmatprep.subr.bf16.mxu1 %v5680_v33  ;;  %v2540_v9 = vld [vmem:[#allocation3 + $0x30] sm:$0xff] }
 0xe33   :  { %2485 = vst.msk [vmem:[#allocation3 + $0x48] sm:$0xf] %vm352_vm5, %v2483_v3  ;;  %2486 = vst.msk [vmem:[#allocation3 + $0x58] sm:$0xf] %vm352_vm5, %v2483_v3  ;;  %v2467_v55 = vpop.permute.xlu0 %2466  ;;  %5378 = vmatprep.subr.bf16.mxu0 %v5680_v33  ;;  %v2541_v10 = vld [vmem:[#allocation3 + $0x38] sm:$0xf] }
 0xe34   :  { %2472 = vst.msk [vmem:[#allocation3 + $0x40] sm:$0xff] %vm237_vm6, %v2467_v55  ;;  %v2539_v11 = vld [vmem:[#allocation3 + $0x28] sm:$0xf]  ;;  %v5383_v17 = vpack.c.bf16 %v2541_v10, %v2540_v9 }
 0xe36   :  { %v2423_v12 = vpop.permute.xlu1 %2422  ;;  %v2538_v14 = vld [vmem:[#allocation3 + $0x20] sm:$0xff] }
 0xe37   :  { %2428 = vst.msk [vmem:[#allocation2 + $0x10] sm:$0xff] %vm237_vm6, %v2423_v12  ;;  %v2425_v15 = vpop.permute.xlu0 %2424  ;;  %v5379_v18 = vpack.c.bf16 %v2539_v11, %v2538_v14  ;;  %v2544_v24 = vld [vmem:[#allocation3 + $0x50] sm:$0xff] }
 0xe38   :  { %2429 = vst.msk [vmem:[#allocation2 + $0x18] sm:$0xff] %vm237_vm6, %v2425_v15  ;;  %5082 = vmatmul.mubr.msk.f32.vlgmr.msra.gmra.mrb[22].mxu1 %vm237_vm6, %v2527_v16 }
 0xe39   :  { %5075 = vmatmul.mubr.msk.f32.vlgmr.msra.gmra.mrb[22].mxu0 %vm237_vm6, %v2526_v27  ;;  %5385 = vmatpush3.bf16.xpose.msk.msra.mxu1 %vm5827_vm8, %v5383_v17 }
 0xe3a   :  { %v2503_v25 = vpop.permute.xlu1 %2502  ;;  %5381 = vmatpush3.bf16.xpose.msk.msra.mxu0 %vm5827_vm8, %v5379_v18  ;;  %5095 = vmatprep.mubr.msk.f32.mxu1 %vm5683_vm7, %v5679_v30  ;;  %v2545_v26 = vld [vmem:[#allocation3 + $0x58] sm:$0xf]  ;;  %v2543_v21 = vld [vmem:[#allocation3 + $0x48] sm:$0xf] }
 0xe3b   :  { %2507 = vst.msk [vmem:[#allocation3 + $0x70] sm:$0xff] %vm237_vm6, %v2503_v25  ;;  %v2517_v34 = vpop.permute.xlu0 %2516  ;;  %5088 = vmatprep.mubr.msk.f32.mxu0 %vm5683_vm7, %v5679_v30  ;;  %5390 = vmatprep.subr.bf16.mxu1 %v5680_v33  ;;  %v2542_v19 = vld [vmem:[#allocation3 + $0x40] sm:$0xff]  ;;  %v5391_v32 = vpack.c.bf16 %v2545_v26, %v2544_v24 }
 0xe3c   :  { %2519 = vst.msk [vmem:[#allocation3 + $0x68] sm:$0xf] %vm352_vm5, %v2517_v34  ;;  %2520 = vst.msk [vmem:[#allocation3 + $0x78] sm:$0xf] %vm352_vm5, %v2517_v34  ;;  %5386 = vmatprep.subr.bf16.mxu0 %v5680_v33  ;;  %v5387_v22 = vpack.c.bf16 %v2543_v21, %v2542_v19 }
 0xe3e   :  { %v2501_v23 = vpop.permute.xlu1 %2500  ;;  %v2528_v20 = vld [vmem:[#allocation2 + $0x10] sm:$0xff] }
 0xe3f   :  { %2506 = vst.msk [vmem:[#allocation3 + $0x60] sm:$0xff] %vm237_vm6, %v2501_v23  ;;  %v2459_v29 = vpop.permute.xlu0 %2458  ;;  %v2529_v31 = vld [vmem:[#allocation2 + $0x18] sm:$0xff] }
 0xe40   :  { %2464 = vst.msk [vmem:[#allocation2 + $0x20] sm:$0xff] %vm237_vm6, %v2459_v29  ;;  %5096 = vmatmul.mubr.msk.f32.vlgmr.msra.gmra.mrb[24].mxu1 %vm237_vm6, %v2529_v31 }
 0xe41   :  { %5089 = vmatmul.mubr.msk.f32.vlgmr.msra.gmra.mrb[24].mxu0 %vm237_vm6, %v2528_v20  ;;  %5393 = vmatpush3.bf16.xpose.msk.msra.mxu1 %vm5827_vm8, %v5391_v32 }
 0xe42   :  { %v2461_v35 = vpop.permute.xlu1 %2460  ;;  %5389 = vmatpush3.bf16.xpose.msk.msra.mxu0 %vm5827_vm8, %v5387_v22  ;;  %5102 = vmatprep.mubr.msk.f32.mxu0 %vm5683_vm7, %v5679_v30  ;;  %v2548_v44 = vld [vmem:[#allocation3 + $0x70] sm:$0xff] }
 0xe43   :  { %2465 = vst.msk [vmem:[#allocation2 + $0x28] sm:$0xff] %vm237_vm6, %v2461_v35  ;;  %v2493_v39 = vpop.permute.xlu0 %2492  ;;  %5394 = vmatprep.subr.bf16.mxu0 %v5680_v33  ;;  %5109 = vmatprep.mubr.msk.f32.mxu1 %vm5683_vm7, %v5679_v30  ;;  %v2547_v13 = vld [vmem:[#allocation3 + $0x68] sm:$0xf]  ;;  %v2549_v45 = vld [vmem:[#allocation3 + $0x78] sm:$0xf] }
 0xe44   :  { %2498 = vst.msk [vmem:[#allocation2 + $0x30] sm:$0xff] %vm237_vm6, %v2493_v39  ;;  %5398 = vmatprep.subr.bf16.mxu1 %v5680_v33  ;;  %v5399_v56 = vpack.c.bf16 %v2549_v45, %v2548_v44 }
 0xe46   :  { %v2495_v40 = vpop.permute.xlu1 %2494  ;;  %v2546_v41 = vld [vmem:[#allocation3 + $0x60] sm:$0xff] }
 0xe47   :  { %2499 = vst.msk [vmem:[#allocation2 + $0x38] sm:$0xff] %vm237_vm6, %v2495_v40  ;;  %v2413_v42 = vpop.permute.xlu0 %2412  ;;  %v2530_v43 = vld [vmem:[#allocation2 + $0x20] sm:$0xff]  ;;  %v5395_v36 = vpack.c.bf16 %v2547_v13, %v2546_v41 }
 0xe48   :  { %2417 = vst.msk [vmem:[#allocation4 + $0x10] sm:$0xff] %vm237_vm6, %v2413_v42 }
 0xe49   :  { %5103 = vmatmul.mubr.msk.f32.vlgmr.msra.gmra.mrb[26].mxu0 %vm237_vm6, %v2530_v43 }
 0xe4a   :  { %v2454_v51 = vpop.permute.xlu1 %2453  ;;  %5397 = vmatpush3.bf16.xpose.msk.msra.mxu0 %vm5827_vm8, %v5395_v36  ;;  %v2531_v53 = vld [vmem:[#allocation2 + $0x28] sm:$0xff]  ;;  %5116 = vmatprep.mubr.msk.f32.mxu0 %vm5683_vm7, %v5679_v30 }
 0xe4b   :  { %2456 = vst.msk [vmem:[#allocation4 + $0x28] sm:$0xf] %vm352_vm5, %v2454_v51  ;;  %2457 = vst.msk [vmem:[#allocation4 + $0x38] sm:$0xf] %vm352_vm5, %v2454_v51  ;;  %5110 = vmatmul.mubr.msk.f32.vlgmr.msra.gmra.mrb[26].mxu1 %vm237_vm6, %v2531_v53  ;;  %5402 = vmatprep.subr.bf16.mxu0 %v5680_v33  ;;  %v2532_v60 = vld [vmem:[#allocation2 + $0x30] sm:$0xff] }
 0xe4c   :  { %5401 = vmatpush3.bf16.xpose.msk.msra.mxu1 %vm5827_vm8, %v5399_v56  ;;  %5123 = vmatprep.mubr.msk.f32.mxu1 %vm5683_vm7, %v5679_v30 }
 0xe4d   :  { %5410 = vmatprep.subr.bf16.mxu1 %v5680_v33 }
 0xe4e   :  { %v2411_v58 = vpop.permute.xlu1 %2410  ;;  %v2533_v62 = vld [vmem:[#allocation2 + $0x38] sm:$0xff] }
 0xe4f   :  { %2416 = vst.msk [vmem:[#allocation4] sm:$0xff] %vm237_vm6, %v2411_v58 }
 0xe51   :  { %5117 = vmatmul.mubr.msk.f32.vlgmr.msra.gmra.mrb[28].mxu0 %vm237_vm6, %v2532_v60 }
 0xe52   :  { %v2439_v61 = vpop.permute.xlu1 %2438  ;;  %5130 = vmatprep.mubr.msk.f32.mxu0 %vm5683_vm7, %v5679_v30  ;;  %v2555_v1 = vld [vmem:[#allocation4 + $0x28] sm:$0xf] }
 0xe53   :  { %2444 = vst.msk [vmem:[#allocation4 + $0x20] sm:$0xff] %vm237_vm6, %v2439_v61  ;;  %5124 = vmatmul.mubr.msk.f32.vlgmr.msra.gmra.mrb[28].mxu1 %vm237_vm6, %v2533_v62 }
 0xe54   :  { %5144 = vmatprep.mubr.msk.f32.mxu1 %vm5683_vm7, %v5679_v30 }
 0xe56   :  { %v2550_v63 = vld [vmem:[#allocation4] sm:$0xff] }
 0xe57   :  { %v5403_v0 = vpack.c.bf16 %v2551_v47, %v2550_v63 }
 0xe59   :  { %5405 = vmatpush3.bf16.msk.msra.mxu0 %vm5966_vm11, %v5403_v0 }
 0xe5a   :  { %v2554_v2 = vld [vmem:[#allocation4 + $0x20] sm:$0xff]  ;;  %5406 = vmatprep.subr.bf16.mxu0 %v5680_v33 }
 0xe5b   :  { %v5411_v4 = vpack.c.bf16 %v2555_v1, %v2554_v2 }
 0xe5d   :  { %5413 = vmatpush3.bf16.msk.msra.mxu1 %vm5966_vm11, %v5411_v4 }
 0xe5e   :  { %5418 = vmatprep.subr.bf16.mxu1 %v5680_v33 }
 0xf0b   :  { %v2720_v7 = vpop.f32.mrb[22].mxu1 }
 0xf0c   :  { %v3199_v5 = vmul.f32 0.35355338, %v2720_v7  ;;  %v2641_v6 = vpop.f32.mrb[22].mxu0  ;;  %v5083_v8 = vpop.f32.mrb[23].mxu1 }
 0xf0d   :  { %v3198_v3 = vmul.f32 0.35355338, %v2641_v6  ;;  %v5076_v55 = vpop.f32.mrb[23].mxu0 }
 0xf0e   :  { %v3207_v9 = vadd.f32 %v3199_v5, %v5908_v48 }
 0xf0f   :  { %v3206_v10 = vadd.f32 %v3198_v3, %v5911_v54 }
 0xf10   :  { %v3217_v11 = vsel %vm1166_vm9, %v3207_v9, -inf }
 0xf11   :  { %3218 = vmax.xlane.f32.xlu1 %v3217_v11  ;;  %v3214_v12 = vsel %vm1166_vm9, %v3206_v10, -inf }
 0xf12   :  { %3215 = vmax.xlane.f32.xlu0 %v3214_v12 }
 0xf13   :  { %v2878_v14 = vpop.f32.mrb[24].mxu1 }
 0xf14   :  { %v3201_v15 = vmul.f32 0.35355338, %v2878_v14  ;;  %v2799_v16 = vpop.f32.mrb[24].mxu0  ;;  %v5097_v17 = vpop.f32.mrb[25].mxu1 }
 0xf15   :  { %v3200_v18 = vmul.f32 0.35355338, %v2799_v16  ;;  %v5090_v27 = vpop.f32.mrb[25].mxu0 }
 0xf16   :  { %v3209_v25 = vadd.f32 %v3201_v15, %v5908_v48 }
 0xf17   :  { %v3208_v26 = vadd.f32 %v3200_v18, %v5911_v54 }
 0xf18   :  { %v3223_v34 = vsel %vm1166_vm9, %v3209_v25, -inf }
 0xf19   :  { %3224 = vmax.xlane.f32.xlu0 %v3223_v34  ;;  %v3220_v21 = vsel %vm1166_vm9, %v3208_v26, -inf }
 0xf1c   :  { %v2957_v19 = vpop.f32.mrb[26].mxu0 }
 0xf1d   :  { %v3202_v23 = vmul.f32 0.35355338, %v2957_v19  ;;  %3221 = vmax.xlane.f32.xlu0 %v3220_v21  ;;  %v5104_v24 = vpop.f32.mrb[27].mxu0 }
 0xf1e   :  { %v3036_v29 = vpop.f32.mrb[26].mxu1 }
 0xf1f   :  { %v3203_v31 = vmul.f32 0.35355338, %v3036_v29  ;;  %v5111_v32 = vpop.f32.mrb[27].mxu1  ;;  %v3210_v20 = vadd.f32 %v3202_v23, %v5911_v54 }
 0xf21   :  { %v3226_v22 = vsel %vm1166_vm9, %v3210_v20, -inf  ;;  %v3211_v35 = vadd.f32 %v3203_v31, %v5908_v48 }
 0xf22   :  { %3227 = vmax.xlane.f32.xlu1 %v3226_v22 }
 0xf23   :  { %v3229_v39 = vsel %vm1166_vm9, %v3211_v35, -inf }
 0xf24   :  { %3230 = vmax.xlane.f32.xlu0 %v3229_v39  ;;  %v3115_v13 = vpop.f32.mrb[28].mxu0 }
 0xf25   :  { %v3204_v40 = vmul.f32 0.35355338, %v3115_v13  ;;  %v5118_v41 = vpop.f32.mrb[29].mxu0 }
 0xf26   :  { %v3194_v42 = vpop.f32.mrb[28].mxu1 }
 0xf27   :  { %v3205_v43 = vmul.f32 0.35355338, %v3194_v42  ;;  %v5125_v36 = vpop.f32.mrb[29].mxu1  ;;  %v3212_v44 = vadd.f32 %v3204_v40, %v5911_v54 }
 0xf28   :  { %v2553_v36 = vld [vmem:[#allocation4 + $0x18] sm:$0xf] }
 0xf29   :  { %v3232_v45 = vsel %vm1166_vm9, %v3212_v44, -inf  ;;  %v3213_v51 = vadd.f32 %v3205_v43, %v5908_v48  ;;  %v2552_v43 = vld [vmem:[#allocation4 + $0x10] sm:$0xff] }
 0xf2a   :  { %3233 = vmax.xlane.f32.xlu1 %v3232_v45 }
 0xf2b   :  { %v3235_v53 = vsel %vm1166_vm9, %v3213_v51, -inf }
 0xf2c   :  { %3236 = vmax.xlane.f32.xlu0 %v3235_v53 }
 0xf3b   :  { %2440 = vrot.lane.b32.xlu1 %v6126_v57, %s5690_s17 }
 0xf3f   :  { %2474 = vrot.lane.b32.xlu1 %v6128_v59, %s5692_s19 }
 0xf42   :  { %2487 = vrot.lane.b32.xlu0 %v6120_v52, %s5686_s10 }
 0xf43   :  { %2476 = vrot.lane.b32.xlu1 %v6126_v57, %s5692_s19 }
 0xf46   :  { %2508 = vrot.lane.b32.xlu0 %v6128_v59, %s5691_s18 }
 0xf9e   :  { %v3219_v48 = vpop.xlane.xlu1 %3218 }
 0xf9f   :  { %v3239_v54 = vsub.f32 %v3207_v9, %v3219_v48  ;;  %v3216_v56 = vpop.xlane.xlu0 %3215  ;;  %v5407_v48 = vpack.c.bf16 %v2553_v36, %v2552_v43 }
 0xfa0   :  { %v3238_v58 = vsub.f32 %v3206_v10, %v3216_v56  ;;  %v2557_v56 = vld [vmem:[#allocation4 + $0x38] sm:$0xf] }
 0xfa1   :  { %v3248_v60 = vmul.f32 1.442695, %v3239_v54 }
 0xfa2   :  { %v3246_v61 = vmul.f32 1.442695, %v3238_v58 }
 0xfa3   :  { %5566 = vpow2.f32 %v3248_v60 }
 0xfa4   :  { %5568 = vpow2.f32 %v3246_v61 }
 0xfa6   :  { %v3225_v62 = vpop.xlane.xlu0 %3224 }
 0xfa7   :  { %v3241_v47 = vsub.f32 %v3209_v25, %v3225_v62 }
 0xfa9   :  { %v3252_v63 = vmul.f32 1.442695, %v3241_v47 }
 0xfaa   :  { %v3222_v0 = vpop.xlane.xlu0 %3221 }
 0xfab   :  { %5570 = vpow2.f32 %v3252_v63  ;;  %v3240_v1 = vsub.f32 %v3208_v26, %v3222_v0 }
 0xfad   :  { %v6278_v2 = vpop.eup %5566  ;;  %v3250_v4 = vmul.f32 1.442695, %v3240_v1 }
 0xfae   :  { %v6280_v7 = vpop.eup %5568  ;;  %v3265_v59 = vsel %vm1166_vm9, %v6278_v2, 0.0 }
 0xfaf   :  { %5572 = vpow2.f32 %v3250_v4  ;;  %3266 = vadd.xlane.f32.xlu0 %v3265_v59  ;;  %v3228_v5 = vpop.xlane.xlu1 %3227  ;;  %v3262_v6 = vsel %vm1166_vm9, %v6280_v7, 0.0 }
 0xfb0   :  { %v3242_v8 = vsub.f32 %v3210_v20, %v3228_v5  ;;  %3263 = vadd.xlane.f32.xlu1 %v3262_v6 }
 0xfb1   :  { %v3231_v3 = vpop.xlane.xlu0 %3230 }
 0xfb2   :  { %v3254_v55 = vmul.f32 1.442695, %v3242_v8  ;;  %v3243_v9 = vsub.f32 %v3211_v35, %v3231_v3 }
 0xfb4   :  { %5574 = vpow2.f32 %v3254_v55  ;;  %v3256_v10 = vmul.f32 1.442695, %v3243_v9 }
 0xfb5   :  { %v6286_v11 = vpop.eup %5570 }
 0xfb6   :  { %5576 = vpow2.f32 %v3256_v10  ;;  %v3271_v12 = vsel %vm1166_vm9, %v6286_v11, 0.0 }
 0xfb7   :  { %3272 = vadd.xlane.f32.xlu0 %v3271_v12  ;;  %v3234_v14 = vpop.xlane.xlu1 %3233 }
 0xfb8   :  { %v3244_v15 = vsub.f32 %v3212_v44, %v3234_v14 }
 0xfb9   :  { %v6290_v16 = vpop.eup %5572  ;;  %v3237_v17 = vpop.xlane.xlu0 %3236 }
 0xfba   :  { %v3245_v18 = vsub.f32 %v3213_v51, %v3237_v17  ;;  %v3268_v27 = vsel %vm1166_vm9, %v6290_v16, 0.0  ;;  %v3258_v34 = vmul.f32 1.442695, %v3244_v15 }
 0xfbb   :  { %3269 = vadd.xlane.f32.xlu1 %v3268_v27  ;;  %v2441_v25 = vpop.permute.xlu1 %2440 }
 0xfbc   :  { %v3260_v26 = vmul.f32 1.442695, %v3245_v18  ;;  %2445 = vst.msk [vmem:[#allocation4 + $0x30] sm:$0xff] %vm237_vm6, %v2441_v25 }
 0xfbd   :  { %v2488_v19 = vpop.permute.xlu0 %2487 }
 0xfbe   :  { %v6295_v21 = vpop.eup %5574  ;;  %5578 = vpow2.f32 %v3260_v26  ;;  %2490 = vst.msk [vmem:[#allocation4 + $0x48] sm:$0xf] %vm352_vm5, %v2488_v19  ;;  %2491 = vst.msk [vmem:[#allocation4 + $0x58] sm:$0xf] %vm352_vm5, %v2488_v19 }
 0xfbf   :  { %v2475_v23 = vpop.permute.xlu1 %2474  ;;  %v3274_v24 = vsel %vm1166_vm9, %v6295_v21, 0.0  ;;  %5580 = vpow2.f32 %v3258_v34 }
 0xfc0   :  { %v6301_v29 = vpop.eup %5576  ;;  %2480 = vst.msk [vmem:[#allocation4 + $0x40] sm:$0xff] %vm237_vm6, %v2475_v23  ;;  %3275 = vadd.xlane.f32.xlu1 %v3274_v24  ;;  %v3940_v24 = vld [vmem:[#allocation5 + $0x1c0] sm:$0xff] }
 0xfc1   :  { %v2509_v31 = vpop.permute.xlu0 %2508  ;;  %v3277_v32 = vsel %vm1166_vm9, %v6301_v29, 0.0 }
 0xfc2   :  { %2514 = vst.msk [vmem:[#allocation4 + $0x60] sm:$0xff] %vm237_vm6, %v2509_v31  ;;  %3278 = vadd.xlane.f32.xlu0 %v3277_v32 }
 0xfc3   :  { %v2477_v20 = vpop.permute.xlu1 %2476 }
 0xfc4   :  { %2481 = vst.msk [vmem:[#allocation4 + $0x50] sm:$0xff] %vm237_vm6, %v2477_v20 }
 0xfc5   :  { %v2561_v47 = vld [vmem:[#allocation4 + $0x58] sm:$0xf]  ;;  %v2559_v4 = vld [vmem:[#allocation4 + $0x48] sm:$0xf] }
 0xfc8   :  { %v6308_v22 = vpop.eup %5578 }
 0xfc9   :  { %v3283_v35 = vsel %vm1166_vm9, %v6308_v22, 0.0  ;;  %v6312_v39 = vpop.eup %5580  ;;  %v2562_v55 = vld [vmem:[#allocation4 + $0x60] sm:$0xff] }
 0xfca   :  { %3284 = vadd.xlane.f32.xlu0 %v3283_v35  ;;  %v3280_v13 = vsel %vm1166_vm9, %v6312_v39, 0.0 }
 0xfcb   :  { %v2560_v62 = vld [vmem:[#allocation4 + $0x50] sm:$0xff] }
 0xfcc   :  { %v5423_v1 = vpack.c.bf16 %v2561_v47, %v2560_v62 }
 0xfce   :  { %3281 = vadd.xlane.f32.xlu0 %v3280_v13  ;;  %v3942_v13 = vld [vmem:[#allocation5 + $0x1d0] sm:$0xff] }
 0xfd1   :  { %2521 = vrot.lane.b32.xlu1 %v6120_v52, %s5688_s12  ;;  %v2556_v52 = vld [vmem:[#allocation4 + $0x30] sm:$0xff] }
 0xfd2   :  { %v5415_v58 = vpack.c.bf16 %v2557_v56, %v2556_v52 }
 0xfe4   :  { %2510 = vrot.lane.b32.xlu0 %v6126_v57, %s5691_s18 }
0x103c   :  { %v3267_v40 = vpop.xlane.xlu0 %3266 }
0x103d   :  { %v3264_v41 = vpop.xlane.xlu1 %3263 }
0x103e   :  { %5582 = vrcp.f32 %v3264_v41 }
0x103f   :  { %5584 = vrcp.f32 %v3267_v40  ;;  %v3943_v40 = vld [vmem:[#allocation5 + $0x1d8] sm:$0xff] }
0x1044   :  { %v3273_v42 = vpop.xlane.xlu0 %3272 }
0x1045   :  { %5586 = vrcp.f32 %v3273_v42  ;;  %v5438_v42 = vpack.c.bf16 %v3943_v40, %v3942_v13 }
0x1048   :  { %v5583_v44 = vpop.eup %5582  ;;  %v3270_v45 = vpop.xlane.xlu1 %3269 }
0x1049   :  { %v3294_v51 = vmul.f32 %v5583_v44, %v6280_v7  ;;  %5588 = vrcp.f32 %v3270_v45  ;;  %v5585_v53 = vpop.eup %5584 }
0x104a   :  { %v3295_v57 = vmul.f32 %v5585_v53, %v6278_v2  ;;  %v2558_v2 = vld [vmem:[#allocation4 + $0x40] sm:$0xff] }
0x104b   :  { %5131 = vmatmul.mubr.msk.f32.vlgmr.msra.gmra.mrb[30].mxu0 %vm1166_vm9, %v3294_v51  ;;  %v5419_v5 = vpack.c.bf16 %v2559_v4, %v2558_v2 }
0x104c   :  { %5409 = vmatpush3.bf16.msk.msra.mxu0 %vm5966_vm11, %v5407_v48  ;;  %5137 = vmatprep.mubr.msk.f32.mxu0 %vm5683_vm7, %v5679_v30 }
0x104d   :  { %v3276_v54 = vpop.xlane.xlu1 %3275  ;;  %5414 = vmatprep.subr.bf16.mxu0 %v5680_v33 }
0x104e   :  { %5590 = vrcp.f32 %v3276_v54 }
0x104f   :  { %v5587_v60 = vpop.eup %5586  ;;  %v3279_v61 = vpop.xlane.xlu0 %3278  ;;  %5138 = vmatmul.mubr.msk.f32.vlgmr.msra.gmra.mrb[32].mxu0 %vm1166_vm9, %v3295_v57 }
0x1050   :  { %v3297_v63 = vmul.f32 %v5587_v60, %v6286_v11  ;;  %5592 = vrcp.f32 %v3279_v61  ;;  %5417 = vmatpush3.bf16.msk.msra.mxu0 %vm5966_vm11, %v5415_v58  ;;  %5151 = vmatprep.mubr.msk.f32.mxu0 %vm5683_vm7, %v5679_v30 }
0x1051   :  { %v2522_v0 = vpop.permute.xlu1 %2521  ;;  %5422 = vmatprep.subr.bf16.mxu0 %v5680_v33 }
0x1052   :  { %2524 = vst.msk [vmem:[#allocation4 + $0x68] sm:$0xf] %vm352_vm5, %v2522_v0  ;;  %2525 = vst.msk [vmem:[#allocation4 + $0x78] sm:$0xf] %vm352_vm5, %v2522_v0  ;;  %v4673_v0 = vld [vmem:[#allocation5 + $0x1e0] ss:$0 sm:$0xff] }
0x1053   :  { %v5589_v7 = vpop.eup %5588  ;;  %5152 = vmatmul.mubr.msk.f32.vlgmr.msra.gmra.mrb[34].mxu0 %vm1166_vm9, %v3297_v63 }
0x1054   :  { %v3296_v59 = vmul.f32 %v5589_v7, %v6290_v16  ;;  %5425 = vmatpush3.bf16.msk.msra.mxu0 %vm5966_vm11, %v5423_v1  ;;  %5165 = vmatprep.mubr.msk.f32.mxu0 %vm5683_vm7, %v5679_v30 }
0x1055   :  { %5430 = vmatprep.subr.bf16.mxu0 %v5680_v33 }
0x1056   :  { %5145 = vmatmul.mubr.msk.f32.vlgmr.msra.gmra.mrb[30].mxu1 %vm1166_vm9, %v3296_v59 }
0x1057   :  { %v3285_v6 = vpop.xlane.xlu0 %3284  ;;  %5421 = vmatpush3.bf16.msk.msra.mxu1 %vm5966_vm11, %v5419_v5  ;;  %5158 = vmatprep.mubr.msk.f32.mxu1 %vm5683_vm7, %v5679_v30 }
0x1058   :  { %v5591_v8 = vpop.eup %5590  ;;  %5426 = vmatprep.subr.bf16.mxu1 %v5680_v33 }
0x1059   :  { %v3298_v3 = vmul.f32 %v5591_v8, %v6295_v21  ;;  %v2563_v9 = vld [vmem:[#allocation4 + $0x68] sm:$0xf]  ;;  %v2565_v15 = vld [vmem:[#allocation4 + $0x78] sm:$0xf] }
0x105a   :  { %v5593_v10 = vpop.eup %5592  ;;  %v5427_v11 = vpack.c.bf16 %v2563_v9, %v2562_v55 }
0x105b   :  { %v3299_v12 = vmul.f32 %v5593_v10, %v6301_v29  ;;  %v3282_v14 = vpop.xlane.xlu0 %3281  ;;  %5159 = vmatmul.mubr.msk.f32.vlgmr.msra.gmra.mrb[32].mxu1 %vm1166_vm9, %v3298_v3  ;;  %v3941_v29 = vld [vmem:[#allocation5 + $0x1c8] sm:$0xff] }
0x105c   :  { %5594 = vrcp.f32 %v3282_v14  ;;  %5429 = vmatpush3.bf16.msk.msra.mxu1 %vm5966_vm11, %v5427_v11  ;;  %5172 = vmatprep.mubr.msk.f32.mxu1 %vm5683_vm7, %v5679_v30  ;;  %v5434_v31 = vpack.c.bf16 %v3941_v29, %v3940_v24  ;;  %v4032_v29 = vld [vmem:[#allocation5 + $0x1e8] sm:$0x3] }
0x105d   :  { %5166 = vmatmul.mubr.msk.f32.vlgmr.msra.gmra.mrb[36].mxu0 %vm1166_vm9, %v3299_v12  ;;  %5596 = vrcp.f32 %v3285_v6 }
0x105e   :  { %5179 = vmatprep.mubr.msk.f32.mxu0 %vm5683_vm7, %v5679_v30  ;;  %5435 = vmatprep.subr.bf16.mxu1 %v5434_v31 }
0x105f   :  { %v2511_v33 = vpop.permute.xlu0 %2510 }
0x1060   :  { %2515 = vst.msk [vmem:[#allocation4 + $0x70] sm:$0xff] %vm237_vm6, %v2511_v33 }
0x1066   :  { %v5595_v16 = vpop.eup %5594 }
0x1067   :  { %v3300_v17 = vmul.f32 %v5595_v16, %v6312_v39  ;;  %v2564_v18 = vld [vmem:[#allocation4 + $0x70] sm:$0xff]  ;;  %v5597_v27 = vpop.eup %5596  ;;  %v4072_v16 = vld [vmem:[#allocation5 + $0x1f8] sm:$0xff] }
0x1068   :  { %v5431_v25 = vpack.c.bf16 %v2565_v15, %v2564_v18  ;;  %v3301_v34 = vmul.f32 %v5597_v27, %v6308_v22  ;;  %v4073_v18 = vld [vmem:[#allocation5 + $0x200] sm:$0xff]  ;;  %v4074_v27 = vld [vmem:[#allocation5 + $0x208] sm:$0xff] }
0x1069   :  { %5173 = vmatmul.mubr.msk.f32.vlgmr.msra.gmra.mrb[34].mxu1 %vm1166_vm9, %v3300_v17 }
0x106a   :  { %5433 = vmatpush3.bf16.msk.msra.mxu0 %vm5966_vm11, %v5431_v25  ;;  %5437 = vmatpush3.bf16.msra.mxu1 %v5434_v31  ;;  %v5446_v25 = vpack.c.bf16 %v4074_v27, %v4073_v18  ;;  %v4062_v31 = vrot.slane %v4032_v29, %v5752_v37  ;;  %vm4548_vm11 = vcmask 0  }
0x106b   :  { %5439 = vmatprep.subr.bf16.mxu1 %v5438_v42 }
0x106d   :  { %5180 = vmatmul.mubr.msk.f32.vlgmr.msra.gmra.mrb[38].mxu0 %vm1166_vm9, %v3301_v34 }
0x106e   :  { %5441 = vmatpush3.bf16.msra.mxu1 %v5438_v42  ;;  %v4215_v42 = vld [vmem:[#allocation5 + $0x218] sm:$0xff] }
0x111e   :  { %v3374_v26 = vpop.f32.mrb[30].mxu0 }
0x111f   :  { %v5132_v19 = vpop.f32.mrb[31].mxu0 }
0x1122   :  { %v3450_v21 = vpop.f32.mrb[32].mxu0 }
0x1123   :  { %v5139_v23 = vpop.f32.mrb[33].mxu0 }
0x1126   :  { %v3602_v32 = vpop.f32.mrb[34].mxu0 }
0x1127   :  { %3914 = vrot.lane.b32.xlu0 %v3602_v32, %s5676_s26  ;;  %v5153_v20 = vpop.f32.mrb[35].mxu0 }
0x1129   :  { %v3526_v35 = vpop.f32.mrb[30].mxu1 }
0x112a   :  { %3912 = vrot.lane.b32.xlu1 %v3526_v35, %s5676_s26  ;;  %v5146_v46 = vpop.f32.mrb[31].mxu1 }
0x112e   :  { %v3678_v22 = vpop.f32.mrb[32].mxu1 }
0x112f   :  { %3920 = vrot.lane.b32.xlu1 %v3678_v22, %s5694_s20  ;;  %v5160_v39 = vpop.f32.mrb[33].mxu1  ;;  %v4068_v22 = vrot.slane %v4032_v29, %v5754_v38 }
0x1130   :  { %v3754_v41 = vpop.f32.mrb[36].mxu0 }
0x1131   :  { %3922 = vrot.lane.b32.xlu0 %v3754_v41, %s5694_s20  ;;  %v5167_v43 = vpop.f32.mrb[37].mxu0 }
0x1132   :  { %v4216_v43 = vld [vmem:[#allocation5 + $0x220] sm:$0xff] }
0x113c   :  { %v3830_v36 = vpop.f32.mrb[34].mxu1 }
0x113d   :  { %3928 = vrot.lane.b32.xlu1 %v3830_v36, %s5695_s21  ;;  %v5174_v44 = vpop.f32.mrb[35].mxu1  ;;  %v5450_v36 = vpack.c.bf16 %v4216_v43, %v4215_v42 }
0x113e   :  { %v4217_v44 = vld [vmem:[#allocation5 + $0x228] sm:$0xff] }
0x113f   :  { %5451 = vmatprep.subr.bf16.mxu1 %v5450_v36 }
0x1140   :  { %v3906_v45 = vpop.f32.mrb[38].mxu0 }
0x1141   :  { %3930 = vrot.lane.b32.xlu0 %v3906_v45, %s5695_s21  ;;  %v5181_v51 = vpop.f32.mrb[39].mxu0  ;;  %v4218_v45 = vld [vmem:[#allocation5 + $0x230] sm:$0xff] }
0x1142   :  { %v5454_v51 = vpack.c.bf16 %v4218_v45, %v4217_v44 }
0x1199   :  { %v3915_v48 = vpop.permute.xlu0 %3914 }
0x119a   :  { %v3935_v61 = vsel %vm237_vm6, %v3450_v21, %v3915_v48  ;;  %v4220_v48 = vld [vmem:[#allocation5 + $0x240] sm:$0xff] }
0x119c   :  { %v3913_v53 = vpop.permute.xlu1 %3912 }
0x119d   :  { %v3934_v57 = vsel %vm237_vm6, %v3374_v26, %v3913_v53  ;;  %v4219_v53 = vld [vmem:[#allocation5 + $0x238] sm:$0xff] }
0x11a1   :  { %v3921_v52 = vpop.permute.xlu1 %3920 }
0x11a2   :  { %v3936_v54 = vsel %vm1889_vm13, %v3934_v57, %v3921_v52  ;;  %v5458_v52 = vpack.c.bf16 %v4220_v48, %v4219_v53  ;;  %v4221_v57 = vld [vmem:[#allocation5 + $0x248] sm:$0xff] }
0x11a3   :  { %v3923_v56 = vpop.permute.xlu0 %3922 }
0x11a4   :  { %v3937_v62 = vsel %vm1889_vm13, %v3935_v61, %v3923_v56 }
0x11af   :  { %v3929_v58 = vpop.permute.xlu1 %3928 }
0x11b0   :  { %v3938_v60 = vsel %vm1892_vm12, %v3936_v54, %v3929_v58  ;;  %v4222_v54 = vld [vmem:[#allocation5 + $0x250] sm:$0xff] }
0x11b1   :  { %5190 = vmatprep.mubr.msk.f32.mxu1 %vm189_vm4, %v3938_v60  ;;  %v5462_v56 = vpack.c.bf16 %v4222_v54, %v4221_v57  ;;  %v4676_v58 = vld [vmem:[#allocation5 + $0x210] ss:$0 sm:$0xff]  ;;  %v4683_v57 = vld [vmem:[#allocation5 + $0x258] ss:$0 sm:$0xff] }
0x11b3   :  { %v3931_v47 = vpop.permute.xlu0 %3930 }
0x11b4   :  { %v3939_v63 = vsel %vm1892_vm12, %v3937_v62, %v3931_v47 }
0x11b5   :  { %5191 = vmatmul.mubr.msk.f32.vlgmr.msra.gmra.mrb[36].mxu1 %vm189_vm4, %v3939_v63 }
0x11b6   :  { %5453 = vmatpush3.bf16.msra.mxu1 %v5450_v36 }
0x11b7   :  { %5455 = vmatprep.subr.bf16.mxu1 %v5454_v51 }
0x11ba   :  { %5457 = vmatpush3.bf16.msra.mxu1 %v5454_v51 }
0x11bb   :  { %5459 = vmatprep.subr.bf16.mxu1 %v5458_v52 }
0x11be   :  { %5461 = vmatpush3.bf16.msra.mxu1 %v5458_v52 }
0x11bf   :  { %5463 = vmatprep.subr.bf16.mxu1 %v5462_v56 }
0x11c2   :  { %5465 = vmatpush3.bf16.msra.mxu1 %v5462_v56 }
0x1288   :  { %v5192_v1 = vpop.f32.mrb[36].mxu1 }
0x1289   :  { %v4027_v2 = vadd.f32 %v5192_v1, %v4673_v0  ;;  %v4021_v4 = vpop.f32.mrb[37].mxu1 }
0x128a   :  { %v4022_v7 = vadd.f32 %v4673_v0, %v4021_v4 }
0x128b   :  { %v4031_v59 = vadd.f32 %v4027_v2, %v6110_v50 }
0x128c   :  { %v4030_v5 = vadd.f32 %v4022_v7, %v6108_v49  ;;  %v4071_v49 = vld [vmem:[#allocation5 + $0x1f0] sm:$0xff] }
0x128d   :  { %v4036_v6 = vsel %vm189_vm4, %v4031_v59, 0.0  ;;  %v5442_v17 = vpack.c.bf16 %v4072_v16, %v4071_v49 }
0x128e   :  { %4037 = vadd.xlane.f32.xlu0 %v4036_v6  ;;  %v4033_v8 = vsel %vm189_vm4, %v4030_v5, 0.0 }
0x128f   :  { %4034 = vadd.xlane.f32.xlu1 %v4033_v8  ;;  %5443 = vmatprep.subr.bf16.mxu0 %v5442_v17 }
0x1290   :  { %5445 = vmatpush3.bf16.msra.mxu0 %v5442_v17 }
0x1291   :  { %5447 = vmatprep.subr.bf16.mxu0 %v5446_v25 }
0x1294   :  { %5449 = vmatpush3.bf16.msra.mxu0 %v5446_v25 }
0x131b   :  { %v4038_v3 = vpop.xlane.xlu0 %4037 }
0x131c   :  { %v4040_v55 = vmul.f32 0.03125, %v4038_v3  ;;  %v4035_v9 = vpop.xlane.xlu1 %4034 }
0x131d   :  { %v4039_v10 = vmul.f32 0.03125, %v4035_v9 }
0x131e   :  { %v4042_v11 = vsub.f32 %v4031_v59, %v4040_v55 }
0x131f   :  { %v4041_v12 = vsub.f32 %v4030_v5, %v4039_v10 }
0x1320   :  { %v4044_v14 = vmul.f32 %v4042_v11, %v4042_v11 }
0x1321   :  { %v4043_v33 = vmul.f32 %v4041_v12, %v4041_v12 }
0x1322   :  { %v4048_v15 = vsel %vm189_vm4, %v4044_v14, 0.0 }
0x1323   :  { %4049 = vadd.xlane.f32.xlu1 %v4048_v15  ;;  %v4045_v50 = vsel %vm189_vm4, %v4043_v33, 0.0 }
0x1324   :  { %4046 = vadd.xlane.f32.xlu0 %v4045_v50 }
0x13b0   :  { %v4050_v34 = vpop.xlane.xlu1 %4049 }
0x13b1   :  { %v4052_v26 = vmul.f32 0.03125, %v4050_v34  ;;  %v4047_v19 = vpop.xlane.xlu0 %4046 }
0x13b2   :  { %v4051_v21 = vmul.f32 0.03125, %v4047_v19 }
0x13b3   :  { %v4054_v23 = vadd.f32 1e-12, %v4052_v26 }
0x13b4   :  { %v4053_v24 = vadd.f32 1e-12, %v4051_v21 }
0x13b5   :  { %5598 = vrsqrt.f32 %v4054_v23 }
0x13b6   :  { %5600 = vrsqrt.f32 %v4053_v24 }
0x13bf   :  { %v5599_v32 = vpop.eup %5598 }
0x13c0   :  { %v5601_v20 = vpop.eup %5600  ;;  %v4058_v35 = vmul.f32 %v5599_v32, %v4042_v11 }
0x13c1   :  { %v4057_v46 = vmul.f32 %v5601_v20, %v4041_v12 }
0x13c2   :  { %v4064_v39 = vmul.f32 %v4062_v31, %v4058_v35 }
0x13c3   :  { %v4063_v13 = vmul.f32 %v4062_v31, %v4057_v46 }
0x13c4   :  { %v6391_v41 = vadd.f32 %v4068_v22, %v4064_v39 }
0x13c5   :  { %v6389_v40 = vadd.f32 %v4068_v22, %v4063_v13 }
0x13c7   :  { %5201 = vmatprep.mubr.msk.f32.mxu0 %vm189_vm4, %v6389_v40 }
0x13c8   :  { %5202 = vmatmul.mubr.msk.f32.vlgmr.msra.gmra.mrb[40].mxu0 %vm189_vm4, %v6391_v41 }
0x149b   :  { %v5203_v60 = vpop.f32.mrb[40].mxu0 }
0x149c   :  { %v4158_v61 = vadd.f32 %v5203_v60, %v4676_v58  ;;  %v4152_v62 = vpop.f32.mrb[41].mxu0 }
0x149d   :  { %v4153_v47 = vadd.f32 %v4676_v58, %v4152_v62 }
0x149e   :  { %v4162_v63 = vmul.f32 0.70710677, %v4158_v61  ;;  %v4210_v53 = vmul.f32 0.5, %v4158_v61 }
0x149f   :  { %v4161_v0 = vmul.f32 0.70710677, %v4153_v47  ;;  %v4209_v45 = vmul.f32 0.5, %v4153_v47 }
0x14a0   :  { %v4164_v1 = vand.u32 2147483647, %v4162_v63  ;;  %vm4204_vm1 = vcmp.ge.f32.partialorder %v4162_v63, 0.0 }
0x14a1   :  { %v4163_v2 = vand.u32 2147483647, %v4161_v0  ;;  %vm4203_vm2 = vcmp.ge.f32.partialorder %v4161_v0, 0.0 }
0x14a2   :  { %v4166_v4 = vmul.f32 0.3275911, %v4164_v1  ;;  %v4192_v6 = vsub.f32 0.0, %v4164_v1 }
0x14a3   :  { %v4165_v7 = vmul.f32 0.3275911, %v4163_v2  ;;  %v4191_v8 = vsub.f32 0.0, %v4163_v2 }
0x14a4   :  { %v4168_v59 = vadd.f32 1.0, %v4166_v4  ;;  %v4194_v55 = vmul.f32 %v4192_v6, %v4164_v1 }
0x14a5   :  { %v4167_v5 = vadd.f32 1.0, %v4165_v7  ;;  %v4193_v11 = vmul.f32 %v4191_v8, %v4163_v2 }
0x14a6   :  { %5602 = vrcp.f32 %v4168_v59  ;;  %v4197_v33 = vmul.f32 1.442695, %v4194_v55 }
0x14a7   :  { %5604 = vrcp.f32 %v4167_v5  ;;  %v4195_v49 = vmul.f32 1.442695, %v4193_v11 }
0x14a8   :  { %5606 = vpow2.f32 %v4197_v33 }
0x14a9   :  { %5608 = vpow2.f32 %v4195_v49 }
0x14b0   :  { %v5603_v3 = vpop.eup %5602 }
0x14b1   :  { %v5605_v9 = vpop.eup %5604  ;;  %v4174_v10 = vmul.f32 1.0614054, %v5603_v3 }
0x14b2   :  { %v4173_v12 = vmul.f32 1.0614054, %v5605_v9  ;;  %v5607_v31 = vpop.eup %5606 }
0x14b3   :  { %v4680_v14 = vadd.f32 -1.4531521, %v4174_v10  ;;  %v5609_v20 = vpop.eup %5608  ;;  %v4353_v10 = vld [vmem:[#allocation5 + $0x290] sm:$0xff] }
0x14b4   :  { %v4679_v15 = vadd.f32 -1.4531521, %v4173_v12 }
0x14b5   :  { %v4178_v50 = vmul.f32 %v5603_v3, %v4680_v14 }
0x14b6   :  { %v4177_v16 = vmul.f32 %v5605_v9, %v4679_v15 }
0x14b7   :  { %v4180_v17 = vadd.f32 1.4214138, %v4178_v50 }
0x14b8   :  { %v4179_v18 = vadd.f32 1.4214138, %v4177_v16  ;;  %v4311_v16 = vld [vmem:[#allocation5 + $0x260] sm:$0x3] }
0x14b9   :  { %v4182_v27 = vmul.f32 %v5603_v3, %v4180_v17  ;;  %v4341_v17 = vrot.slane %v4311_v16, %v5752_v37 }
0x14ba   :  { %v4181_v25 = vmul.f32 %v5605_v9, %v4179_v18 }
0x14bb   :  { %v4682_v34 = vadd.f32 -0.28449672, %v4182_v27 }
0x14bc   :  { %v4681_v26 = vadd.f32 -0.28449672, %v4181_v25 }
0x14bd   :  { %v4186_v19 = vmul.f32 %v5603_v3, %v4682_v34 }
0x14be   :  { %v4185_v21 = vmul.f32 %v5605_v9, %v4681_v26  ;;  %v4347_v26 = vrot.slane %v4311_v16, %v5754_v38 }
0x14bf   :  { %v4188_v23 = vadd.f32 0.2548296, %v4186_v19 }
0x14c0   :  { %v4187_v24 = vadd.f32 0.2548296, %v4185_v21 }
0x14c1   :  { %v4190_v29 = vmul.f32 %v5603_v3, %v4188_v23  ;;  %v4351_v3 = vld [vmem:[#allocation5 + $0x280] sm:$0xff] }
0x14c2   :  { %v4189_v32 = vmul.f32 %v5605_v9, %v4187_v24  ;;  %v4352_v9 = vld [vmem:[#allocation5 + $0x288] sm:$0xff] }
0x14c3   :  { %v4200_v35 = vmul.f32 %v5607_v31, %v4190_v29  ;;  %v5470_v11 = vpack.c.bf16 %v4353_v10, %v4352_v9  ;;  %v4686_v29 = vld [vmem:[#allocation5 + $0x298] ss:$0 sm:$0xff] }
0x14c4   :  { %v4199_v46 = vmul.f32 %v5609_v20, %v4189_v32 }
0x14c5   :  { %v4202_v22 = vsub.f32 1.0, %v4200_v35 }
0x14c6   :  { %v4201_v39 = vsub.f32 1.0, %v4199_v46  ;;  %v5624_v46 = vld [vmem:[%s6441_s1 + $0x8] sm:$0xff] }
0x14c7   :  { %v4206_v13 = vsub.f32 0.0, %v4202_v22 }
0x14c8   :  { %v4205_v42 = vsub.f32 0.0, %v4201_v39 }
0x14c9   :  { %v4208_v43 = vsel %vm4204_vm1, %v4202_v22, %v4206_v13  ;;  %v5625_v22 = vld [vmem:[%s6441_s1] sm:$0xff]  ;;  %s5698_s1 = smov 125  }
0x14ca   :  { %v4212_v36 = vadd.f32 1.0, %v4208_v43  ;;  %v4207_v44 = vsel %vm4203_vm2, %v4201_v39, %v4205_v42  ;;  %v5697_v39 = vmov 3   ;;  %vm4442_vm5 = vcmp.eq.s32.totalorder %v5625_v22, 1 }
0x14cb   :  { %v4211_v51 = vadd.f32 1.0, %v4207_v44  ;;  %5508 = vset.pattern.permute.xlu1 %v5697_v39  ;;  %5507 = vset.pattern.permute.xlu0 %v5697_v39 }
0x14cc   :  { %v4214_v52 = vmul.f32 %v4212_v36, %v4210_v53 }
0x14cd   :  { %v4213_v48 = vmul.f32 %v4211_v51, %v4209_v45 }
0x14cf   :  { %5220 = vmatprep.mubr.msk.f32.mxu1 %vm2183_vm0, %v4213_v48 }
0x14d0   :  { %5221 = vmatmul.mubr.msk.f32.vlgmr.msra.gmra.mrb[38].mxu1 %vm2183_vm0, %v4214_v52 }
0x15a3   :  { %v5222_v54 = vpop.f32.mrb[38].mxu1 }
0x15a4   :  { %v4306_v56 = vadd.f32 %v5222_v54, %v4683_v57  ;;  %v4300_v58 = vpop.f32.mrb[39].mxu1 }
0x15a5   :  { %v4301_v60 = vadd.f32 %v4683_v57, %v4300_v58 }
0x15a6   :  { %v4310_v62 = vadd.f32 %v4306_v56, %v6391_v41 }
0x15a7   :  { %v4309_v63 = vadd.f32 %v4301_v60, %v6389_v40  ;;  %v4350_v40 = vld [vmem:[#allocation5 + $0x278] sm:$0xff] }
0x15a8   :  { %v4315_v0 = vsel %vm189_vm4, %v4310_v62, 0.0  ;;  %v5466_v55 = vpack.c.bf16 %v4351_v3, %v4350_v40 }
0x15a9   :  { %4316 = vadd.xlane.f32.xlu1 %v4315_v0  ;;  %v4312_v61 = vsel %vm189_vm4, %v4309_v63, 0.0 }
0x15aa   :  { %4313 = vadd.xlane.f32.xlu0 %v4312_v61  ;;  %5467 = vmatprep.subr.bf16.mxu0 %v5466_v55 }
0x15ab   :  { %5469 = vmatpush3.bf16.msra.mxu0 %v5466_v55 }
0x15ac   :  { %5471 = vmatprep.subr.bf16.mxu0 %v5470_v11 }
0x15af   :  { %5473 = vmatpush3.bf16.msra.mxu0 %v5470_v11 }
0x1636   :  { %v4317_v47 = vpop.xlane.xlu1 %4316 }
0x1637   :  { %v4319_v1 = vmul.f32 0.03125, %v4317_v47  ;;  %v4314_v2 = vpop.xlane.xlu0 %4313 }
0x1638   :  { %v4318_v4 = vmul.f32 0.03125, %v4314_v2 }
0x1639   :  { %v4321_v7 = vsub.f32 %v4310_v62, %v4319_v1 }
0x163a   :  { %v4320_v59 = vsub.f32 %v4309_v63, %v4318_v4 }
0x163b   :  { %v4323_v5 = vmul.f32 %v4321_v7, %v4321_v7 }
0x163c   :  { %v4322_v6 = vmul.f32 %v4320_v59, %v4320_v59 }
0x163d   :  { %v4327_v8 = vsel %vm189_vm4, %v4323_v5, 0.0 }
0x163e   :  { %4328 = vadd.xlane.f32.xlu1 %v4327_v8  ;;  %v4324_v41 = vsel %vm189_vm4, %v4322_v6, 0.0 }
0x163f   :  { %4325 = vadd.xlane.f32.xlu0 %v4324_v41 }
0x16cb   :  { %v4329_v12 = vpop.xlane.xlu1 %4328 }
0x16cc   :  { %v4331_v14 = vmul.f32 0.03125, %v4329_v12  ;;  %v4326_v33 = vpop.xlane.xlu0 %4325 }
0x16cd   :  { %v4330_v15 = vmul.f32 0.03125, %v4326_v33 }
0x16ce   :  { %v4333_v50 = vadd.f32 1e-12, %v4331_v14 }
0x16cf   :  { %v4332_v49 = vadd.f32 1e-12, %v4330_v15 }
0x16d0   :  { %5610 = vrsqrt.f32 %v4333_v50 }
0x16d1   :  { %5612 = vrsqrt.f32 %v4332_v49 }
0x16da   :  { %v5611_v18 = vpop.eup %5610 }
0x16db   :  { %v5613_v27 = vpop.eup %5612  ;;  %v4337_v25 = vmul.f32 %v5611_v18, %v4321_v7 }
0x16dc   :  { %v4336_v34 = vmul.f32 %v5613_v27, %v4320_v59 }
0x16dd   :  { %v4343_v19 = vmul.f32 %v4341_v17, %v4337_v25 }
0x16de   :  { %v4342_v21 = vmul.f32 %v4341_v17, %v4336_v34 }
0x16df   :  { %v4349_v24 = vadd.f32 %v4347_v26, %v4343_v19 }
0x16e0   :  { %v4348_v23 = vadd.f32 %v4347_v26, %v4342_v21 }
0x16e2   :  { %5231 = vmatprep.mubr.msk.f32.mxu0 %vm189_vm4, %v4348_v23 }
0x16e3   :  { %5232 = vmatmul.mubr.msk.f32.vlgmr.msra.gmra.mrb[42].mxu0 %vm189_vm4, %v4349_v24  ;;  %vm4443_vm4 = vcmp.eq.s32.totalorder %v5624_v46, 1 }
0x17b6   :  { %v5233_v31 = vpop.f32.mrb[42].mxu0 }
0x17b7   :  { %v4437_v32 = vadd.f32 %v5233_v31, %v4686_v29  ;;  %v4431_v37 = vpop.f32.mrb[43].mxu0 }
0x17b8   :  { %v4432_v20 = vadd.f32 %v4686_v29, %v4431_v37 }
0x17b9   :  { %4441 = vst [vmem:[%s6443_s3 + $0x8] sm:$0xff] %v4437_v32  ;;  %v4452_v38 = vsel %vm4450_vm3, %v4437_v32, -1e+30 }
0x17ba   :  { %4440 = vst [vmem:[%s6443_s3] sm:$0xff] %v4432_v20  ;;  %4455 = vmax.xlane.f32.xlu1 %v4452_v38  ;;  %v4451_v35 = vsel %vm4450_vm3, %v4432_v20, -1e+30 }
0x17bb   :  { %4453 = vmax.xlane.f32.xlu0 %v4451_v35 }
0x17cb   :  { %4446 = vrot.lane.b32.xlu1 %v5624_v46, %s5696_s28 }
0x17d1   :  { %4444 = vrot.lane.b32.xlu0 %v5625_v22, %s5696_s28 }
0x1847   :  { %v4456_v13 = vpop.xlane.xlu1 %4455 }
0x1848   :  { %v4458_v42 = vsub.f32 %v4452_v38, %v4456_v13  ;;  %v4454_v43 = vpop.xlane.xlu0 %4453 }
0x1849   :  { %v4457_v36 = vsub.f32 %v4451_v35, %v4454_v43 }
0x184a   :  { %v4461_v44 = vmul.f32 1.442695, %v4458_v42 }
0x184b   :  { %v4459_v45 = vmul.f32 1.442695, %v4457_v36  ;;  %v4447_v48 = vpop.permute.xlu1 %4446 }
0x184c   :  { %5614 = vpow2.f32 %v4461_v44  ;;  %v4449_v52 = vsel %vm4443_vm4, %v4447_v48, 4294967196  ;;  %v4445_v57 = vpop.permute.xlu0 %4444 }
0x184d   :  { %5616 = vpow2.f32 %v4459_v45  ;;  %v4448_v54 = vsel %vm4442_vm5, %v4445_v57, 4294967196  ;;  %vm4496_vm8 = vcmp.ne.s32.totalorder %v4449_v52, 4294967196 }
0x184e   :  { %vm4495_vm9 = vcmp.ne.s32.totalorder %v4448_v54, 4294967196  ;;  %v4692_v41 = vsel %vm4496_vm8, 1.0, %v5679_v30 }
0x184f   :  { %v4691_v40 = vsel %vm4495_vm9, 1.0, %v5679_v30 }
0x1850   :  { %v5509_v3 = vpack.i.bf16 %v4692_v41, %v4691_v40 }
0x1856   :  { %v5615_v51 = vpop.eup %5614 }
0x1857   :  { %v5617_v53 = vpop.eup %5616  ;;  %4465 = vadd.xlane.f32.xlu0 %v5615_v51 }
0x1858   :  { %4463 = vadd.xlane.f32.xlu1 %v5617_v53 }
0x1869   :  { %4477 = vperm.xlu1 %5508, %v4449_v52  }
0x186d   :  { %4474 = vperm.xlu0 %5507, %v4448_v54  }
0x18e4   :  { %v4466_v56 = vpop.xlane.xlu0 %4465 }
0x18e5   :  { %5618 = vlog2.f32 %v4466_v56  ;;  %v4464_v58 = vpop.xlane.xlu1 %4463 }
0x18e6   :  { %5620 = vlog2.f32 %v4464_v58 }
0x18e9   :  { %v4478_v60 = vpop.permute.xlu1 %4477 }
0x18ea   :  { %vm4480_vm6 = vcmp.eq.s32.totalorder %v5746_v28, %v4478_v60 }
0x18eb   :  { %v4690_v4 = vsel %vm4480_vm6, 1.0, %v5679_v30 }
0x18ec   :  { %v4475_v62 = vpop.permute.xlu0 %4474 }
0x18ed   :  { %vm4479_vm7 = vcmp.eq.s32.totalorder %v5746_v28, %v4475_v62 }
0x18ee   :  { %v4689_v59 = vsel %vm4479_vm7, 1.0, %v5679_v30 }
0x18ef   :  { %v5619_v63 = vpop.eup %5618 }
0x18f0   :  { %v5621_v0 = vpop.eup %5620  ;;  %v4470_v61 = vmul.f32 0.6931472, %v5619_v63 }
0x18f1   :  { %v4468_v47 = vmul.f32 0.6931472, %v5621_v0 }
0x18f2   :  { %v4472_v1 = vadd.f32 %v4470_v61, %v4456_v13 }
0x18f3   :  { %v4471_v2 = vadd.f32 %v4468_v47, %v4454_v43 }
0x18f4   :  { %v4486_v7 = vsub.f32 %v4452_v38, %v4472_v1 }
0x18f5   :  { %v4485_v5 = vsub.f32 %v4451_v35, %v4471_v2 }
0x18f6   :  { %v4488_v6 = vmul.f32 %v4690_v4, %v4486_v7 }
0x18f7   :  { %v4487_v8 = vmul.f32 %v4689_v59, %v4485_v5 }
0x18f8   :  { %4491 = vadd.xlane.f32.xlu0 %v4488_v6 }
0x18f9   :  { %4489 = vadd.xlane.f32.xlu1 %v4487_v8 }
0x190e   :  { %5510 = vrot.lane.b32.xlu0 %v5509_v3, %s5698_s1 }
0x1985   :  { %v4492_v28 = vpop.xlane.xlu0 %4491 }
0x1986   :  { %v4490_v55 = vpop.xlane.xlu1 %4489  ;;  %v4494_v10 = vsub.f32 0.0, %v4492_v28 }
0x1987   :  { %v4493_v9 = vsub.f32 0.0, %v4490_v55 }
0x1988   :  { %v4502_v49 = vmul.f32 %v4692_v41, %v4494_v10 }
0x1989   :  { %v4501_v11 = vmul.f32 %v4691_v40, %v4493_v9  ;;  %v5511_v12 = vpop.permute.xlu0 %5510 }
0x198a   :  { %v5513_v14 = vunpack.i.h.bf16 %v5511_v12  ;;  %v5512_v33 = vunpack.i.l.bf16 %v5511_v12 }
0x198b   :  { %4505 = vrot.lane.b32.xlu1 %v4501_v11, %s5698_s1 }
0x198c   :  { %v4534_v15 = vsel %vm4511_vm10, %v5513_v14, 0.0  ;;  %v4533_v50 = vsel %vm4511_vm10, %v5512_v33, 0.0 }
0x198d   :  { %v4535_v16 = vadd.f32 %v4534_v15, %v4533_v50 }
0x198f   :  { %4507 = vrot.lane.b32.xlu1 %v4502_v49, %s5698_s1  ;;  %4536 = vadd.xlane.f32.xlu0 %v4535_v16 }
0x19fd   :  { %v4506_v30 = vpop.permute.xlu1 %4505 }
0x19fe   :  { %v4512_v18 = vsel %vm4511_vm10, %v4506_v30, 0.0 }
0x1a01   :  { %v4508_v17 = vpop.permute.xlu1 %4507 }
0x1a02   :  { %v4513_v27 = vsel %vm4511_vm10, %v4508_v17, 0.0 }
0x1a03   :  { %v4514_v25 = vadd.f32 %v4513_v27, %v4512_v18 }
0x1a05   :  { %4515 = vadd.xlane.f32.xlu1 %v4514_v25 }
0x1a1c   :  { %v4537_v34 = vpop.xlane.xlu0 %4536 }
0x1a1d   :  { %v4538_v26 = vrot.slane %v4537_v34, 4 }
0x1a1f   :  { %v4539_v19 = vadd.f32 %v4538_v26, %v4537_v34 }
0x1a21   :  { %v4540_v21 = vrot.slane %v4539_v19, 2 }
0x1a23   :  { %v4541_v31 = vadd.f32 %v4540_v21, %v4539_v19 }
0x1a25   :  { %v4542_v20 = vrot.slane %v4541_v31, 1 }
0x1a27   :  { %v4543_v46 = vadd.f32 %v4542_v20, %v4541_v31 }
0x1a92   :  { %v4516_v23 = vpop.xlane.xlu1 %4515 }
0x1a93   :  { %v4517_v24 = vrot.slane %v4516_v23, 4 }
0x1a95   :  { %v4518_v29 = vadd.f32 %v4517_v24, %v4516_v23 }
0x1a97   :  { %v4519_v32 = vrot.slane %v4518_v29, 2 }
0x1a99   :  { %v4520_v37 = vadd.f32 %v4519_v32, %v4518_v29 }
0x1a9b   :  { %v4521_v38 = vrot.slane %v4520_v37, 1 }
0x1a9d   :  { %v4522_v35 = vadd.f32 %v4521_v38, %v4520_v37 }
0x1a9f   :  { %5474 = vpush %v4522_v35 }
0x1aa0   :  { %5476 = vpush %v4543_v46 }
0x1ad0   :  { %s5475_s3 = spop %5474 }
0x1ad1   :  { %s5477_s5 = spop %5476  ;;  %v4524_v13 = vstv %s5475_s3 }
0x1ad2   :  { %v4545_v22 = vstv %s5477_s5 }
0x1ad3   :  { %5622 = vrcp.f32 %v4545_v22 }
0x1add   :  { %v5623_v39 = vpop.eup %5622 }
0x1ade   :  { %v4547_v42 = vmul.f32 %v5623_v39, %v4524_v13 }
0x1ae0   :  { %4549 = vst.msk [vmem:[#allocation8] sm:$0x1] %vm4548_vm11, %v4547_v42 }
0x1ae1   :  { %5659 = shalt.err (!%p5656_p12)
}
0x1ae2   :  { %s5660_s11 = scalar_lea.hbm %s6444_s4, 16 }
0x1ae3   :  { %p5661_p13 = scmp.ne.s32.totalorder %s6444_s4, %s5660_s11  ;;  %p5664_p0 = scmp.lt.u32.totalorder %s5660_s11, %s6444_s4 }
0x1ae5   :  { %p5666_p1 = pnand %p5664_p0, %p5661_p13 }
0x1ae7   :  { %5669 = shalt.err (!%p5666_p1)
}
0x1ae8   :  { %4561 = dma.vmem_to_hbm [thread:$0]  %s4559_s0, 16, %s6444_s4, [#allocation7]  }
0x1ae9   :  { %5672 = dma.done.wait [#allocation7], 16  }
0x1aea   :  { %5673 = vsyncadd [#allocation7], 4294967280 }
0x1aeb   :  { %4567 = vsyncpa [#allocation6], 1 }
0x1aec   :  { %4568 = vsyncpa [#allocation7], 1 }

</bundles_post_ra>
